<compile_context>
chip_gen: v6e
topology: v6e:2x2x1
jax: 0.10.0
libtpu: 0.0.40
codegen_flags: <defaults>
</compile_context>

<pallas_src>
import functools

import jax
import jax.numpy as jnp
import numpy as np
from jax.experimental import pallas as pl
from jax.experimental.pallas import tpu as pltpu

# MXU operand dtype and inter-kernel activation dtype.  bf16 halves operand
# VMEM/vreg footprint and HBM traffic between the pallas_calls; accumulation
# is always f32.  Set both to jnp.float32 for bit-closer PyTorch eval.
MXU_DTYPE = jnp.bfloat16
ACT_DTYPE = jnp.bfloat16


def _vmem_limit_bytes():
    try:
        cap = int(pltpu.get_tpu_info().vmem_capacity_bytes)
    except Exception:
        cap = 64 * 1024 * 1024
    # 3/4 of physical VMEM, capped: ~48 MiB on v7x, 96 MiB on v5e/v6e.
    return min(cap * 3 // 4, 96 * 1024 * 1024)


VMEM_LIMIT_BYTES = _vmem_limit_bytes()


# ----------------------------------------------------------------------------
# Pallas kernels
# ----------------------------------------------------------------------------
def _fused_pair_kernel(*refs, kh, kw, d, s, TH, Wo, nin, act, has_res):
    """One composed (KxK grouped conv + BN + 1x1 conv + BN [+PReLU])
    [+ residual add + PReLU] for one (batch, output-row-tile) grid step.

    Ref order: x refs (nin), w (kh*kw*Cin, Cout), b (1, Cout), [a (1, Cout)],
               [res (1, TH, Wo, Cout), a_out (1, Cout)], out (1, TH, Wo, Cout),
               col scratch (TH*Wo, kh*kw*Cin).
    For s==1 each x ref is (1, Hp, Wp, Cin) (padded image); for s==2 it is the
    phase-decomposed padded image (4, Hp//2, Wp//2, Cin).
    """
    idx = 0
    x_refs = refs[idx:idx + nin]; idx += nin
    w_ref = refs[idx]; idx += 1
    b_ref = refs[idx]; idx += 1
    a_ref = None
    if act:
        a_ref = refs[idx]; idx += 1
    res_ref = aout_ref = None
    if has_res:
        res_ref = refs[idx]; idx += 1
        aout_ref = refs[idx]; idx += 1
    o_ref = refs[idx]; idx += 1
    col_ref = refs[idx]

    cin = x_refs[0].shape[-1]
    cout = w_ref.shape[-1]

    base = pl.program_id(1) * TH            # first output row of this tile
    if TH % 8 == 0:
        base = pl.multiple_of(base, 8)       # unlock aligned vector loads

    if s == 1:
        # Load the full input row window once; the (optional) x1+x2 add of the
        # down-sampling block is done ONCE here, not per tap.
        th_in = TH + d * (kh - 1)
        win = x_refs[0][0, pl.ds(base, th_in), :, :].astype(jnp.float32)
        if nin == 2:
            win = win + x_refs[1][0, pl.ds(base, th_in), :, :].astype(jnp.float32)

    # ---- im2col: pack all taps into one (TH*Wo, kh*kw*Cin) matrix -----------
    for t in range(kh * kw):
        i, j = divmod(t, kw)
        if s == 1:
            tap = win[i * d:i * d + TH, j * d:j * d + Wo, :]
        else:
            # stride 2: padded row 2*(base+ho)+i*d lives in phase (i*d)%2 at
            # plane-row (base+ho)+(i*d)//2 (same for columns) -> contiguous read.
            phs = 2 * ((i * d) % 2) + ((j * d) % 2)
            h0 = base + (i * d) // 2
            w0 = (j * d) // 2
            tap = x_refs[0][phs, pl.ds(h0, TH), pl.ds(w0, Wo), :].astype(jnp.float32)
        col_ref[:, t * cin:(t + 1) * cin] = tap.reshape(TH * Wo, cin)

    # ---- single MXU matmul with the composed (conv-pair + BN) weight --------
    cols = col_ref[...].astype(MXU_DTYPE)
    out = jnp.dot(cols, w_ref[...].astype(MXU_DTYPE),
                  preferred_element_type=jnp.float32) + b_ref[...]

    if act:                                      # PReLU of the 1x1 conv
        a = a_ref[...]
        out = jnp.where(out > 0, out, a * out)

    out = out.reshape(TH, Wo, cout)
    if has_res:                                  # fused residual add + PReLU
        out = out + res_ref[0].astype(jnp.float32)
        ao = aout_ref[...]
        out = jnp.where(out > 0, out, ao * out)

    o_ref[...] = out[None].astype(o_ref.dtype)


def _se_apply_kernel(x_ref, r_ref, g_ref, a_ref, o_ref):
    """Lane-dense elementwise pass: y = PReLU(x * gate + residual).
    Blocks are (1, TH, W*C) so stores are unmasked full-lane vst."""
    y = x_ref[0].astype(jnp.float32) * g_ref[0] + r_ref[0].astype(jnp.float32)
    a = a_ref[...]
    y = jnp.where(y > 0, y, a * y)
    o_ref[...] = y[None].astype(o_ref.dtype)


# ----------------------------------------------------------------------------
# Wrappers
# ----------------------------------------------------------------------------
def _pick_row_tile(Ho, row_bytes, target_bytes=1 << 20):
    """Largest row tile (valid TPU block: multiple of 8 or full extent) whose
    output slab stays under ~1 MiB."""
    cands = [t for t in range(Ho, 0, -1)
             if Ho % t == 0 and (t == Ho or t % 8 == 0)]
    for t in cands:
        if t * row_bytes <= target_bytes:
            return t
    return cands[-1]


def _prep(x, pair):
    """Zero-pad (and for stride 2, even/odd phase-decompose) an NHWC tensor."""
    N, H, W, C = x.shape
    kh, kw, d, s = pair["kh"], pair["kw"], pair["dilation"], pair["stride"]
    ph = d * (kh - 1) // 2
    pw = d * (kw - 1) // 2
    xp = jnp.pad(x, ((0, 0), (ph, ph), (pw, pw), (0, 0)))
    if s == 1:
        return xp
    Hp, Wp = H + 2 * ph, W + 2 * pw
    Hp_e, Wp_e = Hp + (Hp % 2), Wp + (Wp % 2)
    xp = jnp.pad(xp, ((0, 0), (0, Hp_e - Hp), (0, Wp_e - Wp), (0, 0)))
    xp = xp.reshape(N, Hp_e // 2, 2, Wp_e // 2, 2, C)
    xp = jnp.transpose(xp, (0, 2, 4, 1, 3, 5))
    return xp.reshape(N * 4, Hp_e // 2, Wp_e // 2, C)


def fused_pair(xp, pair, hw, *, xp2=None, residual=None, out_slope=None):
    """Run one composed conv pair on a prepped (padded / phase-split) input.

    xp2: optional second prepped input added elementwise before the conv
    (the x1 + x2 of the down block).  residual/out_slope: fused residual add
    + PReLU epilogue.  NHWC activations in ACT_DTYPE.
    """
    H, W = hw
    kh, kw, d, s = pair["kh"], pair["kw"], pair["dilation"], pair["stride"]
    cin, cout = pair["cin"], pair["cout"]
    lead = 1 if s == 1 else 4
    N = xp.shape[0] // lead
    assert xp2 is None or s == 1
    assert (residual is None) == (out_slope is None)

    ph = d * (kh - 1) // 2
    pw = d * (kw - 1) // 2
    Ho = (H + 2 * ph - d * (kh - 1) - 1) // s + 1
    Wo = (W + 2 * pw - d * (kw - 1) - 1) // s + 1
    TH = _pick_row_tile(Ho, Wo * cout * jnp.dtype(ACT_DTYPE).itemsize)
    grid = (N, Ho // TH)

    xb_shape = (lead,) + xp.shape[1:]
    x_spec = pl.BlockSpec(xb_shape, lambda n, r: (n, 0, 0, 0))

    nin = 1 + (xp2 is not None)
    operands = [xp] + ([xp2] if xp2 is not None else [])
    in_specs = [x_spec] * nin

    operands += [pair["w"], pair["b"]]
    in_specs += [
        pl.BlockSpec(pair["w"].shape, lambda n, r: (0, 0)),
        pl.BlockSpec((1, cout), lambda n, r: (0, 0)),
    ]
    act = pair["a"] is not None
    if act:
        operands.append(pair["a"])
        in_specs.append(pl.BlockSpec((1, cout), lambda n, r: (0, 0)))
    has_res = residual is not None
    if has_res:
        operands += [residual, out_slope]
        in_specs += [
            pl.BlockSpec((1, TH, Wo, cout), lambda n, r: (n, r, 0, 0)),
            pl.BlockSpec((1, cout), lambda n, r: (0, 0)),
        ]

    kernel = functools.partial(_fused_pair_kernel, kh=kh, kw=kw, d=d, s=s,
                               TH=TH, Wo=Wo, nin=nin, act=act, has_res=has_res)
    return pl.pallas_call(
        kernel,
        out_shape=jax.ShapeDtypeStruct((N, Ho, Wo, cout), ACT_DTYPE),
        grid=grid,
        in_specs=in_specs,
        out_specs=pl.BlockSpec((1, TH, Wo, cout), lambda n, r: (n, r, 0, 0)),
        scratch_shapes=[pltpu.VMEM((TH * Wo, kh * kw * cin), jnp.float32)],
        compiler_params=pltpu.CompilerParams(
            dimension_semantics=("parallel", "parallel"),
            vmem_limit_bytes=VMEM_LIMIT_BYTES),
    )(*operands)


def se_res_prelu(x, residual, se_p, prelu_a):
    """SE gate (tiny per-image MLP, computed in XLA) then a lane-dense,
    row-tiled Pallas pass: PReLU(x * gate + residual)."""
    N, H, W, C = x.shape
    pooled = jnp.mean(x.astype(jnp.float32), axis=(1, 2))              # (N, C)
    h = jnp.maximum(pooled @ se_p["w1"] + se_p["b1"], 0.0)             # ReLU
    gate = jax.nn.sigmoid(h @ se_p["w2"] + se_p["b2"])                 # (N, C)
    gate_flat = jnp.tile(gate, (1, W))[:, None, :]                     # (N,1,W*C)
    a_flat = jnp.tile(prelu_a, (1, W))                                 # (1, W*C)

    TH = _pick_row_tile(H, W * C * jnp.dtype(ACT_DTYPE).itemsize)
    xf = x.reshape(N, H, W * C)
    rf = residual.reshape(N, H, W * C)
    out = pl.pallas_call(
        _se_apply_kernel,
        out_shape=jax.ShapeDtypeStruct((N, H, W * C), ACT_DTYPE),
        grid=(N, H // TH),
        in_specs=[
            pl.BlockSpec((1, TH, W * C), lambda n, r: (n, r, 0)),
            pl.BlockSpec((1, TH, W * C), lambda n, r: (n, r, 0)),
            pl.BlockSpec((1, 1, W * C), lambda n, r: (n, 0, 0)),
            pl.BlockSpec((1, W * C), lambda n, r: (0, 0)),
        ],
        out_specs=pl.BlockSpec((1, TH, W * C), lambda n, r: (n, r, 0)),
        compiler_params=pltpu.CompilerParams(
            dimension_semantics=("parallel", "parallel"),
            vmem_limit_bytes=VMEM_LIMIT_BYTES),
    )(xf, rf, gate_flat, a_flat)
    return out.reshape(N, H, W, C)


# ----------------------------------------------------------------------------
# Parameter construction (mirrors PyTorch __init__, BN folded, pairs composed)
# ----------------------------------------------------------------------------
def init_convbn(key, cin, cout, k, groups_reduce, prelu, stride, dilation):
    kh, kw = (k, k) if isinstance(k, int) else k
    groups = cin // groups_reduce
    cin_g, cout_g = cin // groups, cout // groups
    k1, k2, k3, k4, k5 = jax.random.split(key, 5)

    w = jax.random.normal(k1, (kh, kw, cin, cout), jnp.float32)
    w = w * (1.0 / np.sqrt(cin_g * kh * kw))
    # block-diagonal mask -> grouped convolution semantics
    ci = jnp.arange(cin)[:, None] // cin_g
    co = jnp.arange(cout)[None, :] // cout_g
    w = w * (ci == co).astype(jnp.float32)[None, None]

    # BatchNorm2d (eval mode) folding — exact.
    gamma = jax.random.uniform(k2, (cout,), minval=0.5, maxval=1.5)
    beta = 0.1 * jax.random.normal(k3, (cout,))
    mean = 0.1 * jax.random.normal(k4, (cout,))
    var = jax.random.uniform(k5, (cout,), minval=0.5, maxval=1.5)
    sc = gamma / jnp.sqrt(var + 1e-5)
    w = w * sc[None, None, None, :]
    b = beta - mean * sc

    return dict(w=w, b=b,
                a=(jnp.full((1, cout), 0.25, jnp.float32) if prelu else None),
                kh=kh, kw=kw, stride=stride, dilation=dilation)


def compose_pair(pa, pb):
    """Fold (KxK conv+BN) -> (1x1 conv+BN [+PReLU]) into ONE conv.
    Exact (up to fp rounding): no activation between the two convs."""
    assert pa["a"] is None and pb["kh"] == 1 and pb["kw"] == 1 and pb["stride"] == 1
    kh, kw = pa["kh"], pa["kw"]
    cin = pa["w"].shape[2]
    w2 = pb["w"][0, 0]                                       # (cmid, cout)
    cout = w2.shape[1]
    w = jnp.einsum("hwim,mo->hwio", pa["w"], w2)              # composed weight
    b = pa["b"] @ w2 + pb["b"]                                # composed bias
    return dict(w=w.reshape(kh * kw * cin, cout).astype(MXU_DTYPE),
                b=b.reshape(1, cout).astype(jnp.float32),
                a=pb["a"],
                kh=kh, kw=kw, stride=pa["stride"], dilation=pa["dilation"],
                cin=cin, cout=cout)


def init_se(key, c, reduction=4):
    cr = max(c // reduction, 1)
    k1, k2, k3, k4 = jax.random.split(key, 4)
    return dict(
        w1=(jax.random.normal(k1, (c, cr)) / np.sqrt(c)).astype(jnp.float32),
        b1=(0.1 * jax.random.normal(k2, (1, cr))).astype(jnp.float32),
        w2=(jax.random.normal(k3, (cr, c)) / np.sqrt(cr)).astype(jnp.float32),
        b2=(0.1 * jax.random.normal(k4, (1, c))).astype(jnp.float32),
    )


def init_vargroup_block(key, c, k, dilation, gr):
    ks = jax.random.split(key, 5)
    ic = 2 * c
    return dict(
        g1=compose_pair(init_convbn(ks[0], c, ic, k, gr, False, 1, dilation),
                        init_convbn(ks[1], ic, c, 1, gr, True, 1, dilation)),
        g2=compose_pair(init_convbn(ks[2], c, ic, k, gr, False, 1, dilation),
                        init_convbn(ks[3], ic, c, 1, gr, False, 1, dilation)),
        se=init_se(ks[4], c),
        prelu_a=jnp.full((1, c), 0.25, jnp.float32),
    )


def init_vargroup_down(key, c, k, dilation, gr):
    ks = jax.random.split(key, 8)
    ic = 2 * c
    return dict(
        b1=compose_pair(init_convbn(ks[0], c, ic, k, gr, False, 2, dilation),
                        init_convbn(ks[1], ic, ic, 1, gr, True, 1, dilation)),
        b2=compose_pair(init_convbn(ks[2], c, ic, k, gr, False, 2, dilation),
                        init_convbn(ks[3], ic, ic, 1, gr, True, 1, dilation)),
        cc=compose_pair(init_convbn(ks[4], ic, 2 * ic, k, gr, False, 1, dilation),
                        init_convbn(ks[5], 2 * ic, ic, 1, gr, False, 1, dilation)),
        sc=compose_pair(init_convbn(ks[6], c, ic, k, gr, False, 2, dilation),
                        init_convbn(ks[7], ic, ic, 1, gr, False, 1, dilation)),
        prelu_a=jnp.full((1, ic), 0.25, jnp.float32),
    )


def init_vargroup_stage(key, in_channels, num_units, k, dilation=1, groups_reduce=8):
    keys = jax.random.split(key, num_units)
    params = [init_vargroup_down(keys[0], in_channels, k, dilation, groups_reduce)]
    c2 = 2 * in_channels
    for i in range(1, num_units):
        params.append(init_vargroup_block(keys[i], c2, k, dilation, groups_reduce))
    return params


# ----------------------------------------------------------------------------
# Forward passes (NHWC internally)
# ----------------------------------------------------------------------------
def vargroup_block_forward(x, p):
    N, H, W, C = x.shape
    residual = x                                     # shortcut = Identity (s=1)
    y = fused_pair(_prep(x, p["g1"]), p["g1"], (H, W))   # 3x3->1x1 (+PReLU), composed
    y = fused_pair(_prep(y, p["g2"]), p["g2"], (H, W))   # 3x3->1x1 (no act), composed
    return se_res_prelu(y, residual, p["se"], p["prelu_a"])


def vargroup_down_forward(x, p):
    N, H, W, C = x.shape
    # One shared pad + phase decomposition for the three stride-2 pairs.
    xp2 = _prep(x, p["sc"])
    residual = fused_pair(xp2, p["sc"], (H, W))      # shortcut: 3x3 s2 -> 1x1
    x1 = fused_pair(xp2, p["b1"], (H, W))            # branch1: 3x3 s2 -> 1x1 PReLU
    x2 = fused_pair(xp2, p["b2"], (H, W))            # branch2: same
    Ho, Wo = x1.shape[1], x1.shape[2]
    # x1 + x2, the concat pair, the residual add and the block PReLU are one call.
    return fused_pair(_prep(x1, p["cc"]), p["cc"], (Ho, Wo),
                      xp2=_prep(x2, p["cc"]),
                      residual=residual, out_slope=p["prelu_a"])


def vargroup_stage_forward(x_nchw, params):
    x = jnp.transpose(x_nchw, (0, 2, 3, 1)).astype(ACT_DTYPE)
    x = vargroup_down_forward(x, params[0])
    for p in params[1:]:
        x = vargroup_block_forward(x, p)
    return jnp.transpose(x, (0, 3, 1, 2)).astype(jnp.float32)


# ----------------------------------------------------------------------------
if __name__ == "__main__":
    key = jax.random.PRNGKey(0)
    kx, kp = jax.random.split(key)

    N, C, H, W = 2, 8, 16, 16
    num_units = 2
    kernel_size = 3
    groups_reduce = 4   # non-trivial grouping at these small channel counts

    x = jax.random.normal(kx, (N, C, H, W), jnp.float32)
    params = init_vargroup_stage(kp, C, num_units, kernel_size,
                                 dilation=1, groups_reduce=groups_reduce)

    fwd = jax.jit(lambda xx: vargroup_stage_forward(xx, params))
    out = fwd(x)
    jax.block_until_ready(out)
    assert out.shape == (N, 2 * C, H // 2, W // 2), out.shape
    assert bool(jnp.all(jnp.isfinite(out)))
    print("KERNEL_OK")
</pallas_src>

<mosaic_0001>
module attributes {stable_mosaic.version = 11 : i64} {
  func.func @_fused_pair_kernel(%arg0: i32, %arg1: i32, %arg2: memref<4x9x9x8xbf16, #tpu.memory_space<vmem>>, %arg3: memref<72x16xbf16, #tpu.memory_space<vmem>>, %arg4: memref<1x16xf32, #tpu.memory_space<vmem>>, %arg5: memref<1x8x8x16xbf16, #tpu.memory_space<vmem>>, %arg6: memref<64x72xf32, #tpu.memory_space<vmem>>) attributes {dimension_semantics = [#tpu.dimension_semantics<parallel>, #tpu.dimension_semantics<parallel>], iteration_bounds = array<i64: 2, 1>, scalar_prefetch = 0 : i64, scratch_operands = 1 : i64, tpu.core_type = #tpu.core_type<tc>, window_params = [{transform_indices = @transform_0, window_bounds = array<i64: 4, 9, 9, 8>}, {pipeline_mode = #tpu.pipeline_mode<synchronous>, transform_indices = @transform_1, window_bounds = array<i64: 72, 16>}, {pipeline_mode = #tpu.pipeline_mode<synchronous>, transform_indices = @transform_2, window_bounds = array<i64: 1, 16>}, {transform_indices = @transform_3, window_bounds = array<i64: 1, 8, 8, 16>}]} {
    %c8_i32 = arith.constant 8 : i32
    %0 = arith.muli %arg1, %c8_i32 : i32
    %1 = tpu.assume_multiple %0, 8 : i32
    %c0_i32 = arith.constant 0 : i32
    %2 = arith.addi %1, %c0_i32 : i32
    %c0 = arith.constant 0 : index
    %3 = arith.index_cast %2 : i32 to index
    %c0_0 = arith.constant 0 : index
    %c0_1 = arith.constant 0 : index
    %4 = vector.load %arg2[%c0, %3, %c0_0, %c0_1] : memref<4x9x9x8xbf16, #tpu.memory_space<vmem>>, vector<1x8x8x8xbf16>
    %5 = vector.shape_cast %4 : vector<1x8x8x8xbf16> to vector<8x8x8xbf16>
    %6 = arith.extf %5 : vector<8x8x8xbf16> to vector<8x8x8xf32>
    %7 = vector.shape_cast %6 : vector<8x8x8xf32> to vector<64x8xf32>
    %c0_2 = arith.constant 0 : index
    %c0_3 = arith.constant 0 : index
    %8 = vector.load %arg6[%c0_2, %c0_3] : memref<64x72xf32, #tpu.memory_space<vmem>>, vector<64x8xf32>
    tpu.vector_store %arg6[%c0_2, %c0_3], %7 {strides = array<i32>} : memref<64x72xf32, #tpu.memory_space<vmem>>, vector<64x8xf32>,
    %c0_i32_4 = arith.constant 0 : i32
    %9 = arith.addi %1, %c0_i32_4 : i32
    %c1 = arith.constant 1 : index
    %10 = arith.index_cast %9 : i32 to index
    %c0_5 = arith.constant 0 : index
    %c0_6 = arith.constant 0 : index
    %11 = vector.load %arg2[%c1, %10, %c0_5, %c0_6] : memref<4x9x9x8xbf16, #tpu.memory_space<vmem>>, vector<1x8x8x8xbf16>
    %12 = vector.shape_cast %11 : vector<1x8x8x8xbf16> to vector<8x8x8xbf16>
    %13 = arith.extf %12 : vector<8x8x8xbf16> to vector<8x8x8xf32>
    %14 = vector.shape_cast %13 : vector<8x8x8xf32> to vector<64x8xf32>
    %c0_7 = arith.constant 0 : index
    %c8 = arith.constant 8 : index
    %15 = vector.load %arg6[%c0_7, %c8] : memref<64x72xf32, #tpu.memory_space<vmem>>, vector<64x8xf32>
    tpu.vector_store %arg6[%c0_7, %c8], %14 {strides = array<i32>} : memref<64x72xf32, #tpu.memory_space<vmem>>, vector<64x8xf32>,
    %c0_i32_8 = arith.constant 0 : i32
    %16 = arith.addi %1, %c0_i32_8 : i32
    %c0_9 = arith.constant 0 : index
    %17 = arith.index_cast %16 : i32 to index
    %c1_10 = arith.constant 1 : index
    %c0_11 = arith.constant 0 : index
    %18 = vector.load %arg2[%c0_9, %17, %c1_10, %c0_11] : memref<4x9x9x8xbf16, #tpu.memory_space<vmem>>, vector<1x8x8x8xbf16>
    %19 = vector.shape_cast %18 : vector<1x8x8x8xbf16> to vector<8x8x8xbf16>
    %20 = arith.extf %19 : vector<8x8x8xbf16> to vector<8x8x8xf32>
    %21 = vector.shape_cast %20 : vector<8x8x8xf32> to vector<64x8xf32>
    %c0_12 = arith.constant 0 : index
    %c16 = arith.constant 16 : index
    %22 = vector.load %arg6[%c0_12, %c16] : memref<64x72xf32, #tpu.memory_space<vmem>>, vector<64x8xf32>
    tpu.vector_store %arg6[%c0_12, %c16], %21 {strides = array<i32>} : memref<64x72xf32, #tpu.memory_space<vmem>>, vector<64x8xf32>,
    %c0_i32_13 = arith.constant 0 : i32
    %23 = arith.addi %1, %c0_i32_13 : i32
    %c2 = arith.constant 2 : index
    %24 = arith.index_cast %23 : i32 to index
    %c0_14 = arith.constant 0 : index
    %c0_15 = arith.constant 0 : index
    %25 = vector.load %arg2[%c2, %24, %c0_14, %c0_15] : memref<4x9x9x8xbf16, #tpu.memory_space<vmem>>, vector<1x8x8x8xbf16>
    %26 = vector.shape_cast %25 : vector<1x8x8x8xbf16> to vector<8x8x8xbf16>
    %27 = arith.extf %26 : vector<8x8x8xbf16> to vector<8x8x8xf32>
    %28 = vector.shape_cast %27 : vector<8x8x8xf32> to vector<64x8xf32>
    %c0_16 = arith.constant 0 : index
    %c24 = arith.constant 24 : index
    %29 = vector.load %arg6[%c0_16, %c24] : memref<64x72xf32, #tpu.memory_space<vmem>>, vector<64x8xf32>
    tpu.vector_store %arg6[%c0_16, %c24], %28 {strides = array<i32>} : memref<64x72xf32, #tpu.memory_space<vmem>>, vector<64x8xf32>,
    %c0_i32_17 = arith.constant 0 : i32
    %30 = arith.addi %1, %c0_i32_17 : i32
    %c3 = arith.constant 3 : index
    %31 = arith.index_cast %30 : i32 to index
    %c0_18 = arith.constant 0 : index
    %c0_19 = arith.constant 0 : index
    %32 = vector.load %arg2[%c3, %31, %c0_18, %c0_19] : memref<4x9x9x8xbf16, #tpu.memory_space<vmem>>, vector<1x8x8x8xbf16>
    %33 = vector.shape_cast %32 : vector<1x8x8x8xbf16> to vector<8x8x8xbf16>
    %34 = arith.extf %33 : vector<8x8x8xbf16> to vector<8x8x8xf32>
    %35 = vector.shape_cast %34 : vector<8x8x8xf32> to vector<64x8xf32>
    %c0_20 = arith.constant 0 : index
    %c32 = arith.constant 32 : index
    %36 = vector.load %arg6[%c0_20, %c32] : memref<64x72xf32, #tpu.memory_space<vmem>>, vector<64x8xf32>
    tpu.vector_store %arg6[%c0_20, %c32], %35 {strides = array<i32>} : memref<64x72xf32, #tpu.memory_space<vmem>>, vector<64x8xf32>,
    %c0_i32_21 = arith.constant 0 : i32
    %37 = arith.addi %1, %c0_i32_21 : i32
    %c2_22 = arith.constant 2 : index
    %38 = arith.index_cast %37 : i32 to index
    %c1_23 = arith.constant 1 : index
    %c0_24 = arith.constant 0 : index
    %39 = vector.load %arg2[%c2_22, %38, %c1_23, %c0_24] : memref<4x9x9x8xbf16, #tpu.memory_space<vmem>>, vector<1x8x8x8xbf16>
    %40 = vector.shape_cast %39 : vector<1x8x8x8xbf16> to vector<8x8x8xbf16>
    %41 = arith.extf %40 : vector<8x8x8xbf16> to vector<8x8x8xf32>
    %42 = vector.shape_cast %41 : vector<8x8x8xf32> to vector<64x8xf32>
    %c0_25 = arith.constant 0 : index
    %c40 = arith.constant 40 : index
    %43 = vector.load %arg6[%c0_25, %c40] : memref<64x72xf32, #tpu.memory_space<vmem>>, vector<64x8xf32>
    tpu.vector_store %arg6[%c0_25, %c40], %42 {strides = array<i32>} : memref<64x72xf32, #tpu.memory_space<vmem>>, vector<64x8xf32>,
    %c1_i32 = arith.constant 1 : i32
    %44 = arith.addi %1, %c1_i32 : i32
    %c0_26 = arith.constant 0 : index
    %45 = arith.index_cast %44 : i32 to index
    %c0_27 = arith.constant 0 : index
    %c0_28 = arith.constant 0 : index
    %46 = vector.load %arg2[%c0_26, %45, %c0_27, %c0_28] : memref<4x9x9x8xbf16, #tpu.memory_space<vmem>>, vector<1x8x8x8xbf16>
    %47 = vector.shape_cast %46 : vector<1x8x8x8xbf16> to vector<8x8x8xbf16>
    %48 = arith.extf %47 : vector<8x8x8xbf16> to vector<8x8x8xf32>
    %49 = vector.shape_cast %48 : vector<8x8x8xf32> to vector<64x8xf32>
    %c0_29 = arith.constant 0 : index
    %c48 = arith.constant 48 : index
    %50 = vector.load %arg6[%c0_29, %c48] : memref<64x72xf32, #tpu.memory_space<vmem>>, vector<64x8xf32>
    tpu.vector_store %arg6[%c0_29, %c48], %49 {strides = array<i32>} : memref<64x72xf32, #tpu.memory_space<vmem>>, vector<64x8xf32>,
    %c1_i32_30 = arith.constant 1 : i32
    %51 = arith.addi %1, %c1_i32_30 : i32
    %c1_31 = arith.constant 1 : index
    %52 = arith.index_cast %51 : i32 to index
    %c0_32 = arith.constant 0 : index
    %c0_33 = arith.constant 0 : index
    %53 = vector.load %arg2[%c1_31, %52, %c0_32, %c0_33] : memref<4x9x9x8xbf16, #tpu.memory_space<vmem>>, vector<1x8x8x8xbf16>
    %54 = vector.shape_cast %53 : vector<1x8x8x8xbf16> to vector<8x8x8xbf16>
    %55 = arith.extf %54 : vector<8x8x8xbf16> to vector<8x8x8xf32>
    %56 = vector.shape_cast %55 : vector<8x8x8xf32> to vector<64x8xf32>
    %c0_34 = arith.constant 0 : index
    %c56 = arith.constant 56 : index
    %57 = vector.load %arg6[%c0_34, %c56] : memref<64x72xf32, #tpu.memory_space<vmem>>, vector<64x8xf32>
    tpu.vector_store %arg6[%c0_34, %c56], %56 {strides = array<i32>} : memref<64x72xf32, #tpu.memory_space<vmem>>, vector<64x8xf32>,
    %c1_i32_35 = arith.constant 1 : i32
    %58 = arith.addi %1, %c1_i32_35 : i32
    %c0_36 = arith.constant 0 : index
    %59 = arith.index_cast %58 : i32 to index
    %c1_37 = arith.constant 1 : index
    %c0_38 = arith.constant 0 : index
    %60 = vector.load %arg2[%c0_36, %59, %c1_37, %c0_38] : memref<4x9x9x8xbf16, #tpu.memory_space<vmem>>, vector<1x8x8x8xbf16>
    %61 = vector.shape_cast %60 : vector<1x8x8x8xbf16> to vector<8x8x8xbf16>
    %62 = arith.extf %61 : vector<8x8x8xbf16> to vector<8x8x8xf32>
    %63 = vector.shape_cast %62 : vector<8x8x8xf32> to vector<64x8xf32>
    %c0_39 = arith.constant 0 : index
    %c64 = arith.constant 64 : index
    %64 = vector.load %arg6[%c0_39, %c64] : memref<64x72xf32, #tpu.memory_space<vmem>>, vector<64x8xf32>
    tpu.vector_store %arg6[%c0_39, %c64], %63 {strides = array<i32>} : memref<64x72xf32, #tpu.memory_space<vmem>>, vector<64x8xf32>,
    %c0_40 = arith.constant 0 : index
    %c0_41 = arith.constant 0 : index
    %65 = vector.load %arg6[%c0_40, %c0_41] : memref<64x72xf32, #tpu.memory_space<vmem>>, vector<64x72xf32>
    %66 = arith.truncf %65 : vector<64x72xf32> to vector<64x72xbf16>
    %c0_42 = arith.constant 0 : index
    %c0_43 = arith.constant 0 : index
    %67 = vector.load %arg3[%c0_42, %c0_43] : memref<72x16xbf16, #tpu.memory_space<vmem>>, vector<72x16xbf16>
    %cst = arith.constant dense<0.000000e+00> : vector<64x16xf32>
    %68 = tpu.matmul %66, %67, %cst {dimension_numbers = #tpu.dot_dimension_numbers<[1], [0], [0], [1], [0, 0, 1, 1], [], []>} : vector<64x72xbf16>, vector<72x16xbf16>, vector<64x16xf32> -> vector<64x16xf32>
    %c0_44 = arith.constant 0 : index
    %c0_45 = arith.constant 0 : index
    %69 = vector.load %arg4[%c0_44, %c0_45] : memref<1x16xf32, #tpu.memory_space<vmem>>, vector<1x16xf32>
    %70 = vector.broadcast %69 : vector<1x16xf32> to vector<64x16xf32>
    %71 = arith.addf %68, %70 : vector<64x16xf32>
    %72 = vector.shape_cast %71 : vector<64x16xf32> to vector<8x8x16xf32>
    %73 = vector.shape_cast %72 : vector<8x8x16xf32> to vector<1x8x8x16xf32>
    %74 = arith.truncf %73 : vector<1x8x8x16xf32> to vector<1x8x8x16xbf16>
    %c0_46 = arith.constant 0 : index
    %c0_47 = arith.constant 0 : index
    %c0_48 = arith.constant 0 : index
    %c0_49 = arith.constant 0 : index
    %75 = vector.load %arg5[%c0_46, %c0_47, %c0_48, %c0_49] : memref<1x8x8x16xbf16, #tpu.memory_space<vmem>>, vector<1x8x8x16xbf16>
    tpu.vector_store %arg5[%c0_46, %c0_47, %c0_48, %c0_49], %74 {strides = array<i32>} : memref<1x8x8x16xbf16, #tpu.memory_space<vmem>>, vector<1x8x8x16xbf16>,
    return
  }
  func.func @transform_0(%arg0: i32, %arg1: i32) -> (i32, i32, i32, i32) {
    %c0_i32 = arith.constant 0 : i32
    %c0_i32_0 = arith.constant 0 : i32
    %c0_i32_1 = arith.constant 0 : i32
    %c0_i32_2 = arith.constant 0 : i32
    return %arg0, %c0_i32, %c0_i32_0, %c0_i32_1 : i32, i32, i32, i32
  }
  func.func @transform_1(%arg0: i32, %arg1: i32) -> (i32, i32) {
    %c0_i32 = arith.constant 0 : i32
    %c0_i32_0 = arith.constant 0 : i32
    %c0_i32_1 = arith.constant 0 : i32
    return %c0_i32, %c0_i32_0 : i32, i32
  }
  func.func @transform_2(%arg0: i32, %arg1: i32) -> (i32, i32) {
    %c0_i32 = arith.constant 0 : i32
    %c0_i32_0 = arith.constant 0 : i32
    %c0_i32_1 = arith.constant 0 : i32
    return %c0_i32, %c0_i32_0 : i32, i32
  }
  func.func @transform_3(%arg0: i32, %arg1: i32) -> (i32, i32, i32, i32) {
    %c0_i32 = arith.constant 0 : i32
    %c0_i32_0 = arith.constant 0 : i32
    %c0_i32_1 = arith.constant 0 : i32
    return %arg0, %arg1, %c0_i32, %c0_i32_0 : i32, i32, i32, i32
  }
}

module attributes {stable_mosaic.version = 11 : i64} {
  func.func @_fused_pair_kernel(%arg0: i32, %arg1: i32, %arg2: memref<4x9x9x8xbf16, #tpu.memory_space<vmem>>, %arg3: memref<72x16xbf16, #tpu.memory_space<vmem>>, %arg4: memref<1x16xf32, #tpu.memory_space<vmem>>, %arg5: memref<1x16xf32, #tpu.memory_space<vmem>>, %arg6: memref<1x8x8x16xbf16, #tpu.memory_space<vmem>>, %arg7: memref<64x72xf32, #tpu.memory_space<vmem>>) attributes {dimension_semantics = [#tpu.dimension_semantics<parallel>, #tpu.dimension_semantics<parallel>], iteration_bounds = array<i64: 2, 1>, scalar_prefetch = 0 : i64, scratch_operands = 1 : i64, tpu.core_type = #tpu.core_type<tc>, window_params = [{transform_indices = @transform_0, window_bounds = array<i64: 4, 9, 9, 8>}, {pipeline_mode = #tpu.pipeline_mode<synchronous>, transform_indices = @transform_1, window_bounds = array<i64: 72, 16>}, {pipeline_mode = #tpu.pipeline_mode<synchronous>, transform_indices = @transform_2, window_bounds = array<i64: 1, 16>}, {pipeline_mode = #tpu.pipeline_mode<synchronous>, transform_indices = @transform_3, window_bounds = array<i64: 1, 16>}, {transform_indices = @transform_4, window_bounds = array<i64: 1, 8, 8, 16>}]} {
    %c8_i32 = arith.constant 8 : i32
    %0 = arith.muli %arg1, %c8_i32 : i32
    %1 = tpu.assume_multiple %0, 8 : i32
    %c0_i32 = arith.constant 0 : i32
    %2 = arith.addi %1, %c0_i32 : i32
    %c0 = arith.constant 0 : index
    %3 = arith.index_cast %2 : i32 to index
    %c0_0 = arith.constant 0 : index
    %c0_1 = arith.constant 0 : index
    %4 = vector.load %arg2[%c0, %3, %c0_0, %c0_1] : memref<4x9x9x8xbf16, #tpu.memory_space<vmem>>, vector<1x8x8x8xbf16>
    %5 = vector.shape_cast %4 : vector<1x8x8x8xbf16> to vector<8x8x8xbf16>
    %6 = arith.extf %5 : vector<8x8x8xbf16> to vector<8x8x8xf32>
    %7 = vector.shape_cast %6 : vector<8x8x8xf32> to vector<64x8xf32>
    %c0_2 = arith.constant 0 : index
    %c0_3 = arith.constant 0 : index
    %8 = vector.load %arg7[%c0_2, %c0_3] : memref<64x72xf32, #tpu.memory_space<vmem>>, vector<64x8xf32>
    tpu.vector_store %arg7[%c0_2, %c0_3], %7 {strides = array<i32>} : memref<64x72xf32, #tpu.memory_space<vmem>>, vector<64x8xf32>,
    %c0_i32_4 = arith.constant 0 : i32
    %9 = arith.addi %1, %c0_i32_4 : i32
    %c1 = arith.constant 1 : index
    %10 = arith.index_cast %9 : i32 to index
    %c0_5 = arith.constant 0 : index
    %c0_6 = arith.constant 0 : index
    %11 = vector.load %arg2[%c1, %10, %c0_5, %c0_6] : memref<4x9x9x8xbf16, #tpu.memory_space<vmem>>, vector<1x8x8x8xbf16>
    %12 = vector.shape_cast %11 : vector<1x8x8x8xbf16> to vector<8x8x8xbf16>
    %13 = arith.extf %12 : vector<8x8x8xbf16> to vector<8x8x8xf32>
    %14 = vector.shape_cast %13 : vector<8x8x8xf32> to vector<64x8xf32>
    %c0_7 = arith.constant 0 : index
    %c8 = arith.constant 8 : index
    %15 = vector.load %arg7[%c0_7, %c8] : memref<64x72xf32, #tpu.memory_space<vmem>>, vector<64x8xf32>
    tpu.vector_store %arg7[%c0_7, %c8], %14 {strides = array<i32>} : memref<64x72xf32, #tpu.memory_space<vmem>>, vector<64x8xf32>,
    %c0_i32_8 = arith.constant 0 : i32
    %16 = arith.addi %1, %c0_i32_8 : i32
    %c0_9 = arith.constant 0 : index
    %17 = arith.index_cast %16 : i32 to index
    %c1_10 = arith.constant 1 : index
    %c0_11 = arith.constant 0 : index
    %18 = vector.load %arg2[%c0_9, %17, %c1_10, %c0_11] : memref<4x9x9x8xbf16, #tpu.memory_space<vmem>>, vector<1x8x8x8xbf16>
    %19 = vector.shape_cast %18 : vector<1x8x8x8xbf16> to vector<8x8x8xbf16>
    %20 = arith.extf %19 : vector<8x8x8xbf16> to vector<8x8x8xf32>
    %21 = vector.shape_cast %20 : vector<8x8x8xf32> to vector<64x8xf32>
    %c0_12 = arith.constant 0 : index
    %c16 = arith.constant 16 : index
    %22 = vector.load %arg7[%c0_12, %c16] : memref<64x72xf32, #tpu.memory_space<vmem>>, vector<64x8xf32>
    tpu.vector_store %arg7[%c0_12, %c16], %21 {strides = array<i32>} : memref<64x72xf32, #tpu.memory_space<vmem>>, vector<64x8xf32>,
    %c0_i32_13 = arith.constant 0 : i32
    %23 = arith.addi %1, %c0_i32_13 : i32
    %c2 = arith.constant 2 : index
    %24 = arith.index_cast %23 : i32 to index
    %c0_14 = arith.constant 0 : index
    %c0_15 = arith.constant 0 : index
    %25 = vector.load %arg2[%c2, %24, %c0_14, %c0_15] : memref<4x9x9x8xbf16, #tpu.memory_space<vmem>>, vector<1x8x8x8xbf16>
    %26 = vector.shape_cast %25 : vector<1x8x8x8xbf16> to vector<8x8x8xbf16>
    %27 = arith.extf %26 : vector<8x8x8xbf16> to vector<8x8x8xf32>
    %28 = vector.shape_cast %27 : vector<8x8x8xf32> to vector<64x8xf32>
    %c0_16 = arith.constant 0 : index
    %c24 = arith.constant 24 : index
    %29 = vector.load %arg7[%c0_16, %c24] : memref<64x72xf32, #tpu.memory_space<vmem>>, vector<64x8xf32>
    tpu.vector_store %arg7[%c0_16, %c24], %28 {strides = array<i32>} : memref<64x72xf32, #tpu.memory_space<vmem>>, vector<64x8xf32>,
    %c0_i32_17 = arith.constant 0 : i32
    %30 = arith.addi %1, %c0_i32_17 : i32
    %c3 = arith.constant 3 : index
    %31 = arith.index_cast %30 : i32 to index
    %c0_18 = arith.constant 0 : index
    %c0_19 = arith.constant 0 : index
    %32 = vector.load %arg2[%c3, %31, %c0_18, %c0_19] : memref<4x9x9x8xbf16, #tpu.memory_space<vmem>>, vector<1x8x8x8xbf16>
    %33 = vector.shape_cast %32 : vector<1x8x8x8xbf16> to vector<8x8x8xbf16>
    %34 = arith.extf %33 : vector<8x8x8xbf16> to vector<8x8x8xf32>
    %35 = vector.shape_cast %34 : vector<8x8x8xf32> to vector<64x8xf32>
    %c0_20 = arith.constant 0 : index
    %c32 = arith.constant 32 : index
    %36 = vector.load %arg7[%c0_20, %c32] : memref<64x72xf32, #tpu.memory_space<vmem>>, vector<64x8xf32>
    tpu.vector_store %arg7[%c0_20, %c32], %35 {strides = array<i32>} : memref<64x72xf32, #tpu.memory_space<vmem>>, vector<64x8xf32>,
    %c0_i32_21 = arith.constant 0 : i32
    %37 = arith.addi %1, %c0_i32_21 : i32
    %c2_22 = arith.constant 2 : index
    %38 = arith.index_cast %37 : i32 to index
    %c1_23 = arith.constant 1 : index
    %c0_24 = arith.constant 0 : index
    %39 = vector.load %arg2[%c2_22, %38, %c1_23, %c0_24] : memref<4x9x9x8xbf16, #tpu.memory_space<vmem>>, vector<1x8x8x8xbf16>
    %40 = vector.shape_cast %39 : vector<1x8x8x8xbf16> to vector<8x8x8xbf16>
    %41 = arith.extf %40 : vector<8x8x8xbf16> to vector<8x8x8xf32>
    %42 = vector.shape_cast %41 : vector<8x8x8xf32> to vector<64x8xf32>
    %c0_25 = arith.constant 0 : index
    %c40 = arith.constant 40 : index
    %43 = vector.load %arg7[%c0_25, %c40] : memref<64x72xf32, #tpu.memory_space<vmem>>, vector<64x8xf32>
    tpu.vector_store %arg7[%c0_25, %c40], %42 {strides = array<i32>} : memref<64x72xf32, #tpu.memory_space<vmem>>, vector<64x8xf32>,
    %c1_i32 = arith.constant 1 : i32
    %44 = arith.addi %1, %c1_i32 : i32
    %c0_26 = arith.constant 0 : index
    %45 = arith.index_cast %44 : i32 to index
    %c0_27 = arith.constant 0 : index
    %c0_28 = arith.constant 0 : index
    %46 = vector.load %arg2[%c0_26, %45, %c0_27, %c0_28] : memref<4x9x9x8xbf16, #tpu.memory_space<vmem>>, vector<1x8x8x8xbf16>
    %47 = vector.shape_cast %46 : vector<1x8x8x8xbf16> to vector<8x8x8xbf16>
    %48 = arith.extf %47 : vector<8x8x8xbf16> to vector<8x8x8xf32>
    %49 = vector.shape_cast %48 : vector<8x8x8xf32> to vector<64x8xf32>
    %c0_29 = arith.constant 0 : index
    %c48 = arith.constant 48 : index
    %50 = vector.load %arg7[%c0_29, %c48] : memref<64x72xf32, #tpu.memory_space<vmem>>, vector<64x8xf32>
    tpu.vector_store %arg7[%c0_29, %c48], %49 {strides = array<i32>} : memref<64x72xf32, #tpu.memory_space<vmem>>, vector<64x8xf32>,
    %c1_i32_30 = arith.constant 1 : i32
    %51 = arith.addi %1, %c1_i32_30 : i32
    %c1_31 = arith.constant 1 : index
    %52 = arith.index_cast %51 : i32 to index
    %c0_32 = arith.constant 0 : index
    %c0_33 = arith.constant 0 : index
    %53 = vector.load %arg2[%c1_31, %52, %c0_32, %c0_33] : memref<4x9x9x8xbf16, #tpu.memory_space<vmem>>, vector<1x8x8x8xbf16>
    %54 = vector.shape_cast %53 : vector<1x8x8x8xbf16> to vector<8x8x8xbf16>
    %55 = arith.extf %54 : vector<8x8x8xbf16> to vector<8x8x8xf32>
    %56 = vector.shape_cast %55 : vector<8x8x8xf32> to vector<64x8xf32>
    %c0_34 = arith.constant 0 : index
    %c56 = arith.constant 56 : index
    %57 = vector.load %arg7[%c0_34, %c56] : memref<64x72xf32, #tpu.memory_space<vmem>>, vector<64x8xf32>
    tpu.vector_store %arg7[%c0_34, %c56], %56 {strides = array<i32>} : memref<64x72xf32, #tpu.memory_space<vmem>>, vector<64x8xf32>,
    %c1_i32_35 = arith.constant 1 : i32
    %58 = arith.addi %1, %c1_i32_35 : i32
    %c0_36 = arith.constant 0 : index
    %59 = arith.index_cast %58 : i32 to index
    %c1_37 = arith.constant 1 : index
    %c0_38 = arith.constant 0 : index
    %60 = vector.load %arg2[%c0_36, %59, %c1_37, %c0_38] : memref<4x9x9x8xbf16, #tpu.memory_space<vmem>>, vector<1x8x8x8xbf16>
    %61 = vector.shape_cast %60 : vector<1x8x8x8xbf16> to vector<8x8x8xbf16>
    %62 = arith.extf %61 : vector<8x8x8xbf16> to vector<8x8x8xf32>
    %63 = vector.shape_cast %62 : vector<8x8x8xf32> to vector<64x8xf32>
    %c0_39 = arith.constant 0 : index
    %c64 = arith.constant 64 : index
    %64 = vector.load %arg7[%c0_39, %c64] : memref<64x72xf32, #tpu.memory_space<vmem>>, vector<64x8xf32>
    tpu.vector_store %arg7[%c0_39, %c64], %63 {strides = array<i32>} : memref<64x72xf32, #tpu.memory_space<vmem>>, vector<64x8xf32>,
    %c0_40 = arith.constant 0 : index
    %c0_41 = arith.constant 0 : index
    %65 = vector.load %arg7[%c0_40, %c0_41] : memref<64x72xf32, #tpu.memory_space<vmem>>, vector<64x72xf32>
    %66 = arith.truncf %65 : vector<64x72xf32> to vector<64x72xbf16>
    %c0_42 = arith.constant 0 : index
    %c0_43 = arith.constant 0 : index
    %67 = vector.load %arg3[%c0_42, %c0_43] : memref<72x16xbf16, #tpu.memory_space<vmem>>, vector<72x16xbf16>
    %cst = arith.constant dense<0.000000e+00> : vector<64x16xf32>
    %68 = tpu.matmul %66, %67, %cst {dimension_numbers = #tpu.dot_dimension_numbers<[1], [0], [0], [1], [0, 0, 1, 1], [], []>} : vector<64x72xbf16>, vector<72x16xbf16>, vector<64x16xf32> -> vector<64x16xf32>
    %c0_44 = arith.constant 0 : index
    %c0_45 = arith.constant 0 : index
    %69 = vector.load %arg4[%c0_44, %c0_45] : memref<1x16xf32, #tpu.memory_space<vmem>>, vector<1x16xf32>
    %70 = vector.broadcast %69 : vector<1x16xf32> to vector<64x16xf32>
    %71 = arith.addf %68, %70 : vector<64x16xf32>
    %c0_46 = arith.constant 0 : index
    %c0_47 = arith.constant 0 : index
    %72 = vector.load %arg5[%c0_46, %c0_47] : memref<1x16xf32, #tpu.memory_space<vmem>>, vector<1x16xf32>
    %cst_48 = arith.constant 0.000000e+00 : f32
    %73 = vector.broadcast %cst_48 : f32 to vector<64x16xf32>
    %74 = arith.cmpf ogt, %71, %73 : vector<64x16xf32>
    %75 = vector.broadcast %72 : vector<1x16xf32> to vector<64x16xf32>
    %76 = arith.mulf %75, %71 : vector<64x16xf32>
    %77 = arith.select %74, %71, %76 : vector<64x16xi1>, vector<64x16xf32>
    %78 = vector.shape_cast %77 : vector<64x16xf32> to vector<8x8x16xf32>
    %79 = vector.shape_cast %78 : vector<8x8x16xf32> to vector<1x8x8x16xf32>
    %80 = arith.truncf %79 : vector<1x8x8x16xf32> to vector<1x8x8x16xbf16>
    %c0_49 = arith.constant 0 : index
    %c0_50 = arith.constant 0 : index
    %c0_51 = arith.constant 0 : index
    %c0_52 = arith.constant 0 : index
    %81 = vector.load %arg6[%c0_49, %c0_50, %c0_51, %c0_52] : memref<1x8x8x16xbf16, #tpu.memory_space<vmem>>, vector<1x8x8x16xbf16>
    tpu.vector_store %arg6[%c0_49, %c0_50, %c0_51, %c0_52], %80 {strides = array<i32>} : memref<1x8x8x16xbf16, #tpu.memory_space<vmem>>, vector<1x8x8x16xbf16>,
    return
  }
  func.func @transform_0(%arg0: i32, %arg1: i32) -> (i32, i32, i32, i32) {
    %c0_i32 = arith.constant 0 : i32
    %c0_i32_0 = arith.constant 0 : i32
    %c0_i32_1 = arith.constant 0 : i32
    %c0_i32_2 = arith.constant 0 : i32
    return %arg0, %c0_i32, %c0_i32_0, %c0_i32_1 : i32, i32, i32, i32
  }
  func.func @transform_1(%arg0: i32, %arg1: i32) -> (i32, i32) {
    %c0_i32 = arith.constant 0 : i32
    %c0_i32_0 = arith.constant 0 : i32
    %c0_i32_1 = arith.constant 0 : i32
    return %c0_i32, %c0_i32_0 : i32, i32
  }
  func.func @transform_2(%arg0: i32, %arg1: i32) -> (i32, i32) {
    %c0_i32 = arith.constant 0 : i32
    %c0_i32_0 = arith.constant 0 : i32
    %c0_i32_1 = arith.constant 0 : i32
    return %c0_i32, %c0_i32_0 : i32, i32
  }
  func.func @transform_3(%arg0: i32, %arg1: i32) -> (i32, i32) {
    %c0_i32 = arith.constant 0 : i32
    %c0_i32_0 = arith.constant 0 : i32
    %c0_i32_1 = arith.constant 0 : i32
    return %c0_i32, %c0_i32_0 : i32, i32
  }
  func.func @transform_4(%arg0: i32, %arg1: i32) -> (i32, i32, i32, i32) {
    %c0_i32 = arith.constant 0 : i32
    %c0_i32_0 = arith.constant 0 : i32
    %c0_i32_1 = arith.constant 0 : i32
    return %arg0, %arg1, %c0_i32, %c0_i32_0 : i32, i32, i32, i32
  }
}

module attributes {stable_mosaic.version = 11 : i64} {
  func.func @_fused_pair_kernel(%arg0: i32, %arg1: i32, %arg2: memref<1x10x10x16xbf16, #tpu.memory_space<vmem>>, %arg3: memref<1x10x10x16xbf16, #tpu.memory_space<vmem>>, %arg4: memref<144x16xbf16, #tpu.memory_space<vmem>>, %arg5: memref<1x16xf32, #tpu.memory_space<vmem>>, %arg6: memref<1x8x8x16xbf16, #tpu.memory_space<vmem>>, %arg7: memref<1x16xf32, #tpu.memory_space<vmem>>, %arg8: memref<1x8x8x16xbf16, #tpu.memory_space<vmem>>, %arg9: memref<64x144xf32, #tpu.memory_space<vmem>>) attributes {dimension_semantics = [#tpu.dimension_semantics<parallel>, #tpu.dimension_semantics<parallel>], iteration_bounds = array<i64: 2, 1>, scalar_prefetch = 0 : i64, scratch_operands = 1 : i64, tpu.core_type = #tpu.core_type<tc>, window_params = [{transform_indices = @transform_0, window_bounds = array<i64: 1, 10, 10, 16>}, {transform_indices = @transform_1, window_bounds = array<i64: 1, 10, 10, 16>}, {pipeline_mode = #tpu.pipeline_mode<synchronous>, transform_indices = @transform_2, window_bounds = array<i64: 144, 16>}, {pipeline_mode = #tpu.pipeline_mode<synchronous>, transform_indices = @transform_3, window_bounds = array<i64: 1, 16>}, {transform_indices = @transform_4, window_bounds = array<i64: 1, 8, 8, 16>}, {pipeline_mode = #tpu.pipeline_mode<synchronous>, transform_indices = @transform_5, window_bounds = array<i64: 1, 16>}, {transform_indices = @transform_6, window_bounds = array<i64: 1, 8, 8, 16>}]} {
    %c8_i32 = arith.constant 8 : i32
    %0 = arith.muli %arg1, %c8_i32 : i32
    %1 = tpu.assume_multiple %0, 8 : i32
    %c0 = arith.constant 0 : index
    %2 = arith.index_cast %1 : i32 to index
    %c0_0 = arith.constant 0 : index
    %c0_1 = arith.constant 0 : index
    %3 = vector.load %arg2[%c0, %2, %c0_0, %c0_1] : memref<1x10x10x16xbf16, #tpu.memory_space<vmem>>, vector<1x10x10x16xbf16>
    %4 = vector.shape_cast %3 : vector<1x10x10x16xbf16> to vector<10x10x16xbf16>
    %5 = arith.extf %4 : vector<10x10x16xbf16> to vector<10x10x16xf32>
    %c0_2 = arith.constant 0 : index
    %6 = arith.index_cast %1 : i32 to index
    %c0_3 = arith.constant 0 : index
    %c0_4 = arith.constant 0 : index
    %7 = vector.load %arg3[%c0_2, %6, %c0_3, %c0_4] : memref<1x10x10x16xbf16, #tpu.memory_space<vmem>>, vector<1x10x10x16xbf16>
    %8 = vector.shape_cast %7 : vector<1x10x10x16xbf16> to vector<10x10x16xbf16>
    %9 = arith.extf %8 : vector<10x10x16xbf16> to vector<10x10x16xf32>
    %10 = arith.addf %5, %9 : vector<10x10x16xf32>
    %11 = vector.extract_strided_slice %10 {offsets = [0, 0, 0], sizes = [8, 8, 16], strides = [1, 1, 1]} : vector<10x10x16xf32> to vector<8x8x16xf32>
    %12 = vector.shape_cast %11 : vector<8x8x16xf32> to vector<64x16xf32>
    %c0_5 = arith.constant 0 : index
    %c0_6 = arith.constant 0 : index
    %13 = vector.load %arg9[%c0_5, %c0_6] : memref<64x144xf32, #tpu.memory_space<vmem>>, vector<64x16xf32>
    tpu.vector_store %arg9[%c0_5, %c0_6], %12 {strides = array<i32>} : memref<64x144xf32, #tpu.memory_space<vmem>>, vector<64x16xf32>,
    %14 = vector.extract_strided_slice %10 {offsets = [0, 1, 0], sizes = [8, 8, 16], strides = [1, 1, 1]} : vector<10x10x16xf32> to vector<8x8x16xf32>
    %15 = vector.shape_cast %14 : vector<8x8x16xf32> to vector<64x16xf32>
    %c0_7 = arith.constant 0 : index
    %c16 = arith.constant 16 : index
    %16 = vector.load %arg9[%c0_7, %c16] : memref<64x144xf32, #tpu.memory_space<vmem>>, vector<64x16xf32>
    tpu.vector_store %arg9[%c0_7, %c16], %15 {strides = array<i32>} : memref<64x144xf32, #tpu.memory_space<vmem>>, vector<64x16xf32>,
    %17 = vector.extract_strided_slice %10 {offsets = [0, 2, 0], sizes = [8, 8, 16], strides = [1, 1, 1]} : vector<10x10x16xf32> to vector<8x8x16xf32>
    %18 = vector.shape_cast %17 : vector<8x8x16xf32> to vector<64x16xf32>
    %c0_8 = arith.constant 0 : index
    %c32 = arith.constant 32 : index
    %19 = vector.load %arg9[%c0_8, %c32] : memref<64x144xf32, #tpu.memory_space<vmem>>, vector<64x16xf32>
    tpu.vector_store %arg9[%c0_8, %c32], %18 {strides = array<i32>} : memref<64x144xf32, #tpu.memory_space<vmem>>, vector<64x16xf32>,
    %20 = vector.extract_strided_slice %10 {offsets = [1, 0, 0], sizes = [8, 8, 16], strides = [1, 1, 1]} : vector<10x10x16xf32> to vector<8x8x16xf32>
    %21 = vector.shape_cast %20 : vector<8x8x16xf32> to vector<64x16xf32>
    %c0_9 = arith.constant 0 : index
    %c48 = arith.constant 48 : index
    %22 = vector.load %arg9[%c0_9, %c48] : memref<64x144xf32, #tpu.memory_space<vmem>>, vector<64x16xf32>
    tpu.vector_store %arg9[%c0_9, %c48], %21 {strides = array<i32>} : memref<64x144xf32, #tpu.memory_space<vmem>>, vector<64x16xf32>,
    %23 = vector.extract_strided_slice %10 {offsets = [1, 1, 0], sizes = [8, 8, 16], strides = [1, 1, 1]} : vector<10x10x16xf32> to vector<8x8x16xf32>
    %24 = vector.shape_cast %23 : vector<8x8x16xf32> to vector<64x16xf32>
    %c0_10 = arith.constant 0 : index
    %c64 = arith.constant 64 : index
    %25 = vector.load %arg9[%c0_10, %c64] : memref<64x144xf32, #tpu.memory_space<vmem>>, vector<64x16xf32>
    tpu.vector_store %arg9[%c0_10, %c64], %24 {strides = array<i32>} : memref<64x144xf32, #tpu.memory_space<vmem>>, vector<64x16xf32>,
    %26 = vector.extract_strided_slice %10 {offsets = [1, 2, 0], sizes = [8, 8, 16], strides = [1, 1, 1]} : vector<10x10x16xf32> to vector<8x8x16xf32>
    %27 = vector.shape_cast %26 : vector<8x8x16xf32> to vector<64x16xf32>
    %c0_11 = arith.constant 0 : index
    %c80 = arith.constant 80 : index
    %28 = vector.load %arg9[%c0_11, %c80] : memref<64x144xf32, #tpu.memory_space<vmem>>, vector<64x16xf32>
    tpu.vector_store %arg9[%c0_11, %c80], %27 {strides = array<i32>} : memref<64x144xf32, #tpu.memory_space<vmem>>, vector<64x16xf32>,
    %29 = vector.extract_strided_slice %10 {offsets = [2, 0, 0], sizes = [8, 8, 16], strides = [1, 1, 1]} : vector<10x10x16xf32> to vector<8x8x16xf32>
    %30 = vector.shape_cast %29 : vector<8x8x16xf32> to vector<64x16xf32>
    %c0_12 = arith.constant 0 : index
    %c96 = arith.constant 96 : index
    %31 = vector.load %arg9[%c0_12, %c96] : memref<64x144xf32, #tpu.memory_space<vmem>>, vector<64x16xf32>
    tpu.vector_store %arg9[%c0_12, %c96], %30 {strides = array<i32>} : memref<64x144xf32, #tpu.memory_space<vmem>>, vector<64x16xf32>,
    %32 = vector.extract_strided_slice %10 {offsets = [2, 1, 0], sizes = [8, 8, 16], strides = [1, 1, 1]} : vector<10x10x16xf32> to vector<8x8x16xf32>
    %33 = vector.shape_cast %32 : vector<8x8x16xf32> to vector<64x16xf32>
    %c0_13 = arith.constant 0 : index
    %c112 = arith.constant 112 : index
    %34 = vector.load %arg9[%c0_13, %c112] : memref<64x144xf32, #tpu.memory_space<vmem>>, vector<64x16xf32>
    tpu.vector_store %arg9[%c0_13, %c112], %33 {strides = array<i32>} : memref<64x144xf32, #tpu.memory_space<vmem>>, vector<64x16xf32>,
    %35 = vector.extract_strided_slice %10 {offsets = [2, 2, 0], sizes = [8, 8, 16], strides = [1, 1, 1]} : vector<10x10x16xf32> to vector<8x8x16xf32>
    %36 = vector.shape_cast %35 : vector<8x8x16xf32> to vector<64x16xf32>
    %c0_14 = arith.constant 0 : index
    %c128 = arith.constant 128 : index
    %37 = vector.load %arg9[%c0_14, %c128] : memref<64x144xf32, #tpu.memory_space<vmem>>, vector<64x16xf32>
    tpu.vector_store %arg9[%c0_14, %c128], %36 {strides = array<i32>} : memref<64x144xf32, #tpu.memory_space<vmem>>, vector<64x16xf32>,
    %c0_15 = arith.constant 0 : index
    %c0_16 = arith.constant 0 : index
    %38 = vector.load %arg9[%c0_15, %c0_16] : memref<64x144xf32, #tpu.memory_space<vmem>>, vector<64x144xf32>
    %39 = arith.truncf %38 : vector<64x144xf32> to vector<64x144xbf16>
    %c0_17 = arith.constant 0 : index
    %c0_18 = arith.constant 0 : index
    %40 = vector.load %arg4[%c0_17, %c0_18] : memref<144x16xbf16, #tpu.memory_space<vmem>>, vector<144x16xbf16>
    %cst = arith.constant dense<0.000000e+00> : vector<64x16xf32>
    %41 = tpu.matmul %39, %40, %cst {dimension_numbers = #tpu.dot_dimension_numbers<[1], [0], [0], [1], [0, 0, 1, 1], [], []>} : vector<64x144xbf16>, vector<144x16xbf16>, vector<64x16xf32> -> vector<64x16xf32>
    %c0_19 = arith.constant 0 : index
    %c0_20 = arith.constant 0 : index
    %42 = vector.load %arg5[%c0_19, %c0_20] : memref<1x16xf32, #tpu.memory_space<vmem>>, vector<1x16xf32>
    %43 = vector.broadcast %42 : vector<1x16xf32> to vector<64x16xf32>
    %44 = arith.addf %41, %43 : vector<64x16xf32>
    %45 = vector.shape_cast %44 : vector<64x16xf32> to vector<8x8x16xf32>
    %c0_21 = arith.constant 0 : index
    %c0_22 = arith.constant 0 : index
    %c0_23 = arith.constant 0 : index
    %c0_24 = arith.constant 0 : index
    %46 = vector.load %arg6[%c0_21, %c0_22, %c0_23, %c0_24] : memref<1x8x8x16xbf16, #tpu.memory_space<vmem>>, vector<1x8x8x16xbf16>
    %47 = vector.shape_cast %46 : vector<1x8x8x16xbf16> to vector<8x8x16xbf16>
    %48 = arith.extf %47 : vector<8x8x16xbf16> to vector<8x8x16xf32>
    %49 = arith.addf %45, %48 : vector<8x8x16xf32>
    %c0_25 = arith.constant 0 : index
    %c0_26 = arith.constant 0 : index
    %50 = vector.load %arg7[%c0_25, %c0_26] : memref<1x16xf32, #tpu.memory_space<vmem>>, vector<1x16xf32>
    %cst_27 = arith.constant 0.000000e+00 : f32
    %51 = vector.broadcast %cst_27 : f32 to vector<8x8x16xf32>
    %52 = arith.cmpf ogt, %49, %51 : vector<8x8x16xf32>
    %53 = vector.shape_cast %50 : vector<1x16xf32> to vector<1x1x16xf32>
    %54 = vector.broadcast %53 : vector<1x1x16xf32> to vector<8x8x16xf32>
    %55 = arith.mulf %54, %49 : vector<8x8x16xf32>
    %56 = arith.select %52, %49, %55 : vector<8x8x16xi1>, vector<8x8x16xf32>
    %57 = vector.shape_cast %56 : vector<8x8x16xf32> to vector<1x8x8x16xf32>
    %58 = arith.truncf %57 : vector<1x8x8x16xf32> to vector<1x8x8x16xbf16>
    %c0_28 = arith.constant 0 : index
    %c0_29 = arith.constant 0 : index
    %c0_30 = arith.constant 0 : index
    %c0_31 = arith.constant 0 : index
    %59 = vector.load %arg8[%c0_28, %c0_29, %c0_30, %c0_31] : memref<1x8x8x16xbf16, #tpu.memory_space<vmem>>, vector<1x8x8x16xbf16>
    tpu.vector_store %arg8[%c0_28, %c0_29, %c0_30, %c0_31], %58 {strides = array<i32>} : memref<1x8x8x16xbf16, #tpu.memory_space<vmem>>, vector<1x8x8x16xbf16>,
    return
  }
  func.func @transform_0(%arg0: i32, %arg1: i32) -> (i32, i32, i32, i32) {
    %c0_i32 = arith.constant 0 : i32
    %c0_i32_0 = arith.constant 0 : i32
    %c0_i32_1 = arith.constant 0 : i32
    %c0_i32_2 = arith.constant 0 : i32
    return %arg0, %c0_i32, %c0_i32_0, %c0_i32_1 : i32, i32, i32, i32
  }
  func.func @transform_1(%arg0: i32, %arg1: i32) -> (i32, i32, i32, i32) {
    %c0_i32 = arith.constant 0 : i32
    %c0_i32_0 = arith.constant 0 : i32
    %c0_i32_1 = arith.constant 0 : i32
    %c0_i32_2 = arith.constant 0 : i32
    return %arg0, %c0_i32, %c0_i32_0, %c0_i32_1 : i32, i32, i32, i32
  }
  func.func @transform_2(%arg0: i32, %arg1: i32) -> (i32, i32) {
    %c0_i32 = arith.constant 0 : i32
    %c0_i32_0 = arith.constant 0 : i32
    %c0_i32_1 = arith.constant 0 : i32
    return %c0_i32, %c0_i32_0 : i32, i32
  }
  func.func @transform_3(%arg0: i32, %arg1: i32) -> (i32, i32) {
    %c0_i32 = arith.constant 0 : i32
    %c0_i32_0 = arith.constant 0 : i32
    %c0_i32_1 = arith.constant 0 : i32
    return %c0_i32, %c0_i32_0 : i32, i32
  }
  func.func @transform_4(%arg0: i32, %arg1: i32) -> (i32, i32, i32, i32) {
    %c0_i32 = arith.constant 0 : i32
    %c0_i32_0 = arith.constant 0 : i32
    %c0_i32_1 = arith.constant 0 : i32
    return %arg0, %arg1, %c0_i32, %c0_i32_0 : i32, i32, i32, i32
  }
  func.func @transform_5(%arg0: i32, %arg1: i32) -> (i32, i32) {
    %c0_i32 = arith.constant 0 : i32
    %c0_i32_0 = arith.constant 0 : i32
    %c0_i32_1 = arith.constant 0 : i32
    return %c0_i32, %c0_i32_0 : i32, i32
  }
  func.func @transform_6(%arg0: i32, %arg1: i32) -> (i32, i32, i32, i32) {
    %c0_i32 = arith.constant 0 : i32
    %c0_i32_0 = arith.constant 0 : i32
    %c0_i32_1 = arith.constant 0 : i32
    return %arg0, %arg1, %c0_i32, %c0_i32_0 : i32, i32, i32, i32
  }
}

module attributes {stable_mosaic.version = 11 : i64} {
  func.func @_fused_pair_kernel(%arg0: i32, %arg1: i32, %arg2: memref<1x10x10x16xbf16, #tpu.memory_space<vmem>>, %arg3: memref<144x16xbf16, #tpu.memory_space<vmem>>, %arg4: memref<1x16xf32, #tpu.memory_space<vmem>>, %arg5: memref<1x16xf32, #tpu.memory_space<vmem>>, %arg6: memref<1x8x8x16xbf16, #tpu.memory_space<vmem>>, %arg7: memref<64x144xf32, #tpu.memory_space<vmem>>) attributes {dimension_semantics = [#tpu.dimension_semantics<parallel>, #tpu.dimension_semantics<parallel>], iteration_bounds = array<i64: 2, 1>, scalar_prefetch = 0 : i64, scratch_operands = 1 : i64, tpu.core_type = #tpu.core_type<tc>, window_params = [{transform_indices = @transform_0, window_bounds = array<i64: 1, 10, 10, 16>}, {pipeline_mode = #tpu.pipeline_mode<synchronous>, transform_indices = @transform_1, window_bounds = array<i64: 144, 16>}, {pipeline_mode = #tpu.pipeline_mode<synchronous>, transform_indices = @transform_2, window_bounds = array<i64: 1, 16>}, {pipeline_mode = #tpu.pipeline_mode<synchronous>, transform_indices = @transform_3, window_bounds = array<i64: 1, 16>}, {transform_indices = @transform_4, window_bounds = array<i64: 1, 8, 8, 16>}]} {
    %c8_i32 = arith.constant 8 : i32
    %0 = arith.muli %arg1, %c8_i32 : i32
    %1 = tpu.assume_multiple %0, 8 : i32
    %c0 = arith.constant 0 : index
    %2 = arith.index_cast %1 : i32 to index
    %c0_0 = arith.constant 0 : index
    %c0_1 = arith.constant 0 : index
    %3 = vector.load %arg2[%c0, %2, %c0_0, %c0_1] : memref<1x10x10x16xbf16, #tpu.memory_space<vmem>>, vector<1x10x10x16xbf16>
    %4 = vector.shape_cast %3 : vector<1x10x10x16xbf16> to vector<10x10x16xbf16>
    %5 = arith.extf %4 : vector<10x10x16xbf16> to vector<10x10x16xf32>
    %6 = vector.extract_strided_slice %5 {offsets = [0, 0, 0], sizes = [8, 8, 16], strides = [1, 1, 1]} : vector<10x10x16xf32> to vector<8x8x16xf32>
    %7 = vector.shape_cast %6 : vector<8x8x16xf32> to vector<64x16xf32>
    %c0_2 = arith.constant 0 : index
    %c0_3 = arith.constant 0 : index
    %8 = vector.load %arg7[%c0_2, %c0_3] : memref<64x144xf32, #tpu.memory_space<vmem>>, vector<64x16xf32>
    tpu.vector_store %arg7[%c0_2, %c0_3], %7 {strides = array<i32>} : memref<64x144xf32, #tpu.memory_space<vmem>>, vector<64x16xf32>,
    %9 = vector.extract_strided_slice %5 {offsets = [0, 1, 0], sizes = [8, 8, 16], strides = [1, 1, 1]} : vector<10x10x16xf32> to vector<8x8x16xf32>
    %10 = vector.shape_cast %9 : vector<8x8x16xf32> to vector<64x16xf32>
    %c0_4 = arith.constant 0 : index
    %c16 = arith.constant 16 : index
    %11 = vector.load %arg7[%c0_4, %c16] : memref<64x144xf32, #tpu.memory_space<vmem>>, vector<64x16xf32>
    tpu.vector_store %arg7[%c0_4, %c16], %10 {strides = array<i32>} : memref<64x144xf32, #tpu.memory_space<vmem>>, vector<64x16xf32>,
    %12 = vector.extract_strided_slice %5 {offsets = [0, 2, 0], sizes = [8, 8, 16], strides = [1, 1, 1]} : vector<10x10x16xf32> to vector<8x8x16xf32>
    %13 = vector.shape_cast %12 : vector<8x8x16xf32> to vector<64x16xf32>
    %c0_5 = arith.constant 0 : index
    %c32 = arith.constant 32 : index
    %14 = vector.load %arg7[%c0_5, %c32] : memref<64x144xf32, #tpu.memory_space<vmem>>, vector<64x16xf32>
    tpu.vector_store %arg7[%c0_5, %c32], %13 {strides = array<i32>} : memref<64x144xf32, #tpu.memory_space<vmem>>, vector<64x16xf32>,
    %15 = vector.extract_strided_slice %5 {offsets = [1, 0, 0], sizes = [8, 8, 16], strides = [1, 1, 1]} : vector<10x10x16xf32> to vector<8x8x16xf32>
    %16 = vector.shape_cast %15 : vector<8x8x16xf32> to vector<64x16xf32>
    %c0_6 = arith.constant 0 : index
    %c48 = arith.constant 48 : index
    %17 = vector.load %arg7[%c0_6, %c48] : memref<64x144xf32, #tpu.memory_space<vmem>>, vector<64x16xf32>
    tpu.vector_store %arg7[%c0_6, %c48], %16 {strides = array<i32>} : memref<64x144xf32, #tpu.memory_space<vmem>>, vector<64x16xf32>,
    %18 = vector.extract_strided_slice %5 {offsets = [1, 1, 0], sizes = [8, 8, 16], strides = [1, 1, 1]} : vector<10x10x16xf32> to vector<8x8x16xf32>
    %19 = vector.shape_cast %18 : vector<8x8x16xf32> to vector<64x16xf32>
    %c0_7 = arith.constant 0 : index
    %c64 = arith.constant 64 : index
    %20 = vector.load %arg7[%c0_7, %c64] : memref<64x144xf32, #tpu.memory_space<vmem>>, vector<64x16xf32>
    tpu.vector_store %arg7[%c0_7, %c64], %19 {strides = array<i32>} : memref<64x144xf32, #tpu.memory_space<vmem>>, vector<64x16xf32>,
    %21 = vector.extract_strided_slice %5 {offsets = [1, 2, 0], sizes = [8, 8, 16], strides = [1, 1, 1]} : vector<10x10x16xf32> to vector<8x8x16xf32>
    %22 = vector.shape_cast %21 : vector<8x8x16xf32> to vector<64x16xf32>
    %c0_8 = arith.constant 0 : index
    %c80 = arith.constant 80 : index
    %23 = vector.load %arg7[%c0_8, %c80] : memref<64x144xf32, #tpu.memory_space<vmem>>, vector<64x16xf32>
    tpu.vector_store %arg7[%c0_8, %c80], %22 {strides = array<i32>} : memref<64x144xf32, #tpu.memory_space<vmem>>, vector<64x16xf32>,
    %24 = vector.extract_strided_slice %5 {offsets = [2, 0, 0], sizes = [8, 8, 16], strides = [1, 1, 1]} : vector<10x10x16xf32> to vector<8x8x16xf32>
    %25 = vector.shape_cast %24 : vector<8x8x16xf32> to vector<64x16xf32>
    %c0_9 = arith.constant 0 : index
    %c96 = arith.constant 96 : index
    %26 = vector.load %arg7[%c0_9, %c96] : memref<64x144xf32, #tpu.memory_space<vmem>>, vector<64x16xf32>
    tpu.vector_store %arg7[%c0_9, %c96], %25 {strides = array<i32>} : memref<64x144xf32, #tpu.memory_space<vmem>>, vector<64x16xf32>,
    %27 = vector.extract_strided_slice %5 {offsets = [2, 1, 0], sizes = [8, 8, 16], strides = [1, 1, 1]} : vector<10x10x16xf32> to vector<8x8x16xf32>
    %28 = vector.shape_cast %27 : vector<8x8x16xf32> to vector<64x16xf32>
    %c0_10 = arith.constant 0 : index
    %c112 = arith.constant 112 : index
    %29 = vector.load %arg7[%c0_10, %c112] : memref<64x144xf32, #tpu.memory_space<vmem>>, vector<64x16xf32>
    tpu.vector_store %arg7[%c0_10, %c112], %28 {strides = array<i32>} : memref<64x144xf32, #tpu.memory_space<vmem>>, vector<64x16xf32>,
    %30 = vector.extract_strided_slice %5 {offsets = [2, 2, 0], sizes = [8, 8, 16], strides = [1, 1, 1]} : vector<10x10x16xf32> to vector<8x8x16xf32>
    %31 = vector.shape_cast %30 : vector<8x8x16xf32> to vector<64x16xf32>
    %c0_11 = arith.constant 0 : index
    %c128 = arith.constant 128 : index
    %32 = vector.load %arg7[%c0_11, %c128] : memref<64x144xf32, #tpu.memory_space<vmem>>, vector<64x16xf32>
    tpu.vector_store %arg7[%c0_11, %c128], %31 {strides = array<i32>} : memref<64x144xf32, #tpu.memory_space<vmem>>, vector<64x16xf32>,
    %c0_12 = arith.constant 0 : index
    %c0_13 = arith.constant 0 : index
    %33 = vector.load %arg7[%c0_12, %c0_13] : memref<64x144xf32, #tpu.memory_space<vmem>>, vector<64x144xf32>
    %34 = arith.truncf %33 : vector<64x144xf32> to vector<64x144xbf16>
    %c0_14 = arith.constant 0 : index
    %c0_15 = arith.constant 0 : index
    %35 = vector.load %arg3[%c0_14, %c0_15] : memref<144x16xbf16, #tpu.memory_space<vmem>>, vector<144x16xbf16>
    %cst = arith.constant dense<0.000000e+00> : vector<64x16xf32>
    %36 = tpu.matmul %34, %35, %cst {dimension_numbers = #tpu.dot_dimension_numbers<[1], [0], [0], [1], [0, 0, 1, 1], [], []>} : vector<64x144xbf16>, vector<144x16xbf16>, vector<64x16xf32> -> vector<64x16xf32>
    %c0_16 = arith.constant 0 : index
    %c0_17 = arith.constant 0 : index
    %37 = vector.load %arg4[%c0_16, %c0_17] : memref<1x16xf32, #tpu.memory_space<vmem>>, vector<1x16xf32>
    %38 = vector.broadcast %37 : vector<1x16xf32> to vector<64x16xf32>
    %39 = arith.addf %36, %38 : vector<64x16xf32>
    %c0_18 = arith.constant 0 : index
    %c0_19 = arith.constant 0 : index
    %40 = vector.load %arg5[%c0_18, %c0_19] : memref<1x16xf32, #tpu.memory_space<vmem>>, vector<1x16xf32>
    %cst_20 = arith.constant 0.000000e+00 : f32
    %41 = vector.broadcast %cst_20 : f32 to vector<64x16xf32>
    %42 = arith.cmpf ogt, %39, %41 : vector<64x16xf32>
    %43 = vector.broadcast %40 : vector<1x16xf32> to vector<64x16xf32>
    %44 = arith.mulf %43, %39 : vector<64x16xf32>
    %45 = arith.select %42, %39, %44 : vector<64x16xi1>, vector<64x16xf32>
    %46 = vector.shape_cast %45 : vector<64x16xf32> to vector<8x8x16xf32>
    %47 = vector.shape_cast %46 : vector<8x8x16xf32> to vector<1x8x8x16xf32>
    %48 = arith.truncf %47 : vector<1x8x8x16xf32> to vector<1x8x8x16xbf16>
    %c0_21 = arith.constant 0 : index
    %c0_22 = arith.constant 0 : index
    %c0_23 = arith.constant 0 : index
    %c0_24 = arith.constant 0 : index
    %49 = vector.load %arg6[%c0_21, %c0_22, %c0_23, %c0_24] : memref<1x8x8x16xbf16, #tpu.memory_space<vmem>>, vector<1x8x8x16xbf16>
    tpu.vector_store %arg6[%c0_21, %c0_22, %c0_23, %c0_24], %48 {strides = array<i32>} : memref<1x8x8x16xbf16, #tpu.memory_space<vmem>>, vector<1x8x8x16xbf16>,
    return
  }
  func.func @transform_0(%arg0: i32, %arg1: i32) -> (i32, i32, i32, i32) {
    %c0_i32 = arith.constant 0 : i32
    %c0_i32_0 = arith.constant 0 : i32
    %c0_i32_1 = arith.constant 0 : i32
    %c0_i32_2 = arith.constant 0 : i32
    return %arg0, %c0_i32, %c0_i32_0, %c0_i32_1 : i32, i32, i32, i32
  }
  func.func @transform_1(%arg0: i32, %arg1: i32) -> (i32, i32) {
    %c0_i32 = arith.constant 0 : i32
    %c0_i32_0 = arith.constant 0 : i32
    %c0_i32_1 = arith.constant 0 : i32
    return %c0_i32, %c0_i32_0 : i32, i32
  }
  func.func @transform_2(%arg0: i32, %arg1: i32) -> (i32, i32) {
    %c0_i32 = arith.constant 0 : i32
    %c0_i32_0 = arith.constant 0 : i32
    %c0_i32_1 = arith.constant 0 : i32
    return %c0_i32, %c0_i32_0 : i32, i32
  }
  func.func @transform_3(%arg0: i32, %arg1: i32) -> (i32, i32) {
    %c0_i32 = arith.constant 0 : i32
    %c0_i32_0 = arith.constant 0 : i32
    %c0_i32_1 = arith.constant 0 : i32
    return %c0_i32, %c0_i32_0 : i32, i32
  }
  func.func @transform_4(%arg0: i32, %arg1: i32) -> (i32, i32, i32, i32) {
    %c0_i32 = arith.constant 0 : i32
    %c0_i32_0 = arith.constant 0 : i32
    %c0_i32_1 = arith.constant 0 : i32
    return %arg0, %arg1, %c0_i32, %c0_i32_0 : i32, i32, i32, i32
  }
}

module attributes {stable_mosaic.version = 11 : i64} {
  func.func @_fused_pair_kernel(%arg0: i32, %arg1: i32, %arg2: memref<1x10x10x16xbf16, #tpu.memory_space<vmem>>, %arg3: memref<144x16xbf16, #tpu.memory_space<vmem>>, %arg4: memref<1x16xf32, #tpu.memory_space<vmem>>, %arg5: memref<1x8x8x16xbf16, #tpu.memory_space<vmem>>, %arg6: memref<64x144xf32, #tpu.memory_space<vmem>>) attributes {dimension_semantics = [#tpu.dimension_semantics<parallel>, #tpu.dimension_semantics<parallel>], iteration_bounds = array<i64: 2, 1>, scalar_prefetch = 0 : i64, scratch_operands = 1 : i64, tpu.core_type = #tpu.core_type<tc>, window_params = [{transform_indices = @transform_0, window_bounds = array<i64: 1, 10, 10, 16>}, {pipeline_mode = #tpu.pipeline_mode<synchronous>, transform_indices = @transform_1, window_bounds = array<i64: 144, 16>}, {pipeline_mode = #tpu.pipeline_mode<synchronous>, transform_indices = @transform_2, window_bounds = array<i64: 1, 16>}, {transform_indices = @transform_3, window_bounds = array<i64: 1, 8, 8, 16>}]} {
    %c8_i32 = arith.constant 8 : i32
    %0 = arith.muli %arg1, %c8_i32 : i32
    %1 = tpu.assume_multiple %0, 8 : i32
    %c0 = arith.constant 0 : index
    %2 = arith.index_cast %1 : i32 to index
    %c0_0 = arith.constant 0 : index
    %c0_1 = arith.constant 0 : index
    %3 = vector.load %arg2[%c0, %2, %c0_0, %c0_1] : memref<1x10x10x16xbf16, #tpu.memory_space<vmem>>, vector<1x10x10x16xbf16>
    %4 = vector.shape_cast %3 : vector<1x10x10x16xbf16> to vector<10x10x16xbf16>
    %5 = arith.extf %4 : vector<10x10x16xbf16> to vector<10x10x16xf32>
    %6 = vector.extract_strided_slice %5 {offsets = [0, 0, 0], sizes = [8, 8, 16], strides = [1, 1, 1]} : vector<10x10x16xf32> to vector<8x8x16xf32>
    %7 = vector.shape_cast %6 : vector<8x8x16xf32> to vector<64x16xf32>
    %c0_2 = arith.constant 0 : index
    %c0_3 = arith.constant 0 : index
    %8 = vector.load %arg6[%c0_2, %c0_3] : memref<64x144xf32, #tpu.memory_space<vmem>>, vector<64x16xf32>
    tpu.vector_store %arg6[%c0_2, %c0_3], %7 {strides = array<i32>} : memref<64x144xf32, #tpu.memory_space<vmem>>, vector<64x16xf32>,
    %9 = vector.extract_strided_slice %5 {offsets = [0, 1, 0], sizes = [8, 8, 16], strides = [1, 1, 1]} : vector<10x10x16xf32> to vector<8x8x16xf32>
    %10 = vector.shape_cast %9 : vector<8x8x16xf32> to vector<64x16xf32>
    %c0_4 = arith.constant 0 : index
    %c16 = arith.constant 16 : index
    %11 = vector.load %arg6[%c0_4, %c16] : memref<64x144xf32, #tpu.memory_space<vmem>>, vector<64x16xf32>
    tpu.vector_store %arg6[%c0_4, %c16], %10 {strides = array<i32>} : memref<64x144xf32, #tpu.memory_space<vmem>>, vector<64x16xf32>,
    %12 = vector.extract_strided_slice %5 {offsets = [0, 2, 0], sizes = [8, 8, 16], strides = [1, 1, 1]} : vector<10x10x16xf32> to vector<8x8x16xf32>
    %13 = vector.shape_cast %12 : vector<8x8x16xf32> to vector<64x16xf32>
    %c0_5 = arith.constant 0 : index
    %c32 = arith.constant 32 : index
    %14 = vector.load %arg6[%c0_5, %c32] : memref<64x144xf32, #tpu.memory_space<vmem>>, vector<64x16xf32>
    tpu.vector_store %arg6[%c0_5, %c32], %13 {strides = array<i32>} : memref<64x144xf32, #tpu.memory_space<vmem>>, vector<64x16xf32>,
    %15 = vector.extract_strided_slice %5 {offsets = [1, 0, 0], sizes = [8, 8, 16], strides = [1, 1, 1]} : vector<10x10x16xf32> to vector<8x8x16xf32>
    %16 = vector.shape_cast %15 : vector<8x8x16xf32> to vector<64x16xf32>
    %c0_6 = arith.constant 0 : index
    %c48 = arith.constant 48 : index
    %17 = vector.load %arg6[%c0_6, %c48] : memref<64x144xf32, #tpu.memory_space<vmem>>, vector<64x16xf32>
    tpu.vector_store %arg6[%c0_6, %c48], %16 {strides = array<i32>} : memref<64x144xf32, #tpu.memory_space<vmem>>, vector<64x16xf32>,
    %18 = vector.extract_strided_slice %5 {offsets = [1, 1, 0], sizes = [8, 8, 16], strides = [1, 1, 1]} : vector<10x10x16xf32> to vector<8x8x16xf32>
    %19 = vector.shape_cast %18 : vector<8x8x16xf32> to vector<64x16xf32>
    %c0_7 = arith.constant 0 : index
    %c64 = arith.constant 64 : index
    %20 = vector.load %arg6[%c0_7, %c64] : memref<64x144xf32, #tpu.memory_space<vmem>>, vector<64x16xf32>
    tpu.vector_store %arg6[%c0_7, %c64], %19 {strides = array<i32>} : memref<64x144xf32, #tpu.memory_space<vmem>>, vector<64x16xf32>,
    %21 = vector.extract_strided_slice %5 {offsets = [1, 2, 0], sizes = [8, 8, 16], strides = [1, 1, 1]} : vector<10x10x16xf32> to vector<8x8x16xf32>
    %22 = vector.shape_cast %21 : vector<8x8x16xf32> to vector<64x16xf32>
    %c0_8 = arith.constant 0 : index
    %c80 = arith.constant 80 : index
    %23 = vector.load %arg6[%c0_8, %c80] : memref<64x144xf32, #tpu.memory_space<vmem>>, vector<64x16xf32>
    tpu.vector_store %arg6[%c0_8, %c80], %22 {strides = array<i32>} : memref<64x144xf32, #tpu.memory_space<vmem>>, vector<64x16xf32>,
    %24 = vector.extract_strided_slice %5 {offsets = [2, 0, 0], sizes = [8, 8, 16], strides = [1, 1, 1]} : vector<10x10x16xf32> to vector<8x8x16xf32>
    %25 = vector.shape_cast %24 : vector<8x8x16xf32> to vector<64x16xf32>
    %c0_9 = arith.constant 0 : index
    %c96 = arith.constant 96 : index
    %26 = vector.load %arg6[%c0_9, %c96] : memref<64x144xf32, #tpu.memory_space<vmem>>, vector<64x16xf32>
    tpu.vector_store %arg6[%c0_9, %c96], %25 {strides = array<i32>} : memref<64x144xf32, #tpu.memory_space<vmem>>, vector<64x16xf32>,
    %27 = vector.extract_strided_slice %5 {offsets = [2, 1, 0], sizes = [8, 8, 16], strides = [1, 1, 1]} : vector<10x10x16xf32> to vector<8x8x16xf32>
    %28 = vector.shape_cast %27 : vector<8x8x16xf32> to vector<64x16xf32>
    %c0_10 = arith.constant 0 : index
    %c112 = arith.constant 112 : index
    %29 = vector.load %arg6[%c0_10, %c112] : memref<64x144xf32, #tpu.memory_space<vmem>>, vector<64x16xf32>
    tpu.vector_store %arg6[%c0_10, %c112], %28 {strides = array<i32>} : memref<64x144xf32, #tpu.memory_space<vmem>>, vector<64x16xf32>,
    %30 = vector.extract_strided_slice %5 {offsets = [2, 2, 0], sizes = [8, 8, 16], strides = [1, 1, 1]} : vector<10x10x16xf32> to vector<8x8x16xf32>
    %31 = vector.shape_cast %30 : vector<8x8x16xf32> to vector<64x16xf32>
    %c0_11 = arith.constant 0 : index
    %c128 = arith.constant 128 : index
    %32 = vector.load %arg6[%c0_11, %c128] : memref<64x144xf32, #tpu.memory_space<vmem>>, vector<64x16xf32>
    tpu.vector_store %arg6[%c0_11, %c128], %31 {strides = array<i32>} : memref<64x144xf32, #tpu.memory_space<vmem>>, vector<64x16xf32>,
    %c0_12 = arith.constant 0 : index
    %c0_13 = arith.constant 0 : index
    %33 = vector.load %arg6[%c0_12, %c0_13] : memref<64x144xf32, #tpu.memory_space<vmem>>, vector<64x144xf32>
    %34 = arith.truncf %33 : vector<64x144xf32> to vector<64x144xbf16>
    %c0_14 = arith.constant 0 : index
    %c0_15 = arith.constant 0 : index
    %35 = vector.load %arg3[%c0_14, %c0_15] : memref<144x16xbf16, #tpu.memory_space<vmem>>, vector<144x16xbf16>
    %cst = arith.constant dense<0.000000e+00> : vector<64x16xf32>
    %36 = tpu.matmul %34, %35, %cst {dimension_numbers = #tpu.dot_dimension_numbers<[1], [0], [0], [1], [0, 0, 1, 1], [], []>} : vector<64x144xbf16>, vector<144x16xbf16>, vector<64x16xf32> -> vector<64x16xf32>
    %c0_16 = arith.constant 0 : index
    %c0_17 = arith.constant 0 : index
    %37 = vector.load %arg4[%c0_16, %c0_17] : memref<1x16xf32, #tpu.memory_space<vmem>>, vector<1x16xf32>
    %38 = vector.broadcast %37 : vector<1x16xf32> to vector<64x16xf32>
    %39 = arith.addf %36, %38 : vector<64x16xf32>
    %40 = vector.shape_cast %39 : vector<64x16xf32> to vector<8x8x16xf32>
    %41 = vector.shape_cast %40 : vector<8x8x16xf32> to vector<1x8x8x16xf32>
    %42 = arith.truncf %41 : vector<1x8x8x16xf32> to vector<1x8x8x16xbf16>
    %c0_18 = arith.constant 0 : index
    %c0_19 = arith.constant 0 : index
    %c0_20 = arith.constant 0 : index
    %c0_21 = arith.constant 0 : index
    %43 = vector.load %arg5[%c0_18, %c0_19, %c0_20, %c0_21] : memref<1x8x8x16xbf16, #tpu.memory_space<vmem>>, vector<1x8x8x16xbf16>
    tpu.vector_store %arg5[%c0_18, %c0_19, %c0_20, %c0_21], %42 {strides = array<i32>} : memref<1x8x8x16xbf16, #tpu.memory_space<vmem>>, vector<1x8x8x16xbf16>,
    return
  }
  func.func @transform_0(%arg0: i32, %arg1: i32) -> (i32, i32, i32, i32) {
    %c0_i32 = arith.constant 0 : i32
    %c0_i32_0 = arith.constant 0 : i32
    %c0_i32_1 = arith.constant 0 : i32
    %c0_i32_2 = arith.constant 0 : i32
    return %arg0, %c0_i32, %c0_i32_0, %c0_i32_1 : i32, i32, i32, i32
  }
  func.func @transform_1(%arg0: i32, %arg1: i32) -> (i32, i32) {
    %c0_i32 = arith.constant 0 : i32
    %c0_i32_0 = arith.constant 0 : i32
    %c0_i32_1 = arith.constant 0 : i32
    return %c0_i32, %c0_i32_0 : i32, i32
  }
  func.func @transform_2(%arg0: i32, %arg1: i32) -> (i32, i32) {
    %c0_i32 = arith.constant 0 : i32
    %c0_i32_0 = arith.constant 0 : i32
    %c0_i32_1 = arith.constant 0 : i32
    return %c0_i32, %c0_i32_0 : i32, i32
  }
  func.func @transform_3(%arg0: i32, %arg1: i32) -> (i32, i32, i32, i32) {
    %c0_i32 = arith.constant 0 : i32
    %c0_i32_0 = arith.constant 0 : i32
    %c0_i32_1 = arith.constant 0 : i32
    return %arg0, %arg1, %c0_i32, %c0_i32_0 : i32, i32, i32, i32
  }
}

module attributes {stable_mosaic.version = 11 : i64} {
  func.func @_se_apply_kernel(%arg0: i32, %arg1: i32, %arg2: memref<1x8x128xbf16, #tpu.memory_space<vmem>>, %arg3: memref<1x8x128xbf16, #tpu.memory_space<vmem>>, %arg4: memref<1x1x128xf32, #tpu.memory_space<vmem>>, %arg5: memref<1x128xf32, #tpu.memory_space<vmem>>, %arg6: memref<1x8x128xbf16, #tpu.memory_space<vmem>>) attributes {dimension_semantics = [#tpu.dimension_semantics<parallel>, #tpu.dimension_semantics<parallel>], iteration_bounds = array<i64: 2, 1>, scalar_prefetch = 0 : i64, scratch_operands = 0 : i64, tpu.core_type = #tpu.core_type<tc>, window_params = [{transform_indices = @transform_0, window_bounds = array<i64: 1, 8, 128>}, {transform_indices = @transform_1, window_bounds = array<i64: 1, 8, 128>}, {transform_indices = @transform_2, window_bounds = array<i64: 1, 1, 128>}, {pipeline_mode = #tpu.pipeline_mode<synchronous>, transform_indices = @transform_3, window_bounds = array<i64: 1, 128>}, {transform_indices = @transform_4, window_bounds = array<i64: 1, 8, 128>}]} {
    %c0 = arith.constant 0 : index
    %c0_0 = arith.constant 0 : index
    %c0_1 = arith.constant 0 : index
    %0 = vector.load %arg2[%c0, %c0_0, %c0_1] : memref<1x8x128xbf16, #tpu.memory_space<vmem>>, vector<1x8x128xbf16>
    %1 = vector.shape_cast %0 : vector<1x8x128xbf16> to vector<8x128xbf16>
    %2 = arith.extf %1 : vector<8x128xbf16> to vector<8x128xf32>
    %c0_2 = arith.constant 0 : index
    %c0_3 = arith.constant 0 : index
    %c0_4 = arith.constant 0 : index
    %3 = vector.load %arg4[%c0_2, %c0_3, %c0_4] : memref<1x1x128xf32, #tpu.memory_space<vmem>>, vector<1x1x128xf32>
    %4 = vector.shape_cast %3 : vector<1x1x128xf32> to vector<1x128xf32>
    %5 = vector.broadcast %4 : vector<1x128xf32> to vector<8x128xf32>
    %6 = arith.mulf %2, %5 : vector<8x128xf32>
    %c0_5 = arith.constant 0 : index
    %c0_6 = arith.constant 0 : index
    %c0_7 = arith.constant 0 : index
    %7 = vector.load %arg3[%c0_5, %c0_6, %c0_7] : memref<1x8x128xbf16, #tpu.memory_space<vmem>>, vector<1x8x128xbf16>
    %8 = vector.shape_cast %7 : vector<1x8x128xbf16> to vector<8x128xbf16>
    %9 = arith.extf %8 : vector<8x128xbf16> to vector<8x128xf32>
    %10 = arith.addf %6, %9 : vector<8x128xf32>
    %c0_8 = arith.constant 0 : index
    %c0_9 = arith.constant 0 : index
    %11 = vector.load %arg5[%c0_8, %c0_9] : memref<1x128xf32, #tpu.memory_space<vmem>>, vector<1x128xf32>
    %cst = arith.constant 0.000000e+00 : f32
    %12 = vector.broadcast %cst : f32 to vector<8x128xf32>
    %13 = arith.cmpf ogt, %10, %12 : vector<8x128xf32>
    %14 = vector.broadcast %11 : vector<1x128xf32> to vector<8x128xf32>
    %15 = arith.mulf %14, %10 : vector<8x128xf32>
    %16 = arith.select %13, %10, %15 : vector<8x128xi1>, vector<8x128xf32>
    %17 = vector.shape_cast %16 : vector<8x128xf32> to vector<1x8x128xf32>
    %18 = arith.truncf %17 : vector<1x8x128xf32> to vector<1x8x128xbf16>
    %c0_10 = arith.constant 0 : index
    %c0_11 = arith.constant 0 : index
    %c0_12 = arith.constant 0 : index
    %19 = vector.load %arg6[%c0_10, %c0_11, %c0_12] : memref<1x8x128xbf16, #tpu.memory_space<vmem>>, vector<1x8x128xbf16>
    tpu.vector_store %arg6[%c0_10, %c0_11, %c0_12], %18 {strides = array<i32>} : memref<1x8x128xbf16, #tpu.memory_space<vmem>>, vector<1x8x128xbf16>,
    return
  }
  func.func @transform_0(%arg0: i32, %arg1: i32) -> (i32, i32, i32) {
    %c0_i32 = arith.constant 0 : i32
    %c0_i32_0 = arith.constant 0 : i32
    return %arg0, %arg1, %c0_i32 : i32, i32, i32
  }
  func.func @transform_1(%arg0: i32, %arg1: i32) -> (i32, i32, i32) {
    %c0_i32 = arith.constant 0 : i32
    %c0_i32_0 = arith.constant 0 : i32
    return %arg0, %arg1, %c0_i32 : i32, i32, i32
  }
  func.func @transform_2(%arg0: i32, %arg1: i32) -> (i32, i32, i32) {
    %c0_i32 = arith.constant 0 : i32
    %c0_i32_0 = arith.constant 0 : i32
    %c0_i32_1 = arith.constant 0 : i32
    return %arg0, %c0_i32, %c0_i32_0 : i32, i32, i32
  }
  func.func @transform_3(%arg0: i32, %arg1: i32) -> (i32, i32) {
    %c0_i32 = arith.constant 0 : i32
    %c0_i32_0 = arith.constant 0 : i32
    %c0_i32_1 = arith.constant 0 : i32
    return %c0_i32, %c0_i32_0 : i32, i32
  }
  func.func @transform_4(%arg0: i32, %arg1: i32) -> (i32, i32, i32) {
    %c0_i32 = arith.constant 0 : i32
    %c0_i32_0 = arith.constant 0 : i32
    return %arg0, %arg1, %c0_i32 : i32, i32, i32
  }
}

</mosaic_0001>

<bundles_post_ra>
// kernel: _lambda_.7
= control target key start
LH: loop header
LB: loop body
LE: loop exit
PB: predicated region body
PF: predicated region fallthrough
CT: control target
= control target key end

     0   :  { %s1487_s12 = smov 0   ;;  %s1489_s13 = smov 0   ;;  %s1752_s0 = inlined_call_operand.vmem [shape: bf16[8,9,9,8], index: 0, kind: input, shape index: {}]   ;;  %s1753_s1 = inlined_call_operand.vmem [shape: bf16[72,16], index: 1, kind: input, shape index: {}]   ;;  %s1754_s2 = inlined_call_operand.vmem [shape: f32[1,16], index: 2, kind: input, shape index: {}]   ;;  %s1755_s3 = inlined_call_operand.vmem [shape: bf16[2,8,8,16], index: 3, kind: output, shape index: {}]  }
   0x1   :  { %s1491_s14 = smov 0  }
   0x2 LB: > { %s25_s15 = sadd.s32 1, %s1453_s13  ;;  %p1108_p0 = scmp.ge.s32.totalorder %s1457_s14, 1  ;;  %s1457_s14 = sphi %s1491_s14, %s13_s14   ;;  %s1453_s13 = sphi %s1489_s13, %s1757_s13   ;;  %s1449_s12 = sphi %s1487_s12, %s1756_s12  }
   0x3   : > { %p27_p1 = scmp.ge.s32.totalorder %s25_s15, 2  ;;  %p153_p2 = scmp.lt.s32.totalorder %s1457_s14, 3 }
   0x5   : > { %s1759_s15 = smov (%p27_p1, %s25_s15), 0  ;;  %p154_p3 = pnand %p1108_p0, %p153_p2 }
   0x6   : > { %s1109_s16 = sshll.u32 (!%p154_p3), %s1449_s12, 2  ;;  %s1459_s21 = smov (!%p154_p3), 8  }
   0x7   : > { %157 = sbr.rel (%p154_p3) target bundleno = 414 (0x19e), region = 32  ;;  %p183_p4 = scmp.lt.s32.totalorder (!%p154_p3), %s1109_s16, 7 }
   0x8   : > { %s1460_s22 = smov (!%p154_p3), 16   ;;  %s1461_s23 = smov (!%p154_p3), 24  }
   0x9   : > { %s1462_s24 = smov (!%p154_p3), 32   ;;  %s1463_s25 = smov (!%p154_p3), 40  }
   0xa   : > { %s1464_s26 = smov (!%p154_p3), 48   ;;  %s1465_s4 = smov (!%p154_p3), 56  }
   0xb   : > { %s1466_s9 = smov (!%p154_p3), 64   ;;  %p190_p5 = scmp.lt.s32.totalorder (!%p154_p3), %s1449_s12, 1 }
   0xc   : > { %s1761_s16 = smov (!%p183_p4, %s1109_s16), 7  ;;  %vm337_vm0 = vcmask 1046528   ;;  %vm220_vm1 = vcmask 64512   ;;  %vm914_vm2 = vcmask 1043456   ;;  %vm280_vm3 = vcmask 130112  }
   0xd   : > { %s1237_s17 = smul.u32 72, %s1761_s16  ;;  %vm386_vm4 = vcmask 195712   ;;  %vm446_vm5 = vcmask 261312   ;;  %vm506_vm6 = vcmask 326912   ;;  %vm611_vm7 = vcmask 392512   ;;  %s1763_s12 = smov (!%p190_p5, %s1449_s12), 1 }
   0xe   : > { %vm672_vm8 = vcmask 458112   ;;  %vm732_vm9 = vcmask 523712   ;;  %vm837_vm10 = vcmask 589312   ;;  %vm901_vm11 = vcmask 588800   ;;  %s1197_s18 = sshll.u32 %s1763_s12, 5 }
   0xf   : > { %s1511_s20 = scalar_lea.vmem %s1752_s0, %s1237_s17  ;;  %vm991_vm12 = vcmask 125952  }
  0x10   : > { %v1115_v0 = vld [vmem:[%s1511_s20 + $0x58] ss:$8 sps:$4 sm:$0xff]   ;;  %v1113_v1 = vld [vmem:[%s1511_s20 + $0x48] ss:$8 sps:$4 sm:$0xff]   ;;  %v298_v9 = vld [vmem:[%s1511_s20 + $0x24] sm:$0x1] }
  0x11   : > { %v1119_v2 = vld [vmem:[%s1511_s20 + $0x78] ss:$8 sps:$4 sm:$0xff]   ;;  %v242_v3 = vunpack.c.l.bf16 %v1115_v0  ;;  %v243_v4 = vunpack.c.h.bf16 %v1115_v0  ;;  %v240_v5 = vunpack.c.l.bf16 %v1113_v1  ;;  %v241_v6 = vunpack.c.h.bf16 %v1113_v1  ;;  %v1117_v7 = vld [vmem:[%s1511_s20 + $0x68] ss:$8 sps:$4 sm:$0xff]   ;;  %v300_v14 = vld [vmem:[%s1511_s20 + $0x2c] sm:$0x1] }
  0x12   : > { %v297_v8 = vld [vmem:[%s1511_s20 + $0x20] ss:$8 sps:$4 sm:$0xff]   ;;  %v246_v10 = vunpack.c.l.bf16 %v1119_v2  ;;  %v247_v11 = vunpack.c.h.bf16 %v1119_v2  ;;  %v244_v12 = vunpack.c.l.bf16 %v1117_v7  ;;  %v245_v13 = vunpack.c.h.bf16 %v1117_v7  ;;  %v290_v16 = vld [vmem:[%s1511_s20 + $0x4] sm:$0x1]  ;;  %v292_v21 = vld [vmem:[%s1511_s20 + $0xc] sm:$0x1] }
  0x13   : > { %v289_v15 = vld [vmem:[%s1511_s20] ss:$8 sps:$4 sm:$0xff]   ;;  %v1280_v17 = vpack.i.bf16 %v243_v4, %v242_v3  ;;  %v1270_v18 = vpack.i.bf16 %v241_v6, %v240_v5  ;;  %v313_v19 = vunpack.c.l.bf16 %v297_v8  ;;  %v314_v20 = vunpack.c.l.bf16 %v298_v9  ;;  %v301_v26 = vld [vmem:[%s1511_s20 + $0x30] ss:$8 sps:$4 sm:$0xff]   ;;  %v302_v31 = vld [vmem:[%s1511_s20 + $0x34] sm:$0x1] }
  0x14   : > { %v1285_v22 = vpack.i.bf16 %v247_v11, %v246_v10  ;;  %v1275_v23 = vpack.i.bf16 %v245_v13, %v244_v12  ;;  %v315_v24 = vunpack.c.h.bf16 %v297_v8  ;;  %v316_v25 = vunpack.c.l.bf16 %v300_v14  ;;  %v304_v36 = vld [vmem:[%s1511_s20 + $0x3c] sm:$0x1]  ;;  %v293_v41 = vld [vmem:[%s1511_s20 + $0x10] ss:$8 sps:$4 sm:$0xff]   ;;  %v294_v46 = vld [vmem:[%s1511_s20 + $0x14] sm:$0x1] }
  0x15   : > { %1281 = vrot.lane.b32.xlu1 %v1280_v17, %s1459_s21  ;;  %1271 = vrot.lane.b32.xlu0 %v1270_v18, %s1459_s21  ;;  %v350_v27 = vrot.slane %v313_v19, 1  ;;  %v351_v28 = vrot.slane %v314_v20, 1  ;;  %v305_v29 = vunpack.c.l.bf16 %v289_v15  ;;  %v306_v30 = vunpack.c.l.bf16 %v290_v16  ;;  %v296_v51 = vld [vmem:[%s1511_s20 + $0x1c] sm:$0x1]  ;;  %v1125_v56 = vld [vmem:[%s1511_s20 + $0xb0] ss:$8 sps:$4 sm:$0xff]  }
  0x16   : > { %v353_v32 = vrot.slane %v315_v24, 1  ;;  %v354_v33 = vrot.slane %v316_v25, 1  ;;  %v307_v34 = vunpack.c.h.bf16 %v289_v15  ;;  %v308_v35 = vunpack.c.l.bf16 %v292_v21  ;;  %v1121_v1 = vld [vmem:[%s1511_s20 + $0x90] ss:$8 sps:$4 sm:$0xff]   ;;  %v1127_v6 = vld [vmem:[%s1511_s20 + $0xc0] ss:$8 sps:$4 sm:$0xff]  }
  0x17   : > { %v352_v37 = vsel %vm337_vm0, %v350_v27, %v351_v28  ;;  %v338_v38 = vrot.slane %v305_v29, 1  ;;  %v339_v39 = vrot.slane %v306_v30, 1  ;;  %v317_v40 = vunpack.c.l.bf16 %v301_v26  ;;  %v1123_v13 = vld [vmem:[%s1511_s20 + $0xa0] ss:$8 sps:$4 sm:$0xff]   ;;  %v1145_v25 = vld [vmem:[%s1511_s20 + $0xb0] ss:$8 sps:$4 sm:$0xff]  }
  0x18   : > { %v355_v42 = vsel %vm337_vm0, %v353_v32, %v354_v33  ;;  %v341_v43 = vrot.slane %v307_v34, 1  ;;  %v342_v44 = vrot.slane %v308_v35, 1  ;;  %v318_v45 = vunpack.c.l.bf16 %v302_v31  ;;  %v1133_v14 = vld [vmem:[%s1511_s20 + $0xf8] ss:$8 sps:$4 sm:$0xff]   ;;  %v1148_v27 = vld [vmem:[%s1511_s20 + $0xbc] sm:$0x1] }
  0x19   : > { %1286 = vrot.lane.b32.xlu1 %v1285_v22, %s1459_s21  ;;  %1276 = vrot.lane.b32.xlu0 %v1275_v23, %s1459_s21  ;;  %v1295_v47 = vpack.i.bf16 %v355_v42, %v352_v37  ;;  %v340_v48 = vsel %vm337_vm0, %v338_v38, %v339_v39  ;;  %v319_v49 = vunpack.c.h.bf16 %v301_v26  ;;  %v320_v50 = vunpack.c.l.bf16 %v304_v36  ;;  %v1129_v20 = vld [vmem:[%s1511_s20 + $0xd8] ss:$8 sps:$4 sm:$0xff]   ;;  %v1146_v26 = vld [vmem:[%s1511_s20 + $0xb4] sm:$0x1]  ;;  %s1725_s21 = scalar_lea.vmem %s1755_s3, %s1197_s18 }
  0x1a   : > { %v343_v52 = vsel %vm337_vm0, %v341_v43, %v342_v44  ;;  %v356_v53 = vrot.slane %v317_v40, 1  ;;  %v357_v54 = vrot.slane %v318_v45, 1  ;;  %v309_v55 = vunpack.c.l.bf16 %v293_v41  ;;  %v1135_v29 = vld [vmem:[%s1511_s20 + $0x108] ss:$8 sps:$4 sm:$0xff]   ;;  %v1138_v34 = vld [vmem:[%s1511_s20 + $0x94] sm:$0x1] }
  0x1b   : > { %v1290_v57 = vpack.i.bf16 %v343_v52, %v340_v48  ;;  %v359_v58 = vrot.slane %v319_v49, 1  ;;  %v360_v59 = vrot.slane %v320_v50, 1  ;;  %v310_v60 = vunpack.c.l.bf16 %v294_v46  ;;  %v1137_v33 = vld [vmem:[%s1511_s20 + $0x90] ss:$8 sps:$4 sm:$0xff]   ;;  %v1140_v35 = vld [vmem:[%s1511_s20 + $0x9c] sm:$0x1] }
  0x1c   : > { %v358_v61 = vsel %vm337_vm0, %v356_v53, %v357_v54  ;;  %v311_v62 = vunpack.c.h.bf16 %v293_v41  ;;  %v312_v63 = vunpack.c.l.bf16 %v296_v51  ;;  %v344_v0 = vrot.slane %v309_v55, 1  ;;  %v1131_v36 = vld [vmem:[%s1511_s20 + $0xe8] ss:$8 sps:$4 sm:$0xff]   ;;  %v1150_v49 = vld [vmem:[%s1511_s20 + $0xc4] sm:$0x1] }
  0x1d   : > { %1296 = vrot.lane.b32.xlu1 %v1295_v47, %s1460_s22  ;;  %1291 = vrot.lane.b32.xlu0 %v1290_v57, %s1460_s22  ;;  %v361_v2 = vsel %vm337_vm0, %v359_v58, %v360_v59  ;;  %v345_v3 = vrot.slane %v310_v60, 1  ;;  %v410_v4 = vunpack.c.l.bf16 %v1125_v56  ;;  %v411_v5 = vunpack.c.h.bf16 %v1125_v56  ;;  %v1149_v48 = vld [vmem:[%s1511_s20 + $0xc0] ss:$8 sps:$4 sm:$0xff]   ;;  %v1152_v50 = vld [vmem:[%s1511_s20 + $0xcc] sm:$0x1] }
  0x1e   : > { %v1310_v7 = vpack.i.bf16 %v361_v2, %v358_v61  ;;  %v347_v8 = vrot.slane %v311_v62, 1  ;;  %v348_v9 = vrot.slane %v312_v63, 1  ;;  %v406_v11 = vunpack.c.l.bf16 %v1121_v1  ;;  %v1141_v55 = vld [vmem:[%s1511_s20 + $0xa0] ss:$8 sps:$4 sm:$0xff]   ;;  %v1142_v60 = vld [vmem:[%s1511_s20 + $0xa4] sm:$0x1] }
  0x1f   : > { %v346_v10 = vsel %vm337_vm0, %v344_v0, %v345_v3  ;;  %v407_v12 = vunpack.c.h.bf16 %v1121_v1  ;;  %v412_v16 = vunpack.c.l.bf16 %v1127_v6  ;;  %v413_v17 = vunpack.c.h.bf16 %v1127_v6  ;;  %v1144_v1 = vld [vmem:[%s1511_s20 + $0xac] sm:$0x1] }
  0x20   : > { %v349_v15 = vsel %vm337_vm0, %v347_v8, %v348_v9  ;;  %v1315_v19 = vpack.i.bf16 %v411_v5, %v410_v4  ;;  %v408_v21 = vunpack.c.l.bf16 %v1123_v13  ;;  %v409_v22 = vunpack.c.h.bf16 %v1123_v13 }
  0x21   : > { %1311 = vrot.lane.b32.xlu1 %v1310_v7, %s1460_s22  ;;  %v1300_v18 = vpack.i.bf16 %v349_v15, %v346_v10  ;;  %v470_v23 = vunpack.c.l.bf16 %v1133_v14  ;;  %v471_v24 = vunpack.c.h.bf16 %v1133_v14  ;;  %v1305_v28 = vpack.i.bf16 %v407_v12, %v406_v11 }
  0x22   : > { %v1325_v30 = vpack.i.bf16 %v413_v17, %v412_v16  ;;  %v466_v31 = vunpack.c.l.bf16 %v1129_v20  ;;  %v467_v32 = vunpack.c.h.bf16 %v1129_v20  ;;  %v539_v37 = vunpack.c.l.bf16 %v1145_v25 }
  0x23   : > { %1301 = vrot.lane.b32.xlu0 %v1300_v18, %s1460_s22  ;;  %v540_v38 = vunpack.c.l.bf16 %v1146_v26  ;;  %v541_v39 = vunpack.c.h.bf16 %v1145_v25  ;;  %v542_v40 = vunpack.c.l.bf16 %v1148_v27  ;;  %v1320_v41 = vpack.i.bf16 %v409_v22, %v408_v21  ;;  %v1157_v27 = vld [vmem:[%s1511_s20 + $0x28] ss:$8 sps:$4 sm:$0xff]  }
  0x24   : > { %v1335_v42 = vpack.i.bf16 %v471_v24, %v470_v23  ;;  %v472_v43 = vunpack.c.l.bf16 %v1135_v29  ;;  %v531_v44 = vunpack.c.l.bf16 %v1137_v33  ;;  %v532_v45 = vunpack.c.l.bf16 %v1138_v34 }
  0x25   : > { %1316 = vrot.lane.b32.xlu1 %v1315_v19, %s1461_s23  ;;  %v533_v46 = vunpack.c.h.bf16 %v1137_v33  ;;  %v534_v47 = vunpack.c.l.bf16 %v1140_v35  ;;  %v1330_v51 = vpack.i.bf16 %v467_v32, %v466_v31  ;;  %v473_v52 = vunpack.c.h.bf16 %v1135_v29  ;;  %v1153_v29 = vld [vmem:[%s1511_s20 + $0x8] ss:$8 sps:$4 sm:$0xff]   ;;  %v1155_v33 = vld [vmem:[%s1511_s20 + $0x18] ss:$8 sps:$4 sm:$0xff]  }
  0x26   : > { %v468_v53 = vunpack.c.l.bf16 %v1131_v36  ;;  %v469_v54 = vunpack.c.h.bf16 %v1131_v36  ;;  %v575_v56 = vrot.slane %v539_v37, 1  ;;  %v576_v57 = vrot.slane %v540_v38, 1  ;;  %v1165_v37 = vld [vmem:[%s1511_s20 + $0x70] ss:$8 sps:$4 sm:$0xff]  }
  0x27   : > { %1306 = vrot.lane.b32.xlu0 %v1305_v28, %s1461_s23  ;;  %v578_v58 = vrot.slane %v541_v39, 1  ;;  %v579_v59 = vrot.slane %v542_v40, 1  ;;  %v543_v61 = vunpack.c.l.bf16 %v1149_v48  ;;  %v544_v62 = vunpack.c.l.bf16 %v1150_v49 }
  0x28   : > { %v545_v63 = vunpack.c.h.bf16 %v1149_v48  ;;  %v546_v0 = vunpack.c.l.bf16 %v1152_v50  ;;  %v563_v2 = vrot.slane %v531_v44, 1  ;;  %v564_v3 = vrot.slane %v532_v45, 1 }
  0x29   : > { %1326 = vrot.lane.b32.xlu1 %v1325_v30, %s1461_s23  ;;  %v566_v4 = vrot.slane %v533_v46, 1  ;;  %v567_v5 = vrot.slane %v534_v47, 1  ;;  %v1345_v6 = vpack.i.bf16 %v473_v52, %v472_v43  ;;  %v535_v7 = vunpack.c.l.bf16 %v1141_v55  ;;  %v1159_v30 = vld [vmem:[%s1511_s20 + $0x38] ss:$8 sps:$4 sm:$0xff]   ;;  %v1177_v46 = vld [vmem:[%s1511_s20 + $0x28] ss:$8 sps:$4 sm:$0xff]  }
  0x2a   : > { %v536_v8 = vunpack.c.l.bf16 %v1142_v60  ;;  %v577_v9 = vsel %vm337_vm0, %v575_v56, %v576_v57  ;;  %v580_v10 = vsel %vm337_vm0, %v578_v58, %v579_v59  ;;  %v537_v11 = vunpack.c.h.bf16 %v1141_v55  ;;  %v1178_v47 = vld [vmem:[%s1511_s20 + $0x2c] sm:$0x1]  ;;  %v1169_v55 = vld [vmem:[%s1511_s20 + $0x8] ss:$8 sps:$4 sm:$0xff]  }
  0x2b   : > { %1321 = vrot.lane.b32.xlu0 %v1320_v41, %s1461_s23  ;;  %v538_v12 = vunpack.c.l.bf16 %v1144_v1  ;;  %v581_v13 = vrot.slane %v543_v61, 1  ;;  %v582_v14 = vrot.slane %v544_v62, 1  ;;  %v584_v15 = vrot.slane %v545_v63, 1  ;;  %v1161_v41 = vld [vmem:[%s1511_s20 + $0x50] ss:$8 sps:$4 sm:$0xff]  }
  0x2c   : > { %v585_v16 = vrot.slane %v546_v0, 1  ;;  %v1340_v17 = vpack.i.bf16 %v469_v54, %v468_v53  ;;  %v565_v18 = vsel %vm337_vm0, %v563_v2, %v564_v3  ;;  %v568_v19 = vsel %vm337_vm0, %v566_v4, %v567_v5  ;;  %v1582_v53 = vld [vmem:[%s1511_s20 + $0x80] ss:$8 sps:$4 sm:$0xff]   ;;  %v1180_v54 = vld [vmem:[%s1511_s20 + $0x34] sm:$0x1] }
  0x2d   : > { %1336 = vrot.lane.b32.xlu1 %v1335_v42, %s1462_s24  ;;  %v569_v20 = vrot.slane %v535_v7, 1  ;;  %v570_v21 = vrot.slane %v536_v8, 1  ;;  %v572_v22 = vrot.slane %v537_v11, 1  ;;  %v573_v23 = vrot.slane %v538_v12, 1  ;;  %v1587_v56 = vld [vmem:[%s1511_s20 + $0x60] ss:$8 sps:$4 sm:$0xff]  }
  0x2e   : > { %v1355_v24 = vpack.i.bf16 %v580_v10, %v577_v9  ;;  %v583_v25 = vsel %vm337_vm0, %v581_v13, %v582_v14  ;;  %v586_v26 = vsel %vm337_vm0, %v584_v15, %v585_v16  ;;  %v1350_v28 = vpack.i.bf16 %v568_v19, %v565_v18  ;;  %v1170_v63 = vld [vmem:[%s1511_s20 + $0xc] sm:$0x1]  ;;  %v1172_v3 = vld [vmem:[%s1511_s20 + $0x14] sm:$0x1]  ;;  %v206_v5 = vld [vmem:[%s1511_s20 + $0x10] ss:$8 sps:$4 sm:$0xff]  }
  0x2f   : > { %1331 = vrot.lane.b32.xlu0 %v1330_v51, %s1462_s24  ;;  %v571_v31 = vsel %vm337_vm0, %v569_v20, %v570_v21  ;;  %v574_v32 = vsel %vm337_vm0, %v572_v22, %v573_v23  ;;  %v1365_v34 = vpack.i.bf16 %v586_v26, %v583_v25  ;;  %v636_v35 = vunpack.c.l.bf16 %v1157_v27  ;;  %v1181_v10 = vld [vmem:[%s1511_s20 + $0x38] ss:$8 sps:$4 sm:$0xff]   ;;  %v1182_v11 = vld [vmem:[%s1511_s20 + $0x3c] sm:$0x1]  ;;  %v1184_v20 = vld [vmem:[%s1511_s20 + $0x44] sm:$0x1] }
  0x30   : > { %v637_v36 = vunpack.c.h.bf16 %v1157_v27  ;;  %v632_v38 = vunpack.c.l.bf16 %v1153_v29  ;;  %v633_v39 = vunpack.c.h.bf16 %v1153_v29  ;;  %v638_v40 = vunpack.c.l.bf16 %v1159_v30  ;;  %v204_v12 = vld [vmem:[%s1511_s20] ss:$8 sps:$4 sm:$0xff]  }
  0x31   : > { %1346 = vrot.lane.b32.xlu1 %v1345_v6, %s1462_s24  ;;  %v1360_v42 = vpack.i.bf16 %v574_v32, %v571_v31  ;;  %v639_v43 = vunpack.c.h.bf16 %v1159_v30  ;;  %v634_v44 = vunpack.c.l.bf16 %v1155_v33  ;;  %v635_v45 = vunpack.c.h.bf16 %v1155_v33  ;;  %v208_v23 = vld [vmem:[%s1511_s20 + $0x20] ss:$8 sps:$4 sm:$0xff]   ;;  %v1174_v30 = vld [vmem:[%s1511_s20 + $0x1c] sm:$0x1]  ;;  %v1176_v31 = vld [vmem:[%s1511_s20 + $0x24] sm:$0x1] }
  0x32   : > { %v696_v48 = vunpack.c.l.bf16 %v1165_v37  ;;  %v697_v49 = vunpack.c.h.bf16 %v1165_v37  ;;  %v1375_v50 = vpack.i.bf16 %v637_v36, %v636_v35  ;;  %v692_v51 = vunpack.c.l.bf16 %v1161_v41  ;;  %v1173_v27 = vld [vmem:[%s1511_s20 + $0x18] ss:$8 sps:$4 sm:$0xff]  }
  0x33   : > { %1341 = vrot.lane.b32.xlu0 %v1340_v17, %s1462_s24  ;;  %v693_v52 = vunpack.c.h.bf16 %v1161_v41  ;;  %v765_v57 = vunpack.c.l.bf16 %v1177_v46  ;;  %v766_v58 = vunpack.c.l.bf16 %v1178_v47  ;;  %v767_v59 = vunpack.c.h.bf16 %v1177_v46  ;;  %v210_v17 = vld [vmem:[%s1511_s20 + $0x30] ss:$8 sps:$4 sm:$0xff]   ;;  %v1430_v35 = vld [vmem:[%s1753_s1 + $0x20] ss:$0 sps:$4 sm:$0xff]  }
  0x34   : > { %v1370_v60 = vpack.i.bf16 %v633_v39, %v632_v38  ;;  %v1385_v61 = vpack.i.bf16 %v639_v43, %v638_v40  ;;  %v1380_v62 = vpack.i.bf16 %v635_v45, %v634_v44  ;;  %v1395_v0 = vpack.i.bf16 %v697_v49, %v696_v48  ;;  %v1431_v47 = vld [vmem:[%s1753_s1 + $0x18] sm:$0xff]   ;;  %1235 = vmatprep.subr.msk.bf16.mxu0 %vm914_vm2, %v1430_v35 }
  0x35   : > { %1356 = vrot.lane.b32.xlu1 %v1355_v24, %s1463_s25  ;;  %v698_v1 = vunpack.c.l.bf16 %v1582_v53  ;;  %v768_v2 = vunpack.c.l.bf16 %v1180_v54  ;;  %v757_v4 = vunpack.c.l.bf16 %v1169_v55  ;;  %v1594_v6 = vpack.i.bf16 %v693_v52, %v692_v51  ;;  %1236 = vmatprep.subr.msk.bf16.mxu1 %vm914_vm2, %v1430_v35 }
  0x36   : > { %v699_v7 = vunpack.c.h.bf16 %v1582_v53  ;;  %v694_v8 = vunpack.c.l.bf16 %v1587_v56  ;;  %v695_v9 = vunpack.c.h.bf16 %v1587_v56  ;;  %v801_v13 = vrot.slane %v765_v57, 1 }
  0x37   : > { %1351 = vrot.lane.b32.xlu0 %v1350_v28, %s1463_s25  ;;  %v802_v14 = vrot.slane %v766_v58, 1  ;;  %v804_v15 = vrot.slane %v767_v59, 1  ;;  %v758_v16 = vunpack.c.l.bf16 %v1170_v63  ;;  %v759_v18 = vunpack.c.h.bf16 %v1169_v55 }
  0x38   : > { %v760_v19 = vunpack.c.l.bf16 %v1172_v3  ;;  %v214_v21 = vunpack.c.l.bf16 %v206_v5  ;;  %v215_v22 = vunpack.c.h.bf16 %v206_v5  ;;  %v805_v24 = vrot.slane %v768_v2, 1 }
  0x39   : > { %1366 = vrot.lane.b32.xlu1 %v1365_v34, %s1463_s25  ;;  %v789_v25 = vrot.slane %v757_v4, 1  ;;  %v769_v26 = vunpack.c.l.bf16 %v1181_v10  ;;  %v212_v28 = vunpack.c.l.bf16 %v204_v12  ;;  %v770_v29 = vunpack.c.l.bf16 %v1182_v11 }
  0x3a   : > { %223 = vst.msk [vmem:[#allocation2 + $0x10] sm:$0xff] %vm220_vm1, %v214_v21  ;;  %224 = vst.msk [vmem:[#allocation2 + $0x18] sm:$0xff] %vm220_vm1, %v215_v22  ;;  %v213_v32 = vunpack.c.h.bf16 %v204_v12  ;;  %v218_v33 = vunpack.c.l.bf16 %v210_v17  ;;  %v219_v34 = vunpack.c.h.bf16 %v210_v17  ;;  %v771_v36 = vunpack.c.h.bf16 %v1181_v10 }
  0x3b   : > { %1361 = vrot.lane.b32.xlu0 %v1360_v42, %s1463_s25  ;;  %v772_v37 = vunpack.c.l.bf16 %v1184_v20  ;;  %221 = vst.msk [vmem:[#allocation2] sm:$0xff] %vm220_vm1, %v212_v28  ;;  %v216_v38 = vunpack.c.l.bf16 %v208_v23  ;;  %v217_v39 = vunpack.c.h.bf16 %v208_v23  ;;  %v790_v40 = vrot.slane %v758_v16, 1 }
  0x3c   : > { %v792_v41 = vrot.slane %v759_v18, 1  ;;  %v793_v42 = vrot.slane %v760_v19, 1  ;;  %v761_v43 = vunpack.c.l.bf16 %v1173_v27  ;;  %222 = vst.msk [vmem:[#allocation2 + $0x8] sm:$0xff] %vm220_vm1, %v213_v32  ;;  %227 = vst.msk [vmem:[#allocation2 + $0x30] sm:$0xff] %vm220_vm1, %v218_v33  ;;  %v762_v44 = vunpack.c.l.bf16 %v1174_v30 }
  0x3d   : > { %1376 = vrot.lane.b32.xlu1 %v1375_v50, %s1464_s26  ;;  %228 = vst.msk [vmem:[#allocation2 + $0x38] sm:$0xff] %vm220_vm1, %v219_v34  ;;  %v763_v45 = vunpack.c.h.bf16 %v1173_v27  ;;  %v764_v46 = vunpack.c.l.bf16 %v1176_v31  ;;  %225 = vst.msk [vmem:[#allocation2 + $0x20] sm:$0xff] %vm220_vm1, %v216_v38  ;;  %v1405_v48 = vpack.i.bf16 %v699_v7, %v698_v1  ;;  %v803_v49 = vsel %vm337_vm0, %v801_v13, %v802_v14 }
  0x3e   : > { %226 = vst.msk [vmem:[#allocation2 + $0x28] sm:$0xff] %vm220_vm1, %v217_v39  ;;  %v806_v50 = vsel %vm337_vm0, %v804_v15, %v805_v24  ;;  %v916_v51 = vsel %vm914_vm2, %v1430_v35, 0  ;;  %v807_v52 = vrot.slane %v769_v26, 1  ;;  %v808_v54 = vrot.slane %v770_v29, 1 }
  0x3f   : > { %1371 = vrot.lane.b32.xlu0 %v1370_v60, %s1464_s26  ;;  %v810_v55 = vrot.slane %v771_v36, 1  ;;  %v811_v57 = vrot.slane %v772_v37, 1  ;;  %1208 = vmatpush3.bf16.msra.mxu0 %v916_v51  ;;  %v1400_v53 = vpack.i.bf16 %v695_v9, %v694_v8  ;;  %v791_v58 = vsel %vm337_vm0, %v789_v25, %v790_v40  ;;  %v1434_v9 = vld [vmem:[%s1753_s1] sm:$0xff]  }
  0x40   : > { %v794_v59 = vsel %vm337_vm0, %v792_v41, %v793_v42  ;;  %1230 = vmatpush3.bf16.msra.mxu1 %v916_v51  ;;  %v795_v60 = vrot.slane %v761_v43, 1  ;;  %v799_v63 = vrot.slane %v764_v46, 1  ;;  %1209 = vmatprep.subr.bf16.mxu0 %v1431_v47  ;;  %v1415_v1 = vpack.i.bf16 %v806_v50, %v803_v49 }
  0x41   : > { %1386 = vrot.lane.b32.xlu1 %v1385_v61, %s1464_s26  ;;  %v796_v61 = vrot.slane %v762_v44, 1  ;;  %1226 = vmatprep.subr.bf16.mxu1 %v1431_v47  ;;  %v809_v56 = vsel %vm337_vm0, %v807_v52, %v808_v54  ;;  %v812_v2 = vsel %vm337_vm0, %v810_v55, %v811_v57  ;;  %v1410_v3 = vpack.i.bf16 %v794_v59, %v791_v58 }
  0x42   : > { %v1425_v7 = vpack.i.bf16 %v812_v2, %v809_v56 }
  0x43   : > { %1381 = vrot.lane.b32.xlu0 %v1380_v62, %s1464_s26  ;;  %v798_v62 = vrot.slane %v763_v45, 1  ;;  %1210 = vmatpush3.bf16.msra.mxu0 %v1431_v47  ;;  %v797_v4 = vsel %vm337_vm0, %v795_v60, %v796_v61 }
  0x44   : > { %1231 = vmatpush3.bf16.msra.mxu1 %v1431_v47 }
  0x45   : > { %1396 = vrot.lane.b32.xlu1 %v1395_v0, %s1465_s4  ;;  %v1432_v0 = vld [vmem:[%s1753_s1 + $0x10] sm:$0xff]   ;;  %v800_v5 = vsel %vm337_vm0, %v798_v62, %v799_v63 }
  0x46   : > { %1211 = vmatprep.subr.bf16.mxu0 %v1432_v0  ;;  %1227 = vmatprep.subr.bf16.mxu1 %v1432_v0  ;;  %v1420_v8 = vpack.i.bf16 %v800_v5, %v797_v4 }
  0x47   : > { %1391 = vrot.lane.b32.xlu0 %v1594_v6, %s1465_s4  ;;  %v1433_v6 = vld [vmem:[%s1753_s1 + $0x8] sm:$0xff]   ;;  %1212 = vmatpush3.bf16.msra.mxu0 %v1432_v0 }
  0x48   : > { %1232 = vmatpush3.bf16.msra.mxu1 %v1432_v0  ;;  %1213 = vmatprep.subr.bf16.mxu0 %v1433_v6 }
  0x49   : > { %1406 = vrot.lane.b32.xlu1 %v1405_v48, %s1465_s4  ;;  %1228 = vmatprep.subr.bf16.mxu1 %v1433_v6 }
  0x4b   : > { %1401 = vrot.lane.b32.xlu0 %v1400_v53, %s1465_s4  ;;  %1214 = vmatpush3.bf16.msra.mxu0 %v1433_v6 }
  0x4c   : > { %1233 = vmatpush3.bf16.msra.mxu1 %v1433_v6  ;;  %1215 = vmatprep.subr.bf16.mxu0 %v1434_v9 }
  0x4d   : > { %1416 = vrot.lane.b32.xlu1 %v1415_v1, %s1466_s9  ;;  %1229 = vmatprep.subr.bf16.mxu1 %v1434_v9 }
  0x4f   : > { %1411 = vrot.lane.b32.xlu0 %v1410_v3, %s1466_s9  ;;  %1216 = vmatpush3.bf16.msra.mxu0 %v1434_v9 }
  0x50   : > { %1234 = vmatpush3.bf16.msra.mxu1 %v1434_v9 }
  0x51   : > { %1426 = vrot.lane.b32.xlu1 %v1425_v7, %s1466_s9 }
  0x53   : > { %1421 = vrot.lane.b32.xlu0 %v1420_v8, %s1466_s9 }
  0x87   : > { %v1282_v10 = vpop.permute.xlu1 %1281  ;;  %v1272_v11 = vpop.permute.xlu0 %1271 }
  0x88   : > { %v1284_v12 = vunpack.i.h.bf16 %v1282_v10  ;;  %v1283_v13 = vunpack.i.l.bf16 %v1282_v10  ;;  %v1274_v14 = vunpack.i.h.bf16 %v1272_v11  ;;  %v1273_v15 = vunpack.i.l.bf16 %v1272_v11 }
  0x8a   : > { %283 = vst.msk [vmem:[#allocation2 + $0x10] sm:$0xff] %vm280_vm3, %v1283_v13  ;;  %284 = vst.msk [vmem:[#allocation2 + $0x18] sm:$0xff] %vm280_vm3, %v1284_v12 }
  0x8b   : > { %281 = vst.msk [vmem:[#allocation2] sm:$0xff] %vm280_vm3, %v1273_v15  ;;  %282 = vst.msk [vmem:[#allocation2 + $0x8] sm:$0xff] %vm280_vm3, %v1274_v14  ;;  %v1287_v16 = vpop.permute.xlu1 %1286  ;;  %v1277_v17 = vpop.permute.xlu0 %1276 }
  0x8c   : > { %v1289_v18 = vunpack.i.h.bf16 %v1287_v16  ;;  %v1288_v19 = vunpack.i.l.bf16 %v1287_v16  ;;  %v1279_v20 = vunpack.i.h.bf16 %v1277_v17  ;;  %v1278_v21 = vunpack.i.l.bf16 %v1277_v17 }
  0x8e   : > { %287 = vst.msk [vmem:[#allocation2 + $0x30] sm:$0xff] %vm280_vm3, %v1288_v19  ;;  %288 = vst.msk [vmem:[#allocation2 + $0x38] sm:$0xff] %vm280_vm3, %v1289_v18 }
  0x8f   : > { %285 = vst.msk [vmem:[#allocation2 + $0x20] sm:$0xff] %vm280_vm3, %v1278_v21  ;;  %286 = vst.msk [vmem:[#allocation2 + $0x28] sm:$0xff] %vm280_vm3, %v1279_v20  ;;  %v1297_v22 = vpop.permute.xlu1 %1296  ;;  %v1292_v23 = vpop.permute.xlu0 %1291 }
  0x90   : > { %v1299_v24 = vunpack.i.h.bf16 %v1297_v22  ;;  %v1298_v25 = vunpack.i.l.bf16 %v1297_v22  ;;  %v1294_v26 = vunpack.i.h.bf16 %v1292_v23  ;;  %v1293_v27 = vunpack.i.l.bf16 %v1292_v23 }
  0x92   : > { %391 = vst.msk [vmem:[#allocation2 + $0x20] sm:$0xff] %vm386_vm4, %v1298_v25  ;;  %392 = vst.msk [vmem:[#allocation2 + $0x28] sm:$0xff] %vm386_vm4, %v1299_v24 }
  0x93   : > { %387 = vst.msk [vmem:[#allocation2] sm:$0xff] %vm386_vm4, %v1293_v27  ;;  %388 = vst.msk [vmem:[#allocation2 + $0x8] sm:$0xff] %vm386_vm4, %v1294_v26  ;;  %v1312_v28 = vpop.permute.xlu1 %1311 }
  0x94   : > { %v1314_v29 = vunpack.i.h.bf16 %v1312_v28  ;;  %v1313_v30 = vunpack.i.l.bf16 %v1312_v28 }
  0x95   : > { %v1302_v31 = vpop.permute.xlu0 %1301 }
  0x96   : > { %393 = vst.msk [vmem:[#allocation2 + $0x30] sm:$0xff] %vm386_vm4, %v1313_v30  ;;  %394 = vst.msk [vmem:[#allocation2 + $0x38] sm:$0xff] %vm386_vm4, %v1314_v29  ;;  %v1304_v32 = vunpack.i.h.bf16 %v1302_v31  ;;  %v1303_v33 = vunpack.i.l.bf16 %v1302_v31 }
  0x97   : > { %v1317_v34 = vpop.permute.xlu1 %1316 }
  0x98   : > { %389 = vst.msk [vmem:[#allocation2 + $0x10] sm:$0xff] %vm386_vm4, %v1303_v33  ;;  %390 = vst.msk [vmem:[#allocation2 + $0x18] sm:$0xff] %vm386_vm4, %v1304_v32  ;;  %v1319_v35 = vunpack.i.h.bf16 %v1317_v34  ;;  %v1318_v36 = vunpack.i.l.bf16 %v1317_v34 }
  0x99   : > { %v1307_v37 = vpop.permute.xlu0 %1306 }
  0x9a   : > { %451 = vst.msk [vmem:[#allocation2 + $0x20] sm:$0xff] %vm446_vm5, %v1318_v36  ;;  %452 = vst.msk [vmem:[#allocation2 + $0x28] sm:$0xff] %vm446_vm5, %v1319_v35  ;;  %v1309_v38 = vunpack.i.h.bf16 %v1307_v37  ;;  %v1308_v39 = vunpack.i.l.bf16 %v1307_v37 }
  0x9b   : > { %v1327_v40 = vpop.permute.xlu1 %1326 }
  0x9c   : > { %447 = vst.msk [vmem:[#allocation2] sm:$0xff] %vm446_vm5, %v1308_v39  ;;  %448 = vst.msk [vmem:[#allocation2 + $0x8] sm:$0xff] %vm446_vm5, %v1309_v38  ;;  %v1329_v41 = vunpack.i.h.bf16 %v1327_v40  ;;  %v1328_v42 = vunpack.i.l.bf16 %v1327_v40 }
  0x9d   : > { %v1322_v43 = vpop.permute.xlu0 %1321 }
  0x9e   : > { %453 = vst.msk [vmem:[#allocation2 + $0x30] sm:$0xff] %vm446_vm5, %v1328_v42  ;;  %454 = vst.msk [vmem:[#allocation2 + $0x38] sm:$0xff] %vm446_vm5, %v1329_v41  ;;  %v1324_v44 = vunpack.i.h.bf16 %v1322_v43  ;;  %v1323_v45 = vunpack.i.l.bf16 %v1322_v43 }
  0x9f   : > { %v1337_v46 = vpop.permute.xlu1 %1336 }
  0xa0   : > { %449 = vst.msk [vmem:[#allocation2 + $0x10] sm:$0xff] %vm446_vm5, %v1323_v45  ;;  %450 = vst.msk [vmem:[#allocation2 + $0x18] sm:$0xff] %vm446_vm5, %v1324_v44  ;;  %v1339_v47 = vunpack.i.h.bf16 %v1337_v46  ;;  %v1338_v48 = vunpack.i.l.bf16 %v1337_v46 }
  0xa1   : > { %v1332_v49 = vpop.permute.xlu0 %1331 }
  0xa2   : > { %511 = vst.msk [vmem:[#allocation2 + $0x20] sm:$0xff] %vm506_vm6, %v1338_v48  ;;  %512 = vst.msk [vmem:[#allocation2 + $0x28] sm:$0xff] %vm506_vm6, %v1339_v47  ;;  %v1334_v50 = vunpack.i.h.bf16 %v1332_v49  ;;  %v1333_v51 = vunpack.i.l.bf16 %v1332_v49 }
  0xa3   : > { %v1347_v52 = vpop.permute.xlu1 %1346 }
  0xa4   : > { %507 = vst.msk [vmem:[#allocation2] sm:$0xff] %vm506_vm6, %v1333_v51  ;;  %508 = vst.msk [vmem:[#allocation2 + $0x8] sm:$0xff] %vm506_vm6, %v1334_v50  ;;  %v1349_v54 = vunpack.i.h.bf16 %v1347_v52  ;;  %v1348_v55 = vunpack.i.l.bf16 %v1347_v52 }
  0xa5   : > { %v1342_v57 = vpop.permute.xlu0 %1341 }
  0xa6   : > { %513 = vst.msk [vmem:[#allocation2 + $0x30] sm:$0xff] %vm506_vm6, %v1348_v55  ;;  %514 = vst.msk [vmem:[#allocation2 + $0x38] sm:$0xff] %vm506_vm6, %v1349_v54  ;;  %v1344_v53 = vunpack.i.h.bf16 %v1342_v57  ;;  %v1343_v58 = vunpack.i.l.bf16 %v1342_v57  ;;  %v1185_v55 = vld [vmem:[%s1754_s2] ss:$0 sm:$0xff] }
  0xa7   : > { %v1357_v59 = vpop.permute.xlu1 %1356 }
  0xa8   : > { %509 = vst.msk [vmem:[#allocation2 + $0x10] sm:$0xff] %vm506_vm6, %v1343_v58  ;;  %510 = vst.msk [vmem:[#allocation2 + $0x18] sm:$0xff] %vm506_vm6, %v1344_v53  ;;  %v1359_v60 = vunpack.i.h.bf16 %v1357_v59  ;;  %v1358_v61 = vunpack.i.l.bf16 %v1357_v59 }
  0xa9   : > { %v1352_v62 = vpop.permute.xlu0 %1351 }
  0xaa   : > { %616 = vst.msk [vmem:[#allocation2 + $0x20] sm:$0xff] %vm611_vm7, %v1358_v61  ;;  %617 = vst.msk [vmem:[#allocation2 + $0x28] sm:$0xff] %vm611_vm7, %v1359_v60  ;;  %v1354_v63 = vunpack.i.h.bf16 %v1352_v62  ;;  %v1353_v0 = vunpack.i.l.bf16 %v1352_v62 }
  0xab   : > { %v1367_v1 = vpop.permute.xlu1 %1366 }
  0xac   : > { %612 = vst.msk [vmem:[#allocation2] sm:$0xff] %vm611_vm7, %v1353_v0  ;;  %613 = vst.msk [vmem:[#allocation2 + $0x8] sm:$0xff] %vm611_vm7, %v1354_v63  ;;  %v1369_v56 = vunpack.i.h.bf16 %v1367_v1  ;;  %v1368_v2 = vunpack.i.l.bf16 %v1367_v1 }
  0xad   : > { %v1362_v3 = vpop.permute.xlu0 %1361 }
  0xae   : > { %618 = vst.msk [vmem:[#allocation2 + $0x30] sm:$0xff] %vm611_vm7, %v1368_v2  ;;  %619 = vst.msk [vmem:[#allocation2 + $0x38] sm:$0xff] %vm611_vm7, %v1369_v56  ;;  %v1364_v4 = vunpack.i.h.bf16 %v1362_v3  ;;  %v1363_v5 = vunpack.i.l.bf16 %v1362_v3 }
  0xaf   : > { %v1377_v6 = vpop.permute.xlu1 %1376 }
  0xb0   : > { %614 = vst.msk [vmem:[#allocation2 + $0x10] sm:$0xff] %vm611_vm7, %v1363_v5  ;;  %615 = vst.msk [vmem:[#allocation2 + $0x18] sm:$0xff] %vm611_vm7, %v1364_v4  ;;  %v1379_v7 = vunpack.i.h.bf16 %v1377_v6  ;;  %v1378_v8 = vunpack.i.l.bf16 %v1377_v6 }
  0xb1   : > { %v1372_v9 = vpop.permute.xlu0 %1371 }
  0xb2   : > { %677 = vst.msk [vmem:[#allocation2 + $0x20] sm:$0xff] %vm672_vm8, %v1378_v8  ;;  %678 = vst.msk [vmem:[#allocation2 + $0x28] sm:$0xff] %vm672_vm8, %v1379_v7  ;;  %v1374_v10 = vunpack.i.h.bf16 %v1372_v9  ;;  %v1373_v11 = vunpack.i.l.bf16 %v1372_v9 }
  0xb3   : > { %v1387_v12 = vpop.permute.xlu1 %1386 }
  0xb4   : > { %673 = vst.msk [vmem:[#allocation2] sm:$0xff] %vm672_vm8, %v1373_v11  ;;  %674 = vst.msk [vmem:[#allocation2 + $0x8] sm:$0xff] %vm672_vm8, %v1374_v10  ;;  %v1389_v13 = vunpack.i.h.bf16 %v1387_v12  ;;  %v1388_v14 = vunpack.i.l.bf16 %v1387_v12 }
  0xb5   : > { %v1382_v15 = vpop.permute.xlu0 %1381 }
  0xb6   : > { %679 = vst.msk [vmem:[#allocation2 + $0x30] sm:$0xff] %vm672_vm8, %v1388_v14  ;;  %680 = vst.msk [vmem:[#allocation2 + $0x38] sm:$0xff] %vm672_vm8, %v1389_v13  ;;  %v1384_v16 = vunpack.i.h.bf16 %v1382_v15  ;;  %v1383_v17 = vunpack.i.l.bf16 %v1382_v15 }
  0xb7   : > { %v1397_v18 = vpop.permute.xlu1 %1396 }
  0xb8   : > { %675 = vst.msk [vmem:[#allocation2 + $0x10] sm:$0xff] %vm672_vm8, %v1383_v17  ;;  %676 = vst.msk [vmem:[#allocation2 + $0x18] sm:$0xff] %vm672_vm8, %v1384_v16  ;;  %v1399_v19 = vunpack.i.h.bf16 %v1397_v18  ;;  %v1398_v20 = vunpack.i.l.bf16 %v1397_v18 }
  0xb9   : > { %v1392_v21 = vpop.permute.xlu0 %1391 }
  0xba   : > { %737 = vst.msk [vmem:[#allocation2 + $0x20] sm:$0xff] %vm732_vm9, %v1398_v20  ;;  %738 = vst.msk [vmem:[#allocation2 + $0x28] sm:$0xff] %vm732_vm9, %v1399_v19  ;;  %v1394_v22 = vunpack.i.h.bf16 %v1392_v21  ;;  %v1393_v23 = vunpack.i.l.bf16 %v1392_v21 }
  0xbb   : > { %v1407_v24 = vpop.permute.xlu1 %1406 }
  0xbc   : > { %733 = vst.msk [vmem:[#allocation2] sm:$0xff] %vm732_vm9, %v1393_v23  ;;  %734 = vst.msk [vmem:[#allocation2 + $0x8] sm:$0xff] %vm732_vm9, %v1394_v22  ;;  %v1409_v25 = vunpack.i.h.bf16 %v1407_v24  ;;  %v1408_v26 = vunpack.i.l.bf16 %v1407_v24 }
  0xbd   : > { %v1402_v27 = vpop.permute.xlu0 %1401 }
  0xbe   : > { %739 = vst.msk [vmem:[#allocation2 + $0x30] sm:$0xff] %vm732_vm9, %v1408_v26  ;;  %740 = vst.msk [vmem:[#allocation2 + $0x38] sm:$0xff] %vm732_vm9, %v1409_v25  ;;  %v1404_v28 = vunpack.i.h.bf16 %v1402_v27  ;;  %v1403_v29 = vunpack.i.l.bf16 %v1402_v27 }
  0xbf   : > { %v1417_v30 = vpop.permute.xlu1 %1416 }
  0xc0   : > { %735 = vst.msk [vmem:[#allocation2 + $0x10] sm:$0xff] %vm732_vm9, %v1403_v29  ;;  %736 = vst.msk [vmem:[#allocation2 + $0x18] sm:$0xff] %vm732_vm9, %v1404_v28  ;;  %v1419_v31 = vunpack.i.h.bf16 %v1417_v30  ;;  %v1418_v32 = vunpack.i.l.bf16 %v1417_v30 }
  0xc1   : > { %v1412_v33 = vpop.permute.xlu0 %1411 }
  0xc2   : > { %842 = vst.msk [vmem:[#allocation2 + $0x20] sm:$0xff] %vm837_vm10, %v1418_v32  ;;  %843 = vst.msk [vmem:[#allocation2 + $0x28] sm:$0xff] %vm837_vm10, %v1419_v31  ;;  %v1414_v34 = vunpack.i.h.bf16 %v1412_v33  ;;  %v1413_v35 = vunpack.i.l.bf16 %v1412_v33 }
  0xc3   : > { %v1427_v36 = vpop.permute.xlu1 %1426 }
  0xc4   : > { %838 = vst.msk [vmem:[#allocation2] sm:$0xff] %vm837_vm10, %v1413_v35  ;;  %839 = vst.msk [vmem:[#allocation2 + $0x8] sm:$0xff] %vm837_vm10, %v1414_v34  ;;  %v1429_v37 = vunpack.i.h.bf16 %v1427_v36  ;;  %v1428_v38 = vunpack.i.l.bf16 %v1427_v36 }
  0xc5   : > { %v1422_v39 = vpop.permute.xlu0 %1421 }
  0xc6   : > { %844 = vst.msk [vmem:[#allocation2 + $0x30] sm:$0xff] %vm837_vm10, %v1428_v38  ;;  %845 = vst.msk [vmem:[#allocation2 + $0x38] sm:$0xff] %vm837_vm10, %v1429_v37  ;;  %v1424_v40 = vunpack.i.h.bf16 %v1422_v39  ;;  %v1423_v41 = vunpack.i.l.bf16 %v1422_v39 }
  0xc8   : > { %840 = vst.msk [vmem:[#allocation2 + $0x10] sm:$0xff] %vm837_vm10, %v1423_v41  ;;  %841 = vst.msk [vmem:[#allocation2 + $0x18] sm:$0xff] %vm837_vm10, %v1424_v40 }
  0xc9   : > { %v850_v42 = vld [vmem:[#allocation2 + $0x20] sm:$0xff]  ;;  %v851_v43 = vld [vmem:[#allocation2 + $0x28] sm:$0xff] }
  0xca   : > { %v856_v44 = vpack.c.bf16 %v851_v43, %v850_v42 }
  0xcb   : > { %v846_v45 = vld [vmem:[#allocation2] sm:$0xff]  ;;  %v847_v46 = vld [vmem:[#allocation2 + $0x8] sm:$0xff] }
  0xcc   : > { %v854_v47 = vpack.c.bf16 %v847_v46, %v846_v45  ;;  %1221 = vmatprep.mubr.msk.bf16.mxu1 %vm901_vm11, %v856_v44 }
  0xcd   : > { %v852_v48 = vld [vmem:[#allocation2 + $0x30] sm:$0xff]  ;;  %v853_v49 = vld [vmem:[#allocation2 + $0x38] sm:$0xff] }
  0xce   : > { %1217 = vmatprep.mubr.msk.bf16.mxu0 %vm901_vm11, %v854_v47  ;;  %v857_v50 = vpack.c.bf16 %v853_v49, %v852_v48 }
  0xcf   : > { %v848_v51 = vld [vmem:[#allocation2 + $0x10] sm:$0xff]  ;;  %v849_v52 = vld [vmem:[#allocation2 + $0x18] sm:$0xff] }
  0xd0   : > { %v855_v54 = vpack.c.bf16 %v849_v52, %v848_v51  ;;  %1222 = vmatmul.mubr.msk.bf16.vlgmr.msra.gmra.mxu1 %vm901_vm11, %v857_v50 }
  0xd2   : > { %1218 = vmatmul.mubr.msk.bf16.vlgmr.msra.gmra.mxu0 %vm901_vm11, %v855_v54 }
 0x190   : > { %v1223_v57 = vpop.f32.mrf.mxu1 }
 0x191   : > { %v977_v53 = vadd.f32 %v1223_v57, %v1185_v55 }
 0x192   : > { %v1219_v58 = vpop.f32.mrf.mxu0  ;;  %v968_v59 = vpop.f32.mrf.mxu1 }
 0x193   : > { %v961_v60 = vadd.f32 %v1219_v58, %v1185_v55  ;;  %v989_v61 = vpack.c.bf16 %v977_v53, %v977_v53  ;;  %v969_v62 = vadd.f32 %v1185_v55, %v968_v59 }
 0x194   : > { %v952_v63 = vpop.f32.mrf.mxu0  ;;  %v1224_v0 = vpop.f32.mrf.mxu1 }
 0x195   : > { %v985_v1 = vpack.c.bf16 %v961_v60, %v961_v60  ;;  %998 = vst.msk [vmem:[%s1725_s21 + $0x18] sm:$0xf] %vm991_vm12, %v989_v61  ;;  %v953_v56 = vadd.f32 %v1185_v55, %v952_v63  ;;  %v987_v2 = vpack.c.bf16 %v969_v62, %v969_v62  ;;  %v980_v3 = vadd.f32 %v1224_v0, %v1185_v55 }
 0x196   : > { %v1220_v4 = vpop.f32.mrf.mxu0  ;;  %v971_v5 = vpop.f32.mrf.mxu1 }
 0x197   : > { %994 = vst.msk [vmem:[%s1725_s21 + $0x8] sm:$0xf] %vm991_vm12, %v985_v1  ;;  %v983_v6 = vpack.c.bf16 %v953_v56, %v953_v56  ;;  %996 = vst.msk [vmem:[%s1725_s21 + $0x10] sm:$0xf] %vm991_vm12, %v987_v2  ;;  %v964_v7 = vadd.f32 %v1220_v4, %v1185_v55  ;;  %v990_v8 = vpack.c.bf16 %v980_v3, %v980_v3 }
 0x198   : > { %v972_v9 = vadd.f32 %v1185_v55, %v971_v5  ;;  %v955_v10 = vpop.f32.mrf.mxu0 }
 0x199   : > { %992 = vst.msk [vmem:[%s1725_s21] sm:$0xf] %vm991_vm12, %v983_v6  ;;  %v986_v11 = vpack.c.bf16 %v964_v7, %v964_v7  ;;  %999 = vst.msk [vmem:[%s1725_s21 + $0x1c] sm:$0xf] %vm991_vm12, %v990_v8  ;;  %v956_v12 = vadd.f32 %v1185_v55, %v955_v10 }
 0x19a   : > { %v988_v13 = vpack.c.bf16 %v972_v9, %v972_v9 }
 0x19b   : > { %995 = vst.msk [vmem:[%s1725_s21 + $0xc] sm:$0xf] %vm991_vm12, %v986_v11  ;;  %v984_v14 = vpack.c.bf16 %v956_v12, %v956_v12 }
 0x19c   : > { %997 = vst.msk [vmem:[%s1725_s21 + $0x14] sm:$0xf] %vm991_vm12, %v988_v13 }
 0x19d   : > { %993 = vst.msk [vmem:[%s1725_s21 + $0x4] sm:$0xf] %vm991_vm12, %v984_v14 }
 0x19e PF: > { %s13_s14 = sadd.s32 1, %s1457_s14   ;;  %s1756_s12 = smov %s1453_s13 }
 0x19f   : > { %p10_p6 = scmp.ge.s32.totalorder %s13_s14, 4   ;;  %s1757_s13 = smov %s1759_s15 }
 0x1a1   :  { %12 = sbr.rel (!%p10_p6) target bundleno = 2 (0x2), region = 68 }

// kernel: _lambda_.9
= control target key start
LH: loop header
LB: loop body
LE: loop exit
PB: predicated region body
PF: predicated region fallthrough
CT: control target
= control target key end

     0   :  { %s1551_s15 = smov 0   ;;  %s1553_s16 = smov 0   ;;  %s1819_s0 = inlined_call_operand.vmem [shape: bf16[8,9,9,8], index: 0, kind: input, shape index: {}]   ;;  %s1820_s1 = inlined_call_operand.vmem [shape: bf16[72,16], index: 1, kind: input, shape index: {}]   ;;  %s1821_s2 = inlined_call_operand.vmem [shape: f32[1,16], index: 2, kind: input, shape index: {}]   ;;  %s1822_s3 = inlined_call_operand.vmem [shape: f32[1,16], index: 3, kind: input, shape index: {}]   ;;  %s1823_s4 = inlined_call_operand.vmem [shape: bf16[2,8,8,16], index: 4, kind: output, shape index: {}]  }
   0x1   :  { %s1555_s17 = smov 0  }
   0x2 LB: > { %s26_s18 = sadd.s32 1, %s1512_s16  ;;  %p1166_p0 = scmp.ge.s32.totalorder %s1516_s17, 1  ;;  %s1516_s17 = sphi %s1555_s17, %s14_s17   ;;  %s1512_s16 = sphi %s1553_s16, %s1825_s16   ;;  %s1508_s15 = sphi %s1551_s15, %s1824_s15  }
   0x3   : > { %p28_p1 = scmp.ge.s32.totalorder %s26_s18, 2  ;;  %p178_p2 = scmp.lt.s32.totalorder %s1516_s17, 3 }
   0x5   : > { %s1827_s18 = smov (%p28_p1, %s26_s18), 0  ;;  %p179_p3 = pnand %p1166_p0, %p178_p2 }
   0x6   : > { %s1167_s19 = sshll.u32 (!%p179_p3), %s1508_s15, 2  ;;  %s1518_s24 = smov (!%p179_p3), 8  }
   0x7   : > { %182 = sbr.rel (%p179_p3) target bundleno = 419 (0x1a3), region = 36  ;;  %p210_p4 = scmp.lt.s32.totalorder (!%p179_p3), %s1167_s19, 7 }
   0x8   : > { %s1519_s25 = smov (!%p179_p3), 16   ;;  %s1520_s26 = smov (!%p179_p3), 24  }
   0x9   : > { %s1521_s27 = smov (!%p179_p3), 32   ;;  %s1522_s28 = smov (!%p179_p3), 40  }
   0xa   : > { %s1523_s29 = smov (!%p179_p3), 48   ;;  %s1524_s8 = smov (!%p179_p3), 56  }
   0xb   : > { %s1525_s13 = smov (!%p179_p3), 64   ;;  %p217_p5 = scmp.lt.s32.totalorder (!%p179_p3), %s1508_s15, 1 }
   0xc   : > { %s1829_s19 = smov (!%p210_p4, %s1167_s19), 7  ;;  %vm364_vm0 = vcmask 1046528   ;;  %vm247_vm1 = vcmask 64512   ;;  %vm941_vm2 = vcmask 1043456   ;;  %vm307_vm3 = vcmask 130112  }
   0xd   : > { %s1296_s20 = smul.u32 72, %s1829_s19  ;;  %vm413_vm4 = vcmask 195712   ;;  %vm473_vm5 = vcmask 261312   ;;  %vm533_vm6 = vcmask 326912   ;;  %vm638_vm7 = vcmask 392512   ;;  %s1831_s15 = smov (!%p217_p5, %s1508_s15), 1 }
   0xe   : > { %vm699_vm8 = vcmask 458112   ;;  %vm759_vm9 = vcmask 523712   ;;  %vm864_vm10 = vcmask 589312   ;;  %vm928_vm11 = vcmask 588800  }
   0xf   : > { %s1575_s23 = scalar_lea.vmem %s1819_s0, %s1296_s20  ;;  %vm1049_vm13 = vcmask 125952  }
  0x10   : > { %v1173_v0 = vld [vmem:[%s1575_s23 + $0x58] ss:$8 sps:$4 sm:$0xff]   ;;  %v1171_v1 = vld [vmem:[%s1575_s23 + $0x48] ss:$8 sps:$4 sm:$0xff]   ;;  %v325_v9 = vld [vmem:[%s1575_s23 + $0x24] sm:$0x1] }
  0x11   : > { %v1177_v2 = vld [vmem:[%s1575_s23 + $0x78] ss:$8 sps:$4 sm:$0xff]   ;;  %v269_v3 = vunpack.c.l.bf16 %v1173_v0  ;;  %v270_v4 = vunpack.c.h.bf16 %v1173_v0  ;;  %v267_v5 = vunpack.c.l.bf16 %v1171_v1  ;;  %v268_v6 = vunpack.c.h.bf16 %v1171_v1  ;;  %v1175_v7 = vld [vmem:[%s1575_s23 + $0x68] ss:$8 sps:$4 sm:$0xff]   ;;  %v327_v14 = vld [vmem:[%s1575_s23 + $0x2c] sm:$0x1] }
  0x12   : > { %v324_v8 = vld [vmem:[%s1575_s23 + $0x20] ss:$8 sps:$4 sm:$0xff]   ;;  %v273_v10 = vunpack.c.l.bf16 %v1177_v2  ;;  %v274_v11 = vunpack.c.h.bf16 %v1177_v2  ;;  %v271_v12 = vunpack.c.l.bf16 %v1175_v7  ;;  %v272_v13 = vunpack.c.h.bf16 %v1175_v7  ;;  %v317_v16 = vld [vmem:[%s1575_s23 + $0x4] sm:$0x1]  ;;  %v319_v21 = vld [vmem:[%s1575_s23 + $0xc] sm:$0x1] }
  0x13   : > { %v316_v15 = vld [vmem:[%s1575_s23] ss:$8 sps:$4 sm:$0xff]   ;;  %v1339_v17 = vpack.i.bf16 %v270_v4, %v269_v3  ;;  %v1329_v18 = vpack.i.bf16 %v268_v6, %v267_v5  ;;  %v340_v19 = vunpack.c.l.bf16 %v324_v8  ;;  %v341_v20 = vunpack.c.l.bf16 %v325_v9  ;;  %v328_v26 = vld [vmem:[%s1575_s23 + $0x30] ss:$8 sps:$4 sm:$0xff]   ;;  %v329_v31 = vld [vmem:[%s1575_s23 + $0x34] sm:$0x1] }
  0x14   : > { %v1344_v22 = vpack.i.bf16 %v274_v11, %v273_v10  ;;  %v1334_v23 = vpack.i.bf16 %v272_v13, %v271_v12  ;;  %v342_v24 = vunpack.c.h.bf16 %v324_v8  ;;  %v343_v25 = vunpack.c.l.bf16 %v327_v14  ;;  %v331_v36 = vld [vmem:[%s1575_s23 + $0x3c] sm:$0x1]  ;;  %v320_v41 = vld [vmem:[%s1575_s23 + $0x10] ss:$8 sps:$4 sm:$0xff]   ;;  %v321_v46 = vld [vmem:[%s1575_s23 + $0x14] sm:$0x1] }
  0x15   : > { %1340 = vrot.lane.b32.xlu1 %v1339_v17, %s1518_s24  ;;  %1330 = vrot.lane.b32.xlu0 %v1329_v18, %s1518_s24  ;;  %v377_v27 = vrot.slane %v340_v19, 1  ;;  %v378_v28 = vrot.slane %v341_v20, 1  ;;  %v332_v29 = vunpack.c.l.bf16 %v316_v15  ;;  %v333_v30 = vunpack.c.l.bf16 %v317_v16  ;;  %v323_v51 = vld [vmem:[%s1575_s23 + $0x1c] sm:$0x1]  ;;  %v1183_v56 = vld [vmem:[%s1575_s23 + $0xb0] ss:$8 sps:$4 sm:$0xff]  }
  0x16   : > { %v380_v32 = vrot.slane %v342_v24, 1  ;;  %v381_v33 = vrot.slane %v343_v25, 1  ;;  %v334_v34 = vunpack.c.h.bf16 %v316_v15  ;;  %v335_v35 = vunpack.c.l.bf16 %v319_v21  ;;  %v1179_v1 = vld [vmem:[%s1575_s23 + $0x90] ss:$8 sps:$4 sm:$0xff]   ;;  %v1185_v6 = vld [vmem:[%s1575_s23 + $0xc0] ss:$8 sps:$4 sm:$0xff]  }
  0x17   : > { %v379_v37 = vsel %vm364_vm0, %v377_v27, %v378_v28  ;;  %v365_v38 = vrot.slane %v332_v29, 1  ;;  %v366_v39 = vrot.slane %v333_v30, 1  ;;  %v344_v40 = vunpack.c.l.bf16 %v328_v26  ;;  %v1181_v13 = vld [vmem:[%s1575_s23 + $0xa0] ss:$8 sps:$4 sm:$0xff]   ;;  %v1203_v25 = vld [vmem:[%s1575_s23 + $0xb0] ss:$8 sps:$4 sm:$0xff]  }
  0x18   : > { %v382_v42 = vsel %vm364_vm0, %v380_v32, %v381_v33  ;;  %v368_v43 = vrot.slane %v334_v34, 1  ;;  %v369_v44 = vrot.slane %v335_v35, 1  ;;  %v345_v45 = vunpack.c.l.bf16 %v329_v31  ;;  %v1191_v14 = vld [vmem:[%s1575_s23 + $0xf8] ss:$8 sps:$4 sm:$0xff]   ;;  %v1206_v27 = vld [vmem:[%s1575_s23 + $0xbc] sm:$0x1] }
  0x19   : > { %1345 = vrot.lane.b32.xlu1 %v1344_v22, %s1518_s24  ;;  %1335 = vrot.lane.b32.xlu0 %v1334_v23, %s1518_s24  ;;  %v1354_v47 = vpack.i.bf16 %v382_v42, %v379_v37  ;;  %v367_v48 = vsel %vm364_vm0, %v365_v38, %v366_v39  ;;  %v346_v49 = vunpack.c.h.bf16 %v328_v26  ;;  %v347_v50 = vunpack.c.l.bf16 %v331_v36  ;;  %v1187_v20 = vld [vmem:[%s1575_s23 + $0xd8] ss:$8 sps:$4 sm:$0xff]   ;;  %v1204_v26 = vld [vmem:[%s1575_s23 + $0xb4] sm:$0x1]  ;;  %s1256_s24 = sshll.u32 %s1831_s15, 5 }
  0x1a   : > { %v370_v52 = vsel %vm364_vm0, %v368_v43, %v369_v44  ;;  %v383_v53 = vrot.slane %v344_v40, 1  ;;  %v384_v54 = vrot.slane %v345_v45, 1  ;;  %v336_v55 = vunpack.c.l.bf16 %v320_v41  ;;  %v1193_v29 = vld [vmem:[%s1575_s23 + $0x108] ss:$8 sps:$4 sm:$0xff]   ;;  %v1196_v34 = vld [vmem:[%s1575_s23 + $0x94] sm:$0x1] }
  0x1b   : > { %v1349_v57 = vpack.i.bf16 %v370_v52, %v367_v48  ;;  %v386_v58 = vrot.slane %v346_v49, 1  ;;  %v387_v59 = vrot.slane %v347_v50, 1  ;;  %v337_v60 = vunpack.c.l.bf16 %v321_v46  ;;  %v1195_v33 = vld [vmem:[%s1575_s23 + $0x90] ss:$8 sps:$4 sm:$0xff]   ;;  %v1198_v35 = vld [vmem:[%s1575_s23 + $0x9c] sm:$0x1] }
  0x1c   : > { %v385_v61 = vsel %vm364_vm0, %v383_v53, %v384_v54  ;;  %v338_v62 = vunpack.c.h.bf16 %v320_v41  ;;  %v339_v63 = vunpack.c.l.bf16 %v323_v51  ;;  %v371_v0 = vrot.slane %v336_v55, 1  ;;  %v1189_v36 = vld [vmem:[%s1575_s23 + $0xe8] ss:$8 sps:$4 sm:$0xff]   ;;  %v1208_v49 = vld [vmem:[%s1575_s23 + $0xc4] sm:$0x1] }
  0x1d   : > { %1355 = vrot.lane.b32.xlu1 %v1354_v47, %s1519_s25  ;;  %1350 = vrot.lane.b32.xlu0 %v1349_v57, %s1519_s25  ;;  %v388_v2 = vsel %vm364_vm0, %v386_v58, %v387_v59  ;;  %v372_v3 = vrot.slane %v337_v60, 1  ;;  %v437_v4 = vunpack.c.l.bf16 %v1183_v56  ;;  %v438_v5 = vunpack.c.h.bf16 %v1183_v56  ;;  %v1207_v48 = vld [vmem:[%s1575_s23 + $0xc0] ss:$8 sps:$4 sm:$0xff]   ;;  %v1210_v50 = vld [vmem:[%s1575_s23 + $0xcc] sm:$0x1] }
  0x1e   : > { %v1369_v7 = vpack.i.bf16 %v388_v2, %v385_v61  ;;  %v374_v8 = vrot.slane %v338_v62, 1  ;;  %v375_v9 = vrot.slane %v339_v63, 1  ;;  %v433_v11 = vunpack.c.l.bf16 %v1179_v1  ;;  %v1199_v55 = vld [vmem:[%s1575_s23 + $0xa0] ss:$8 sps:$4 sm:$0xff]   ;;  %v1200_v60 = vld [vmem:[%s1575_s23 + $0xa4] sm:$0x1] }
  0x1f   : > { %v373_v10 = vsel %vm364_vm0, %v371_v0, %v372_v3  ;;  %v434_v12 = vunpack.c.h.bf16 %v1179_v1  ;;  %v439_v16 = vunpack.c.l.bf16 %v1185_v6  ;;  %v440_v17 = vunpack.c.h.bf16 %v1185_v6  ;;  %v1202_v1 = vld [vmem:[%s1575_s23 + $0xac] sm:$0x1] }
  0x20   : > { %v376_v15 = vsel %vm364_vm0, %v374_v8, %v375_v9  ;;  %v1374_v19 = vpack.i.bf16 %v438_v5, %v437_v4  ;;  %v435_v21 = vunpack.c.l.bf16 %v1181_v13  ;;  %v436_v22 = vunpack.c.h.bf16 %v1181_v13 }
  0x21   : > { %1370 = vrot.lane.b32.xlu1 %v1369_v7, %s1519_s25  ;;  %v1359_v18 = vpack.i.bf16 %v376_v15, %v373_v10  ;;  %v497_v23 = vunpack.c.l.bf16 %v1191_v14  ;;  %v498_v24 = vunpack.c.h.bf16 %v1191_v14  ;;  %v1364_v28 = vpack.i.bf16 %v434_v12, %v433_v11 }
  0x22   : > { %v1384_v30 = vpack.i.bf16 %v440_v17, %v439_v16  ;;  %v493_v31 = vunpack.c.l.bf16 %v1187_v20  ;;  %v494_v32 = vunpack.c.h.bf16 %v1187_v20  ;;  %v566_v37 = vunpack.c.l.bf16 %v1203_v25 }
  0x23   : > { %1360 = vrot.lane.b32.xlu0 %v1359_v18, %s1519_s25  ;;  %v567_v38 = vunpack.c.l.bf16 %v1204_v26  ;;  %v568_v39 = vunpack.c.h.bf16 %v1203_v25  ;;  %v569_v40 = vunpack.c.l.bf16 %v1206_v27  ;;  %v1379_v41 = vpack.i.bf16 %v436_v22, %v435_v21  ;;  %v1215_v27 = vld [vmem:[%s1575_s23 + $0x28] ss:$8 sps:$4 sm:$0xff]  }
  0x24   : > { %v1394_v42 = vpack.i.bf16 %v498_v24, %v497_v23  ;;  %v499_v43 = vunpack.c.l.bf16 %v1193_v29  ;;  %v558_v44 = vunpack.c.l.bf16 %v1195_v33  ;;  %v559_v45 = vunpack.c.l.bf16 %v1196_v34 }
  0x25   : > { %1375 = vrot.lane.b32.xlu1 %v1374_v19, %s1520_s26  ;;  %v560_v46 = vunpack.c.h.bf16 %v1195_v33  ;;  %v561_v47 = vunpack.c.l.bf16 %v1198_v35  ;;  %v1389_v51 = vpack.i.bf16 %v494_v32, %v493_v31  ;;  %v500_v52 = vunpack.c.h.bf16 %v1193_v29  ;;  %v1211_v29 = vld [vmem:[%s1575_s23 + $0x8] ss:$8 sps:$4 sm:$0xff]   ;;  %v1213_v33 = vld [vmem:[%s1575_s23 + $0x18] ss:$8 sps:$4 sm:$0xff]  }
  0x26   : > { %v495_v53 = vunpack.c.l.bf16 %v1189_v36  ;;  %v496_v54 = vunpack.c.h.bf16 %v1189_v36  ;;  %v602_v56 = vrot.slane %v566_v37, 1  ;;  %v603_v57 = vrot.slane %v567_v38, 1  ;;  %v1223_v37 = vld [vmem:[%s1575_s23 + $0x70] ss:$8 sps:$4 sm:$0xff]  }
  0x27   : > { %1365 = vrot.lane.b32.xlu0 %v1364_v28, %s1520_s26  ;;  %v605_v58 = vrot.slane %v568_v39, 1  ;;  %v606_v59 = vrot.slane %v569_v40, 1  ;;  %v570_v61 = vunpack.c.l.bf16 %v1207_v48  ;;  %v571_v62 = vunpack.c.l.bf16 %v1208_v49 }
  0x28   : > { %v572_v63 = vunpack.c.h.bf16 %v1207_v48  ;;  %v573_v0 = vunpack.c.l.bf16 %v1210_v50  ;;  %v590_v2 = vrot.slane %v558_v44, 1  ;;  %v591_v3 = vrot.slane %v559_v45, 1 }
  0x29   : > { %1385 = vrot.lane.b32.xlu1 %v1384_v30, %s1520_s26  ;;  %v593_v4 = vrot.slane %v560_v46, 1  ;;  %v594_v5 = vrot.slane %v561_v47, 1  ;;  %v1404_v6 = vpack.i.bf16 %v500_v52, %v499_v43  ;;  %v562_v7 = vunpack.c.l.bf16 %v1199_v55  ;;  %v1217_v30 = vld [vmem:[%s1575_s23 + $0x38] ss:$8 sps:$4 sm:$0xff]   ;;  %v1235_v46 = vld [vmem:[%s1575_s23 + $0x28] ss:$8 sps:$4 sm:$0xff]  }
  0x2a   : > { %v563_v8 = vunpack.c.l.bf16 %v1200_v60  ;;  %v604_v9 = vsel %vm364_vm0, %v602_v56, %v603_v57  ;;  %v607_v10 = vsel %vm364_vm0, %v605_v58, %v606_v59  ;;  %v564_v11 = vunpack.c.h.bf16 %v1199_v55  ;;  %v1236_v47 = vld [vmem:[%s1575_s23 + $0x2c] sm:$0x1]  ;;  %v1227_v55 = vld [vmem:[%s1575_s23 + $0x8] ss:$8 sps:$4 sm:$0xff]  }
  0x2b   : > { %1380 = vrot.lane.b32.xlu0 %v1379_v41, %s1520_s26  ;;  %v565_v12 = vunpack.c.l.bf16 %v1202_v1  ;;  %v608_v13 = vrot.slane %v570_v61, 1  ;;  %v609_v14 = vrot.slane %v571_v62, 1  ;;  %v611_v15 = vrot.slane %v572_v63, 1  ;;  %v1219_v41 = vld [vmem:[%s1575_s23 + $0x50] ss:$8 sps:$4 sm:$0xff]  }
  0x2c   : > { %v612_v16 = vrot.slane %v573_v0, 1  ;;  %v1399_v17 = vpack.i.bf16 %v496_v54, %v495_v53  ;;  %v592_v18 = vsel %vm364_vm0, %v590_v2, %v591_v3  ;;  %v595_v19 = vsel %vm364_vm0, %v593_v4, %v594_v5  ;;  %v1646_v53 = vld [vmem:[%s1575_s23 + $0x80] ss:$8 sps:$4 sm:$0xff]   ;;  %v1238_v54 = vld [vmem:[%s1575_s23 + $0x34] sm:$0x1] }
  0x2d   : > { %1395 = vrot.lane.b32.xlu1 %v1394_v42, %s1521_s27  ;;  %v596_v20 = vrot.slane %v562_v7, 1  ;;  %v597_v21 = vrot.slane %v563_v8, 1  ;;  %v599_v22 = vrot.slane %v564_v11, 1  ;;  %v600_v23 = vrot.slane %v565_v12, 1  ;;  %v1651_v56 = vld [vmem:[%s1575_s23 + $0x60] ss:$8 sps:$4 sm:$0xff]  }
  0x2e   : > { %v1414_v24 = vpack.i.bf16 %v607_v10, %v604_v9  ;;  %v610_v25 = vsel %vm364_vm0, %v608_v13, %v609_v14  ;;  %v613_v26 = vsel %vm364_vm0, %v611_v15, %v612_v16  ;;  %v1409_v28 = vpack.i.bf16 %v595_v19, %v592_v18  ;;  %v1228_v63 = vld [vmem:[%s1575_s23 + $0xc] sm:$0x1]  ;;  %v1230_v3 = vld [vmem:[%s1575_s23 + $0x14] sm:$0x1]  ;;  %v233_v5 = vld [vmem:[%s1575_s23 + $0x10] ss:$8 sps:$4 sm:$0xff]  }
  0x2f   : > { %1390 = vrot.lane.b32.xlu0 %v1389_v51, %s1521_s27  ;;  %v598_v31 = vsel %vm364_vm0, %v596_v20, %v597_v21  ;;  %v601_v32 = vsel %vm364_vm0, %v599_v22, %v600_v23  ;;  %v1424_v34 = vpack.i.bf16 %v613_v26, %v610_v25  ;;  %v663_v35 = vunpack.c.l.bf16 %v1215_v27  ;;  %v1239_v10 = vld [vmem:[%s1575_s23 + $0x38] ss:$8 sps:$4 sm:$0xff]   ;;  %v1240_v11 = vld [vmem:[%s1575_s23 + $0x3c] sm:$0x1]  ;;  %v1242_v20 = vld [vmem:[%s1575_s23 + $0x44] sm:$0x1] }
  0x30   : > { %v664_v36 = vunpack.c.h.bf16 %v1215_v27  ;;  %v659_v38 = vunpack.c.l.bf16 %v1211_v29  ;;  %v660_v39 = vunpack.c.h.bf16 %v1211_v29  ;;  %v665_v40 = vunpack.c.l.bf16 %v1217_v30  ;;  %v231_v12 = vld [vmem:[%s1575_s23] ss:$8 sps:$4 sm:$0xff]  }
  0x31   : > { %1405 = vrot.lane.b32.xlu1 %v1404_v6, %s1521_s27  ;;  %v1419_v42 = vpack.i.bf16 %v601_v32, %v598_v31  ;;  %v666_v43 = vunpack.c.h.bf16 %v1217_v30  ;;  %v661_v44 = vunpack.c.l.bf16 %v1213_v33  ;;  %v662_v45 = vunpack.c.h.bf16 %v1213_v33  ;;  %v235_v23 = vld [vmem:[%s1575_s23 + $0x20] ss:$8 sps:$4 sm:$0xff]   ;;  %v1232_v30 = vld [vmem:[%s1575_s23 + $0x1c] sm:$0x1]  ;;  %v1234_v31 = vld [vmem:[%s1575_s23 + $0x24] sm:$0x1] }
  0x32   : > { %v723_v48 = vunpack.c.l.bf16 %v1223_v37  ;;  %v724_v49 = vunpack.c.h.bf16 %v1223_v37  ;;  %v1434_v50 = vpack.i.bf16 %v664_v36, %v663_v35  ;;  %v719_v51 = vunpack.c.l.bf16 %v1219_v41  ;;  %v1231_v27 = vld [vmem:[%s1575_s23 + $0x18] ss:$8 sps:$4 sm:$0xff]  }
  0x33   : > { %1400 = vrot.lane.b32.xlu0 %v1399_v17, %s1521_s27  ;;  %v720_v52 = vunpack.c.h.bf16 %v1219_v41  ;;  %v792_v57 = vunpack.c.l.bf16 %v1235_v46  ;;  %v793_v58 = vunpack.c.l.bf16 %v1236_v47  ;;  %v794_v59 = vunpack.c.h.bf16 %v1235_v46  ;;  %v237_v17 = vld [vmem:[%s1575_s23 + $0x30] ss:$8 sps:$4 sm:$0xff]   ;;  %v1489_v35 = vld [vmem:[%s1820_s1 + $0x20] ss:$0 sps:$4 sm:$0xff]   ;;  %s1792_s27 = scalar_lea.vmem %s1823_s4, %s1256_s24 }
  0x34   : > { %v1429_v60 = vpack.i.bf16 %v660_v39, %v659_v38  ;;  %v1444_v61 = vpack.i.bf16 %v666_v43, %v665_v40  ;;  %v1439_v62 = vpack.i.bf16 %v662_v45, %v661_v44  ;;  %v1454_v0 = vpack.i.bf16 %v724_v49, %v723_v48  ;;  %v1490_v47 = vld [vmem:[%s1820_s1 + $0x18] sm:$0xff]   ;;  %1294 = vmatprep.subr.msk.bf16.mxu0 %vm941_vm2, %v1489_v35 }
  0x35   : > { %1415 = vrot.lane.b32.xlu1 %v1414_v24, %s1522_s28  ;;  %v725_v1 = vunpack.c.l.bf16 %v1646_v53  ;;  %v795_v2 = vunpack.c.l.bf16 %v1238_v54  ;;  %v784_v4 = vunpack.c.l.bf16 %v1227_v55  ;;  %v1658_v6 = vpack.i.bf16 %v720_v52, %v719_v51  ;;  %1295 = vmatprep.subr.msk.bf16.mxu1 %vm941_vm2, %v1489_v35 }
  0x36   : > { %v726_v7 = vunpack.c.h.bf16 %v1646_v53  ;;  %v721_v8 = vunpack.c.l.bf16 %v1651_v56  ;;  %v722_v9 = vunpack.c.h.bf16 %v1651_v56  ;;  %v828_v13 = vrot.slane %v792_v57, 1 }
  0x37   : > { %1410 = vrot.lane.b32.xlu0 %v1409_v28, %s1522_s28  ;;  %v829_v14 = vrot.slane %v793_v58, 1  ;;  %v831_v15 = vrot.slane %v794_v59, 1  ;;  %v785_v16 = vunpack.c.l.bf16 %v1228_v63  ;;  %v786_v18 = vunpack.c.h.bf16 %v1227_v55 }
  0x38   : > { %v787_v19 = vunpack.c.l.bf16 %v1230_v3  ;;  %v241_v21 = vunpack.c.l.bf16 %v233_v5  ;;  %v242_v22 = vunpack.c.h.bf16 %v233_v5  ;;  %v832_v24 = vrot.slane %v795_v2, 1 }
  0x39   : > { %1425 = vrot.lane.b32.xlu1 %v1424_v34, %s1522_s28  ;;  %v816_v25 = vrot.slane %v784_v4, 1  ;;  %v796_v26 = vunpack.c.l.bf16 %v1239_v10  ;;  %v239_v28 = vunpack.c.l.bf16 %v231_v12  ;;  %v797_v29 = vunpack.c.l.bf16 %v1240_v11 }
  0x3a   : > { %250 = vst.msk [vmem:[#allocation2 + $0x10] sm:$0xff] %vm247_vm1, %v241_v21  ;;  %251 = vst.msk [vmem:[#allocation2 + $0x18] sm:$0xff] %vm247_vm1, %v242_v22  ;;  %v240_v32 = vunpack.c.h.bf16 %v231_v12  ;;  %v245_v33 = vunpack.c.l.bf16 %v237_v17  ;;  %v246_v34 = vunpack.c.h.bf16 %v237_v17  ;;  %v798_v36 = vunpack.c.h.bf16 %v1239_v10 }
  0x3b   : > { %1420 = vrot.lane.b32.xlu0 %v1419_v42, %s1522_s28  ;;  %v799_v37 = vunpack.c.l.bf16 %v1242_v20  ;;  %248 = vst.msk [vmem:[#allocation2] sm:$0xff] %vm247_vm1, %v239_v28  ;;  %v243_v38 = vunpack.c.l.bf16 %v235_v23  ;;  %v244_v39 = vunpack.c.h.bf16 %v235_v23  ;;  %v817_v40 = vrot.slane %v785_v16, 1 }
  0x3c   : > { %v819_v41 = vrot.slane %v786_v18, 1  ;;  %v820_v42 = vrot.slane %v787_v19, 1  ;;  %v788_v43 = vunpack.c.l.bf16 %v1231_v27  ;;  %249 = vst.msk [vmem:[#allocation2 + $0x8] sm:$0xff] %vm247_vm1, %v240_v32  ;;  %254 = vst.msk [vmem:[#allocation2 + $0x30] sm:$0xff] %vm247_vm1, %v245_v33  ;;  %v789_v44 = vunpack.c.l.bf16 %v1232_v30 }
  0x3d   : > { %1435 = vrot.lane.b32.xlu1 %v1434_v50, %s1523_s29  ;;  %255 = vst.msk [vmem:[#allocation2 + $0x38] sm:$0xff] %vm247_vm1, %v246_v34  ;;  %v790_v45 = vunpack.c.h.bf16 %v1231_v27  ;;  %v791_v46 = vunpack.c.l.bf16 %v1234_v31  ;;  %252 = vst.msk [vmem:[#allocation2 + $0x20] sm:$0xff] %vm247_vm1, %v243_v38  ;;  %v1464_v48 = vpack.i.bf16 %v726_v7, %v725_v1  ;;  %v830_v49 = vsel %vm364_vm0, %v828_v13, %v829_v14 }
  0x3e   : > { %253 = vst.msk [vmem:[#allocation2 + $0x28] sm:$0xff] %vm247_vm1, %v244_v39  ;;  %v833_v50 = vsel %vm364_vm0, %v831_v15, %v832_v24  ;;  %v943_v51 = vsel %vm941_vm2, %v1489_v35, 0  ;;  %v834_v52 = vrot.slane %v796_v26, 1  ;;  %v835_v54 = vrot.slane %v797_v29, 1 }
  0x3f   : > { %1430 = vrot.lane.b32.xlu0 %v1429_v60, %s1523_s29  ;;  %v837_v55 = vrot.slane %v798_v36, 1  ;;  %v838_v57 = vrot.slane %v799_v37, 1  ;;  %1267 = vmatpush3.bf16.msra.mxu0 %v943_v51  ;;  %v1459_v53 = vpack.i.bf16 %v722_v9, %v721_v8  ;;  %v818_v58 = vsel %vm364_vm0, %v816_v25, %v817_v40  ;;  %v1493_v9 = vld [vmem:[%s1820_s1] sm:$0xff]  }
  0x40   : > { %v821_v59 = vsel %vm364_vm0, %v819_v41, %v820_v42  ;;  %1289 = vmatpush3.bf16.msra.mxu1 %v943_v51  ;;  %v822_v60 = vrot.slane %v788_v43, 1  ;;  %v826_v63 = vrot.slane %v791_v46, 1  ;;  %1268 = vmatprep.subr.bf16.mxu0 %v1490_v47  ;;  %v1474_v1 = vpack.i.bf16 %v833_v50, %v830_v49 }
  0x41   : > { %1445 = vrot.lane.b32.xlu1 %v1444_v61, %s1523_s29  ;;  %v823_v61 = vrot.slane %v789_v44, 1  ;;  %1285 = vmatprep.subr.bf16.mxu1 %v1490_v47  ;;  %v836_v56 = vsel %vm364_vm0, %v834_v52, %v835_v54  ;;  %v839_v2 = vsel %vm364_vm0, %v837_v55, %v838_v57  ;;  %v1469_v3 = vpack.i.bf16 %v821_v59, %v818_v58 }
  0x42   : > { %v1484_v7 = vpack.i.bf16 %v839_v2, %v836_v56 }
  0x43   : > { %1440 = vrot.lane.b32.xlu0 %v1439_v62, %s1523_s29  ;;  %v825_v62 = vrot.slane %v790_v45, 1  ;;  %1269 = vmatpush3.bf16.msra.mxu0 %v1490_v47  ;;  %v824_v4 = vsel %vm364_vm0, %v822_v60, %v823_v61 }
  0x44   : > { %1290 = vmatpush3.bf16.msra.mxu1 %v1490_v47 }
  0x45   : > { %1455 = vrot.lane.b32.xlu1 %v1454_v0, %s1524_s8  ;;  %v1491_v0 = vld [vmem:[%s1820_s1 + $0x10] sm:$0xff]   ;;  %v827_v5 = vsel %vm364_vm0, %v825_v62, %v826_v63 }
  0x46   : > { %1270 = vmatprep.subr.bf16.mxu0 %v1491_v0  ;;  %1286 = vmatprep.subr.bf16.mxu1 %v1491_v0  ;;  %v1479_v8 = vpack.i.bf16 %v827_v5, %v824_v4 }
  0x47   : > { %1450 = vrot.lane.b32.xlu0 %v1658_v6, %s1524_s8  ;;  %v1492_v6 = vld [vmem:[%s1820_s1 + $0x8] sm:$0xff]   ;;  %1271 = vmatpush3.bf16.msra.mxu0 %v1491_v0 }
  0x48   : > { %1291 = vmatpush3.bf16.msra.mxu1 %v1491_v0  ;;  %1272 = vmatprep.subr.bf16.mxu0 %v1492_v6 }
  0x49   : > { %1465 = vrot.lane.b32.xlu1 %v1464_v48, %s1524_s8  ;;  %1287 = vmatprep.subr.bf16.mxu1 %v1492_v6 }
  0x4b   : > { %1460 = vrot.lane.b32.xlu0 %v1459_v53, %s1524_s8  ;;  %1273 = vmatpush3.bf16.msra.mxu0 %v1492_v6 }
  0x4c   : > { %1292 = vmatpush3.bf16.msra.mxu1 %v1492_v6  ;;  %1274 = vmatprep.subr.bf16.mxu0 %v1493_v9 }
  0x4d   : > { %1475 = vrot.lane.b32.xlu1 %v1474_v1, %s1525_s13  ;;  %1288 = vmatprep.subr.bf16.mxu1 %v1493_v9 }
  0x4f   : > { %1470 = vrot.lane.b32.xlu0 %v1469_v3, %s1525_s13  ;;  %1275 = vmatpush3.bf16.msra.mxu0 %v1493_v9 }
  0x50   : > { %1293 = vmatpush3.bf16.msra.mxu1 %v1493_v9 }
  0x51   : > { %1485 = vrot.lane.b32.xlu1 %v1484_v7, %s1525_s13 }
  0x53   : > { %1480 = vrot.lane.b32.xlu0 %v1479_v8, %s1525_s13 }
  0x87   : > { %v1341_v10 = vpop.permute.xlu1 %1340  ;;  %v1331_v11 = vpop.permute.xlu0 %1330 }
  0x88   : > { %v1343_v12 = vunpack.i.h.bf16 %v1341_v10  ;;  %v1342_v13 = vunpack.i.l.bf16 %v1341_v10  ;;  %v1333_v14 = vunpack.i.h.bf16 %v1331_v11  ;;  %v1332_v15 = vunpack.i.l.bf16 %v1331_v11 }
  0x8a   : > { %310 = vst.msk [vmem:[#allocation2 + $0x10] sm:$0xff] %vm307_vm3, %v1342_v13  ;;  %311 = vst.msk [vmem:[#allocation2 + $0x18] sm:$0xff] %vm307_vm3, %v1343_v12 }
  0x8b   : > { %308 = vst.msk [vmem:[#allocation2] sm:$0xff] %vm307_vm3, %v1332_v15  ;;  %309 = vst.msk [vmem:[#allocation2 + $0x8] sm:$0xff] %vm307_vm3, %v1333_v14  ;;  %v1346_v16 = vpop.permute.xlu1 %1345  ;;  %v1336_v17 = vpop.permute.xlu0 %1335 }
  0x8c   : > { %v1348_v18 = vunpack.i.h.bf16 %v1346_v16  ;;  %v1347_v19 = vunpack.i.l.bf16 %v1346_v16  ;;  %v1338_v20 = vunpack.i.h.bf16 %v1336_v17  ;;  %v1337_v21 = vunpack.i.l.bf16 %v1336_v17 }
  0x8e   : > { %314 = vst.msk [vmem:[#allocation2 + $0x30] sm:$0xff] %vm307_vm3, %v1347_v19  ;;  %315 = vst.msk [vmem:[#allocation2 + $0x38] sm:$0xff] %vm307_vm3, %v1348_v18 }
  0x8f   : > { %312 = vst.msk [vmem:[#allocation2 + $0x20] sm:$0xff] %vm307_vm3, %v1337_v21  ;;  %313 = vst.msk [vmem:[#allocation2 + $0x28] sm:$0xff] %vm307_vm3, %v1338_v20  ;;  %v1356_v22 = vpop.permute.xlu1 %1355  ;;  %v1351_v23 = vpop.permute.xlu0 %1350 }
  0x90   : > { %v1358_v24 = vunpack.i.h.bf16 %v1356_v22  ;;  %v1357_v25 = vunpack.i.l.bf16 %v1356_v22  ;;  %v1353_v26 = vunpack.i.h.bf16 %v1351_v23  ;;  %v1352_v27 = vunpack.i.l.bf16 %v1351_v23 }
  0x92   : > { %418 = vst.msk [vmem:[#allocation2 + $0x20] sm:$0xff] %vm413_vm4, %v1357_v25  ;;  %419 = vst.msk [vmem:[#allocation2 + $0x28] sm:$0xff] %vm413_vm4, %v1358_v24 }
  0x93   : > { %414 = vst.msk [vmem:[#allocation2] sm:$0xff] %vm413_vm4, %v1352_v27  ;;  %415 = vst.msk [vmem:[#allocation2 + $0x8] sm:$0xff] %vm413_vm4, %v1353_v26  ;;  %v1371_v28 = vpop.permute.xlu1 %1370 }
  0x94   : > { %v1373_v29 = vunpack.i.h.bf16 %v1371_v28  ;;  %v1372_v30 = vunpack.i.l.bf16 %v1371_v28 }
  0x95   : > { %v1361_v31 = vpop.permute.xlu0 %1360 }
  0x96   : > { %420 = vst.msk [vmem:[#allocation2 + $0x30] sm:$0xff] %vm413_vm4, %v1372_v30  ;;  %421 = vst.msk [vmem:[#allocation2 + $0x38] sm:$0xff] %vm413_vm4, %v1373_v29  ;;  %v1363_v32 = vunpack.i.h.bf16 %v1361_v31  ;;  %v1362_v33 = vunpack.i.l.bf16 %v1361_v31 }
  0x97   : > { %v1376_v34 = vpop.permute.xlu1 %1375 }
  0x98   : > { %416 = vst.msk [vmem:[#allocation2 + $0x10] sm:$0xff] %vm413_vm4, %v1362_v33  ;;  %417 = vst.msk [vmem:[#allocation2 + $0x18] sm:$0xff] %vm413_vm4, %v1363_v32  ;;  %v1378_v35 = vunpack.i.h.bf16 %v1376_v34  ;;  %v1377_v36 = vunpack.i.l.bf16 %v1376_v34 }
  0x99   : > { %v1366_v37 = vpop.permute.xlu0 %1365 }
  0x9a   : > { %478 = vst.msk [vmem:[#allocation2 + $0x20] sm:$0xff] %vm473_vm5, %v1377_v36  ;;  %479 = vst.msk [vmem:[#allocation2 + $0x28] sm:$0xff] %vm473_vm5, %v1378_v35  ;;  %v1368_v38 = vunpack.i.h.bf16 %v1366_v37  ;;  %v1367_v39 = vunpack.i.l.bf16 %v1366_v37 }
  0x9b   : > { %v1386_v40 = vpop.permute.xlu1 %1385 }
  0x9c   : > { %474 = vst.msk [vmem:[#allocation2] sm:$0xff] %vm473_vm5, %v1367_v39  ;;  %475 = vst.msk [vmem:[#allocation2 + $0x8] sm:$0xff] %vm473_vm5, %v1368_v38  ;;  %v1388_v41 = vunpack.i.h.bf16 %v1386_v40  ;;  %v1387_v42 = vunpack.i.l.bf16 %v1386_v40 }
  0x9d   : > { %v1381_v43 = vpop.permute.xlu0 %1380 }
  0x9e   : > { %480 = vst.msk [vmem:[#allocation2 + $0x30] sm:$0xff] %vm473_vm5, %v1387_v42  ;;  %481 = vst.msk [vmem:[#allocation2 + $0x38] sm:$0xff] %vm473_vm5, %v1388_v41  ;;  %v1383_v44 = vunpack.i.h.bf16 %v1381_v43  ;;  %v1382_v45 = vunpack.i.l.bf16 %v1381_v43 }
  0x9f   : > { %v1396_v46 = vpop.permute.xlu1 %1395 }
  0xa0   : > { %476 = vst.msk [vmem:[#allocation2 + $0x10] sm:$0xff] %vm473_vm5, %v1382_v45  ;;  %477 = vst.msk [vmem:[#allocation2 + $0x18] sm:$0xff] %vm473_vm5, %v1383_v44  ;;  %v1398_v47 = vunpack.i.h.bf16 %v1396_v46  ;;  %v1397_v48 = vunpack.i.l.bf16 %v1396_v46 }
  0xa1   : > { %v1391_v49 = vpop.permute.xlu0 %1390 }
  0xa2   : > { %538 = vst.msk [vmem:[#allocation2 + $0x20] sm:$0xff] %vm533_vm6, %v1397_v48  ;;  %539 = vst.msk [vmem:[#allocation2 + $0x28] sm:$0xff] %vm533_vm6, %v1398_v47  ;;  %v1393_v50 = vunpack.i.h.bf16 %v1391_v49  ;;  %v1392_v51 = vunpack.i.l.bf16 %v1391_v49 }
  0xa3   : > { %v1406_v52 = vpop.permute.xlu1 %1405 }
  0xa4   : > { %534 = vst.msk [vmem:[#allocation2] sm:$0xff] %vm533_vm6, %v1392_v51  ;;  %535 = vst.msk [vmem:[#allocation2 + $0x8] sm:$0xff] %vm533_vm6, %v1393_v50  ;;  %v1408_v54 = vunpack.i.h.bf16 %v1406_v52  ;;  %v1407_v55 = vunpack.i.l.bf16 %v1406_v52 }
  0xa5   : > { %v1401_v57 = vpop.permute.xlu0 %1400 }
  0xa6   : > { %540 = vst.msk [vmem:[#allocation2 + $0x30] sm:$0xff] %vm533_vm6, %v1407_v55  ;;  %541 = vst.msk [vmem:[#allocation2 + $0x38] sm:$0xff] %vm533_vm6, %v1408_v54  ;;  %v1403_v53 = vunpack.i.h.bf16 %v1401_v57  ;;  %v1402_v58 = vunpack.i.l.bf16 %v1401_v57  ;;  %v1243_v55 = vld [vmem:[%s1821_s2] ss:$0 sm:$0xff] }
  0xa7   : > { %v1416_v59 = vpop.permute.xlu1 %1415  ;;  %v1253_v57 = vld [vmem:[%s1822_s3] ss:$0 sm:$0xff] }
  0xa8   : > { %536 = vst.msk [vmem:[#allocation2 + $0x10] sm:$0xff] %vm533_vm6, %v1402_v58  ;;  %537 = vst.msk [vmem:[#allocation2 + $0x18] sm:$0xff] %vm533_vm6, %v1403_v53  ;;  %v1418_v60 = vunpack.i.h.bf16 %v1416_v59  ;;  %v1417_v61 = vunpack.i.l.bf16 %v1416_v59 }
  0xa9   : > { %v1411_v62 = vpop.permute.xlu0 %1410 }
  0xaa   : > { %643 = vst.msk [vmem:[#allocation2 + $0x20] sm:$0xff] %vm638_vm7, %v1417_v61  ;;  %644 = vst.msk [vmem:[#allocation2 + $0x28] sm:$0xff] %vm638_vm7, %v1418_v60  ;;  %v1413_v63 = vunpack.i.h.bf16 %v1411_v62  ;;  %v1412_v0 = vunpack.i.l.bf16 %v1411_v62 }
  0xab   : > { %v1426_v1 = vpop.permute.xlu1 %1425 }
  0xac   : > { %639 = vst.msk [vmem:[#allocation2] sm:$0xff] %vm638_vm7, %v1412_v0  ;;  %640 = vst.msk [vmem:[#allocation2 + $0x8] sm:$0xff] %vm638_vm7, %v1413_v63  ;;  %v1428_v56 = vunpack.i.h.bf16 %v1426_v1  ;;  %v1427_v2 = vunpack.i.l.bf16 %v1426_v1 }
  0xad   : > { %v1421_v3 = vpop.permute.xlu0 %1420 }
  0xae   : > { %645 = vst.msk [vmem:[#allocation2 + $0x30] sm:$0xff] %vm638_vm7, %v1427_v2  ;;  %646 = vst.msk [vmem:[#allocation2 + $0x38] sm:$0xff] %vm638_vm7, %v1428_v56  ;;  %v1423_v4 = vunpack.i.h.bf16 %v1421_v3  ;;  %v1422_v5 = vunpack.i.l.bf16 %v1421_v3 }
  0xaf   : > { %v1436_v6 = vpop.permute.xlu1 %1435 }
  0xb0   : > { %641 = vst.msk [vmem:[#allocation2 + $0x10] sm:$0xff] %vm638_vm7, %v1422_v5  ;;  %642 = vst.msk [vmem:[#allocation2 + $0x18] sm:$0xff] %vm638_vm7, %v1423_v4  ;;  %v1438_v7 = vunpack.i.h.bf16 %v1436_v6  ;;  %v1437_v8 = vunpack.i.l.bf16 %v1436_v6 }
  0xb1   : > { %v1431_v9 = vpop.permute.xlu0 %1430 }
  0xb2   : > { %704 = vst.msk [vmem:[#allocation2 + $0x20] sm:$0xff] %vm699_vm8, %v1437_v8  ;;  %705 = vst.msk [vmem:[#allocation2 + $0x28] sm:$0xff] %vm699_vm8, %v1438_v7  ;;  %v1433_v10 = vunpack.i.h.bf16 %v1431_v9  ;;  %v1432_v11 = vunpack.i.l.bf16 %v1431_v9 }
  0xb3   : > { %v1446_v12 = vpop.permute.xlu1 %1445 }
  0xb4   : > { %700 = vst.msk [vmem:[#allocation2] sm:$0xff] %vm699_vm8, %v1432_v11  ;;  %701 = vst.msk [vmem:[#allocation2 + $0x8] sm:$0xff] %vm699_vm8, %v1433_v10  ;;  %v1448_v13 = vunpack.i.h.bf16 %v1446_v12  ;;  %v1447_v14 = vunpack.i.l.bf16 %v1446_v12 }
  0xb5   : > { %v1441_v15 = vpop.permute.xlu0 %1440 }
  0xb6   : > { %706 = vst.msk [vmem:[#allocation2 + $0x30] sm:$0xff] %vm699_vm8, %v1447_v14  ;;  %707 = vst.msk [vmem:[#allocation2 + $0x38] sm:$0xff] %vm699_vm8, %v1448_v13  ;;  %v1443_v16 = vunpack.i.h.bf16 %v1441_v15  ;;  %v1442_v17 = vunpack.i.l.bf16 %v1441_v15 }
  0xb7   : > { %v1456_v18 = vpop.permute.xlu1 %1455 }
  0xb8   : > { %702 = vst.msk [vmem:[#allocation2 + $0x10] sm:$0xff] %vm699_vm8, %v1442_v17  ;;  %703 = vst.msk [vmem:[#allocation2 + $0x18] sm:$0xff] %vm699_vm8, %v1443_v16  ;;  %v1458_v19 = vunpack.i.h.bf16 %v1456_v18  ;;  %v1457_v20 = vunpack.i.l.bf16 %v1456_v18 }
  0xb9   : > { %v1451_v21 = vpop.permute.xlu0 %1450 }
  0xba   : > { %764 = vst.msk [vmem:[#allocation2 + $0x20] sm:$0xff] %vm759_vm9, %v1457_v20  ;;  %765 = vst.msk [vmem:[#allocation2 + $0x28] sm:$0xff] %vm759_vm9, %v1458_v19  ;;  %v1453_v22 = vunpack.i.h.bf16 %v1451_v21  ;;  %v1452_v23 = vunpack.i.l.bf16 %v1451_v21 }
  0xbb   : > { %v1466_v24 = vpop.permute.xlu1 %1465 }
  0xbc   : > { %760 = vst.msk [vmem:[#allocation2] sm:$0xff] %vm759_vm9, %v1452_v23  ;;  %761 = vst.msk [vmem:[#allocation2 + $0x8] sm:$0xff] %vm759_vm9, %v1453_v22  ;;  %v1468_v25 = vunpack.i.h.bf16 %v1466_v24  ;;  %v1467_v26 = vunpack.i.l.bf16 %v1466_v24 }
  0xbd   : > { %v1461_v27 = vpop.permute.xlu0 %1460 }
  0xbe   : > { %766 = vst.msk [vmem:[#allocation2 + $0x30] sm:$0xff] %vm759_vm9, %v1467_v26  ;;  %767 = vst.msk [vmem:[#allocation2 + $0x38] sm:$0xff] %vm759_vm9, %v1468_v25  ;;  %v1463_v28 = vunpack.i.h.bf16 %v1461_v27  ;;  %v1462_v29 = vunpack.i.l.bf16 %v1461_v27 }
  0xbf   : > { %v1476_v30 = vpop.permute.xlu1 %1475 }
  0xc0   : > { %762 = vst.msk [vmem:[#allocation2 + $0x10] sm:$0xff] %vm759_vm9, %v1462_v29  ;;  %763 = vst.msk [vmem:[#allocation2 + $0x18] sm:$0xff] %vm759_vm9, %v1463_v28  ;;  %v1478_v31 = vunpack.i.h.bf16 %v1476_v30  ;;  %v1477_v32 = vunpack.i.l.bf16 %v1476_v30 }
  0xc1   : > { %v1471_v33 = vpop.permute.xlu0 %1470 }
  0xc2   : > { %869 = vst.msk [vmem:[#allocation2 + $0x20] sm:$0xff] %vm864_vm10, %v1477_v32  ;;  %870 = vst.msk [vmem:[#allocation2 + $0x28] sm:$0xff] %vm864_vm10, %v1478_v31  ;;  %v1473_v34 = vunpack.i.h.bf16 %v1471_v33  ;;  %v1472_v35 = vunpack.i.l.bf16 %v1471_v33 }
  0xc3   : > { %v1486_v36 = vpop.permute.xlu1 %1485 }
  0xc4   : > { %865 = vst.msk [vmem:[#allocation2] sm:$0xff] %vm864_vm10, %v1472_v35  ;;  %866 = vst.msk [vmem:[#allocation2 + $0x8] sm:$0xff] %vm864_vm10, %v1473_v34  ;;  %v1488_v37 = vunpack.i.h.bf16 %v1486_v36  ;;  %v1487_v38 = vunpack.i.l.bf16 %v1486_v36 }
  0xc5   : > { %v1481_v39 = vpop.permute.xlu0 %1480 }
  0xc6   : > { %871 = vst.msk [vmem:[#allocation2 + $0x30] sm:$0xff] %vm864_vm10, %v1487_v38  ;;  %872 = vst.msk [vmem:[#allocation2 + $0x38] sm:$0xff] %vm864_vm10, %v1488_v37  ;;  %v1483_v40 = vunpack.i.h.bf16 %v1481_v39  ;;  %v1482_v41 = vunpack.i.l.bf16 %v1481_v39 }
  0xc8   : > { %867 = vst.msk [vmem:[#allocation2 + $0x10] sm:$0xff] %vm864_vm10, %v1482_v41  ;;  %868 = vst.msk [vmem:[#allocation2 + $0x18] sm:$0xff] %vm864_vm10, %v1483_v40 }
  0xc9   : > { %v877_v42 = vld [vmem:[#allocation2 + $0x20] sm:$0xff]  ;;  %v878_v43 = vld [vmem:[#allocation2 + $0x28] sm:$0xff] }
  0xca   : > { %v883_v44 = vpack.c.bf16 %v878_v43, %v877_v42 }
  0xcb   : > { %v873_v45 = vld [vmem:[#allocation2] sm:$0xff]  ;;  %v874_v46 = vld [vmem:[#allocation2 + $0x8] sm:$0xff] }
  0xcc   : > { %v881_v47 = vpack.c.bf16 %v874_v46, %v873_v45  ;;  %1280 = vmatprep.mubr.msk.bf16.mxu1 %vm928_vm11, %v883_v44 }
  0xcd   : > { %v879_v48 = vld [vmem:[#allocation2 + $0x30] sm:$0xff]  ;;  %v880_v49 = vld [vmem:[#allocation2 + $0x38] sm:$0xff] }
  0xce   : > { %1276 = vmatprep.mubr.msk.bf16.mxu0 %vm928_vm11, %v881_v47  ;;  %v884_v50 = vpack.c.bf16 %v880_v49, %v879_v48 }
  0xcf   : > { %v875_v51 = vld [vmem:[#allocation2 + $0x10] sm:$0xff]  ;;  %v876_v52 = vld [vmem:[#allocation2 + $0x18] sm:$0xff] }
  0xd0   : > { %v882_v54 = vpack.c.bf16 %v876_v52, %v875_v51  ;;  %1281 = vmatmul.mubr.msk.bf16.vlgmr.msra.gmra.mxu1 %vm928_vm11, %v884_v50 }
  0xd2   : > { %1277 = vmatmul.mubr.msk.bf16.vlgmr.msra.gmra.mxu0 %vm928_vm11, %v882_v54 }
 0x190   : > { %v1282_v53 = vpop.f32.mrf.mxu1 }
 0x191   : > { %v1004_v58 = vadd.f32 %v1282_v53, %v1243_v55 }
 0x192   : > { %v1278_v59 = vpop.f32.mrf.mxu0  ;;  %v995_v60 = vpop.f32.mrf.mxu1 }
 0x193   : > { %v988_v61 = vadd.f32 %v1278_v59, %v1243_v55  ;;  %vm1017_vm12 = vcmp.gt.f32.partialorder %v1004_v58, 0.0  ;;  %v1031_v62 = vmul.f32 %v1253_v57, %v1004_v58  ;;  %v996_v63 = vadd.f32 %v1243_v55, %v995_v60 }
 0x194   : > { %v979_v0 = vpop.f32.mrf.mxu0  ;;  %v1283_v1 = vpop.f32.mrf.mxu1 }
 0x195   : > { %vm1013_vm14 = vcmp.gt.f32.partialorder %v988_v61, 0.0  ;;  %v1027_v56 = vmul.f32 %v1253_v57, %v988_v61  ;;  %v1039_v2 = vsel %vm1017_vm12, %v1004_v58, %v1031_v62  ;;  %v980_v3 = vadd.f32 %v1243_v55, %v979_v0 }
 0x196   : > { %v1047_v4 = vpack.c.bf16 %v1039_v2, %v1039_v2  ;;  %vm1015_vm15 = vcmp.gt.f32.partialorder %v996_v63, 0.0  ;;  %v1029_v5 = vmul.f32 %v1253_v57, %v996_v63  ;;  %v1279_v6 = vpop.f32.mrf.mxu0  ;;  %v1007_v7 = vadd.f32 %v1283_v1, %v1243_v55  ;;  %v998_v11 = vpop.f32.mrf.mxu1 }
 0x197   : > { %v1035_v8 = vsel %vm1013_vm14, %v988_v61, %v1027_v56  ;;  %vm1011_vm0 = vcmp.gt.f32.partialorder %v980_v3, 0.0  ;;  %v1025_v9 = vmul.f32 %v1253_v57, %v980_v3  ;;  %v991_v10 = vadd.f32 %v1279_v6, %v1243_v55 }
 0x198   : > { %v1043_v12 = vpack.c.bf16 %v1035_v8, %v1035_v8  ;;  %1056 = vst.msk [vmem:[%s1792_s27 + $0x18] sm:$0xf] %vm1049_vm13, %v1047_v4  ;;  %v1037_v13 = vsel %vm1015_vm15, %v996_v63, %v1029_v5  ;;  %vm1018_vm1 = vcmp.gt.f32.partialorder %v1007_v7, 0.0  ;;  %v1032_v14 = vmul.f32 %v1253_v57, %v1007_v7  ;;  %v982_v15 = vpop.f32.mrf.mxu0 }
 0x199   : > { %v1033_v16 = vsel %vm1011_vm0, %v980_v3, %v1025_v9  ;;  %v1045_v17 = vpack.c.bf16 %v1037_v13, %v1037_v13  ;;  %vm1014_vm2 = vcmp.gt.f32.partialorder %v991_v10, 0.0  ;;  %v1028_v18 = vmul.f32 %v1253_v57, %v991_v10 }
 0x19a   : > { %1052 = vst.msk [vmem:[%s1792_s27 + $0x8] sm:$0xf] %vm1049_vm13, %v1043_v12  ;;  %v1041_v19 = vpack.c.bf16 %v1033_v16, %v1033_v16  ;;  %v1040_v20 = vsel %vm1018_vm1, %v1007_v7, %v1032_v14  ;;  %v983_v21 = vadd.f32 %v1243_v55, %v982_v15  ;;  %v999_v22 = vadd.f32 %v1243_v55, %v998_v11 }
 0x19b   : > { %1054 = vst.msk [vmem:[%s1792_s27 + $0x10] sm:$0xf] %vm1049_vm13, %v1045_v17  ;;  %v1036_v23 = vsel %vm1014_vm2, %v991_v10, %v1028_v18  ;;  %v1048_v24 = vpack.c.bf16 %v1040_v20, %v1040_v20 }
 0x19c   : > { %1050 = vst.msk [vmem:[%s1792_s27] sm:$0xf] %vm1049_vm13, %v1041_v19  ;;  %v1044_v25 = vpack.c.bf16 %v1036_v23, %v1036_v23  ;;  %vm1012_vm3 = vcmp.gt.f32.partialorder %v983_v21, 0.0  ;;  %v1026_v26 = vmul.f32 %v1253_v57, %v983_v21  ;;  %vm1016_vm4 = vcmp.gt.f32.partialorder %v999_v22, 0.0 }
 0x19d   : > { %1057 = vst.msk [vmem:[%s1792_s27 + $0x1c] sm:$0xf] %vm1049_vm13, %v1048_v24  ;;  %v1030_v27 = vmul.f32 %v1253_v57, %v999_v22 }
 0x19e   : > { %1053 = vst.msk [vmem:[%s1792_s27 + $0xc] sm:$0xf] %vm1049_vm13, %v1044_v25  ;;  %v1034_v28 = vsel %vm1012_vm3, %v983_v21, %v1026_v26 }
 0x19f   : > { %v1042_v29 = vpack.c.bf16 %v1034_v28, %v1034_v28  ;;  %v1038_v30 = vsel %vm1016_vm4, %v999_v22, %v1030_v27 }
 0x1a0   : > { %v1046_v31 = vpack.c.bf16 %v1038_v30, %v1038_v30 }
 0x1a1   : > { %1051 = vst.msk [vmem:[%s1792_s27 + $0x4] sm:$0xf] %vm1049_vm13, %v1042_v29 }
 0x1a2   : > { %1055 = vst.msk [vmem:[%s1792_s27 + $0x14] sm:$0xf] %vm1049_vm13, %v1046_v31 }
 0x1a3 PF: > { %s14_s17 = sadd.s32 1, %s1516_s17   ;;  %s1824_s15 = smov %s1512_s16 }
 0x1a4   : > { %p11_p6 = scmp.ge.s32.totalorder %s14_s17, 4   ;;  %s1825_s16 = smov %s1827_s18 }
 0x1a6   :  { %13 = sbr.rel (!%p11_p6) target bundleno = 2 (0x2), region = 72 }

// kernel: _lambda_.10
= control target key start
LH: loop header
LB: loop body
LE: loop exit
PB: predicated region body
PF: predicated region fallthrough
CT: control target
= control target key end

     0   :  { %s1319_s21 = smov 0   ;;  %s1321_s22 = smov 0   ;;  %s1787_s0 = inlined_call_operand.vmem [shape: bf16[2,10,10,16], index: 0, kind: input, shape index: {}]   ;;  %s1788_s1 = inlined_call_operand.vmem [shape: bf16[2,10,10,16], index: 1, kind: input, shape index: {}]   ;;  %s1789_s2 = inlined_call_operand.vmem [shape: bf16[144,16], index: 2, kind: input, shape index: {}]   ;;  %s1790_s3 = inlined_call_operand.vmem [shape: f32[1,16], index: 3, kind: input, shape index: {}]   ;;  %s1791_s4 = inlined_call_operand.vmem [shape: bf16[2,8,8,16], index: 4, kind: input, shape index: {}]   ;;  %s1792_s5 = inlined_call_operand.vmem [shape: f32[1,16], index: 5, kind: input, shape index: {}]   ;;  %s1793_s6 = inlined_call_operand.vmem [shape: bf16[2,8,8,16], index: 6, kind: output, shape index: {}]  }
   0x1   :  { %s1323_s23 = smov 0  }
   0x2 LB: > { %s28_s24 = sadd.s32 1, %s1270_s22  ;;  %p1147_p0 = scmp.ge.s32.totalorder %s1274_s23, 1  ;;  %s1274_s23 = sphi %s1323_s23, %s16_s23   ;;  %s1270_s22 = sphi %s1321_s22, %s1795_s22   ;;  %s1266_s21 = sphi %s1319_s21, %s1794_s21  }
   0x3   : > { %p30_p1 = scmp.ge.s32.totalorder %s28_s24, 2  ;;  %p253_p2 = scmp.lt.s32.totalorder %s1274_s23, 3 }
   0x5   : > { %s1797_s24 = smov (%p30_p1, %s28_s24), 0  ;;  %p254_p3 = pnand %p1147_p0, %p253_p2 }
   0x6   : > { %p301_p4 = scmp.lt.s32.totalorder (!%p254_p3), %s1266_s21, 1  ;;  %s1276_s8 = smov (!%p254_p3), 16  }
   0x7   : > { %257 = sbr.rel (%p254_p3) target bundleno = 468 (0x1d4), region = 44  ;;  %s1277_s9 = smov (!%p254_p3), 32  }
   0x8   : > { %s1278_s10 = smov (!%p254_p3), 48   ;;  %s1280_s15 = smov (!%p254_p3), 64  }
   0x9   : > { %s1281_s20 = smov (!%p254_p3), 80   ;;  %s1282_s29 = smov (!%p254_p3), 96  }
   0xa   : > { %s1283_s13 = smov (!%p254_p3), 112  }
   0xc   : > { %s1799_s21 = smov (!%p301_p4, %s1266_s21), 1  ;;  %vm463_vm0 = vcmask 1046528   ;;  %vm438_vm1 = vcmask 130048   ;;  %vm521_vm2 = vcmask 1045504   ;;  %vm512_vm3 = vcmask 261248  }
   0xd   : > { %s1210_s25 = smul.u32 80, %s1799_s21  ;;  %vm570_vm4 = vcmask 392448   ;;  %vm604_vm5 = vcmask 523648   ;;  %vm641_vm6 = vcmask 654848   ;;  %vm677_vm7 = vcmask 786048  }
   0xe   : > { %vm711_vm8 = vcmask 917248   ;;  %vm748_vm9 = vcmask 1048448   ;;  %vm1019_vm11 = vcmask 125952  }
   0xf   : > { %s1343_s28 = scalar_lea.vmem %s1787_s0, %s1210_s25  ;;  %s1348_s7 = scalar_lea.vmem %s1788_s1, %s1210_s25 }
  0x10   : > { %v344_v0 = vld [vmem:[%s1343_s28 + $0x20] ss:$8 sps:$4 sm:$0xff]   ;;  %v345_v1 = vld [vmem:[%s1343_s28 + $0x24] sm:$0x1]  ;;  %v347_v15 = vld [vmem:[%s1343_s28 + $0x2c] sm:$0x1] }
  0x11   : > { %v386_v2 = vld [vmem:[%s1348_s7 + $0x20] ss:$8 sps:$4 sm:$0xff]   ;;  %v364_v3 = vunpack.c.l.bf16 %v344_v0  ;;  %v365_v4 = vunpack.c.l.bf16 %v345_v1  ;;  %v387_v5 = vld [vmem:[%s1348_s7 + $0x24] sm:$0x1]  ;;  %v366_v9 = vunpack.c.h.bf16 %v344_v0  ;;  %v367_v20 = vunpack.c.l.bf16 %v347_v15  ;;  %v389_v21 = vld [vmem:[%s1348_s7 + $0x2c] sm:$0x1] }
  0x12   : > { %v406_v6 = vunpack.c.l.bf16 %v386_v2  ;;  %v336_v7 = vld [vmem:[%s1343_s28] ss:$8 sps:$4 sm:$0xff]   ;;  %v337_v8 = vld [vmem:[%s1343_s28 + $0x4] sm:$0x1]  ;;  %v407_v10 = vunpack.c.l.bf16 %v387_v5  ;;  %v408_v16 = vunpack.c.h.bf16 %v386_v2  ;;  %v339_v22 = vld [vmem:[%s1343_s28 + $0xc] sm:$0x1]  ;;  %v409_v24 = vunpack.c.l.bf16 %v389_v21 }
  0x13   : > { %v356_v11 = vunpack.c.l.bf16 %v336_v7  ;;  %v357_v12 = vunpack.c.l.bf16 %v337_v8  ;;  %v378_v13 = vld [vmem:[%s1348_s7] ss:$8 sps:$4 sm:$0xff]   ;;  %v379_v14 = vld [vmem:[%s1348_s7 + $0x4] sm:$0x1]  ;;  %v358_v26 = vunpack.c.h.bf16 %v336_v7  ;;  %v381_v27 = vld [vmem:[%s1348_s7 + $0xc] sm:$0x1]  ;;  %v359_v31 = vunpack.c.l.bf16 %v339_v22 }
  0x14   : > { %v1359_v17 = vadd.f32 %v406_v6, %v364_v3  ;;  %v398_v18 = vunpack.c.l.bf16 %v378_v13  ;;  %v399_v19 = vunpack.c.l.bf16 %v379_v14  ;;  %v427_v23 = vadd.f32 %v407_v10, %v365_v4  ;;  %v340_v44 = vld [vmem:[%s1343_s28 + $0x10] ss:$8 sps:$4 sm:$0xff]   ;;  %v341_v56 = vld [vmem:[%s1343_s28 + $0x14] sm:$0x1]  ;;  %v385_v21 = vld [vmem:[%s1348_s7 + $0x1c] sm:$0x1] }
  0x15   : > { %v1363_v25 = vadd.f32 %v408_v16, %v366_v9  ;;  %v429_v33 = vadd.f32 %v409_v24, %v367_v20  ;;  %v400_v35 = vunpack.c.h.bf16 %v378_v13  ;;  %v401_v38 = vunpack.c.l.bf16 %v381_v27  ;;  %v382_v45 = vld [vmem:[%s1348_s7 + $0x10] ss:$8 sps:$4 sm:$0xff]   ;;  %v383_v57 = vld [vmem:[%s1348_s7 + $0x14] sm:$0x1]  ;;  %v343_v16 = vld [vmem:[%s1343_s28 + $0x1c] sm:$0x1] }
  0x16   : > { %v476_v28 = vrot.slane %v1359_v17, 1  ;;  %v418_v29 = vadd.f32 %v398_v18, %v356_v11  ;;  %v419_v30 = vadd.f32 %v399_v19, %v357_v12  ;;  %443 = vst.msk [vmem:[#allocation2 + $0x40] sm:$0xff] %vm438_vm1, %v1359_v17  ;;  %v477_v32 = vrot.slane %v427_v23, 1  ;;  %v348_v50 = vld [vmem:[%s1343_s28 + $0x30] ss:$8 sps:$4 sm:$0xff]  }
  0x17   : > { %v479_v34 = vrot.slane %v1363_v25, 1  ;;  %444 = vst.msk [vmem:[#allocation2 + $0x50] sm:$0xff] %vm438_vm1, %v1363_v25  ;;  %v480_v41 = vrot.slane %v429_v33, 1  ;;  %v1376_v42 = vadd.f32 %v400_v35, %v358_v26  ;;  %v421_v47 = vadd.f32 %v401_v38, %v359_v31  ;;  %v390_v51 = vld [vmem:[%s1348_s7 + $0x30] ss:$8 sps:$4 sm:$0xff]  }
  0x18   : > { %v464_v36 = vrot.slane %v418_v29, 1  ;;  %v465_v37 = vrot.slane %v419_v30, 1  ;;  %v522_v39 = vrot.slane %v418_v29, 2  ;;  %439 = vst.msk [vmem:[#allocation2] sm:$0xff] %vm438_vm1, %v418_v29  ;;  %v1374_v40 = vsel %vm463_vm0, %v476_v28, %v477_v32  ;;  %v349_v62 = vld [vmem:[%s1343_s28 + $0x34] sm:$0x1] }
  0x19   : > { %v523_v43 = vrot.slane %v419_v30, 2  ;;  %496 = vrot.lane.b32.xlu1 %v1374_v40, %s1276_s8  ;;  %v537_v48 = vrot.slane %v1363_v25, 2  ;;  %v538_v49 = vrot.slane %v429_v33, 2  ;;  %v1388_v52 = vsel %vm463_vm0, %v479_v34, %v480_v41  ;;  %440 = vst.msk [vmem:[#allocation2 + $0x10] sm:$0xff] %vm438_vm1, %v1376_v42  ;;  %v391_v3 = vld [vmem:[%s1348_s7 + $0x34] sm:$0x1] }
  0x1a   : > { %v466_v46 = vsel %vm463_vm0, %v464_v36, %v465_v37  ;;  %v467_v53 = vrot.slane %v1376_v42, 1  ;;  %v525_v54 = vrot.slane %v1376_v42, 2  ;;  %v468_v58 = vrot.slane %v421_v47, 1  ;;  %v351_v26 = vld [vmem:[%s1343_s28 + $0x3c] sm:$0x1] }
  0x1b   : > { %488 = vrot.lane.b32.xlu0 %v466_v46, %s1276_s8  ;;  %v524_v55 = vsel %vm521_vm2, %v522_v39, %v523_v43  ;;  %v526_v59 = vrot.slane %v421_v47, 2  ;;  %v1398_v60 = vsel %vm521_vm2, %v537_v48, %v538_v49  ;;  %v534_v61 = vrot.slane %v1359_v17, 2  ;;  %v393_v30 = vld [vmem:[%s1348_s7 + $0x3c] sm:$0x1]  ;;  %v352_v33 = vld [vmem:[%s1343_s28 + $0x40] ss:$8 sps:$4 sm:$0xff]  }
  0x1c   : > { %771 = vst.msk [vmem:[#allocation2 + $0x38] sm:$0xff] %vm438_vm1, %v1398_v60  ;;  %v535_v63 = vrot.slane %v427_v23, 2  ;;  %v360_v0 = vunpack.c.l.bf16 %v340_v44  ;;  %v402_v1 = vunpack.c.l.bf16 %v382_v45  ;;  %v368_v2 = vunpack.c.l.bf16 %v348_v50  ;;  %v394_v37 = vld [vmem:[%s1348_s7 + $0x40] ss:$8 sps:$4 sm:$0xff]   ;;  %v353_v43 = vld [vmem:[%s1343_s28 + $0x44] sm:$0x1] }
  0x1d   : > { %498 = vrot.lane.b32.xlu1 %v1388_v52, %s1276_s8  ;;  %v1408_v4 = vsel %vm463_vm0, %v467_v53, %v468_v58  ;;  %v1411_v5 = vsel %vm521_vm2, %v525_v54, %v526_v59  ;;  %v410_v6 = vunpack.c.l.bf16 %v390_v51  ;;  %v361_v7 = vunpack.c.l.bf16 %v341_v56 }
  0x1e   : > { %v1416_v8 = vsel %vm521_vm2, %v534_v61, %v535_v63  ;;  %v1418_v9 = vadd.f32 %v402_v1, %v360_v0  ;;  %v403_v10 = vunpack.c.l.bf16 %v383_v57  ;;  %v369_v11 = vunpack.c.l.bf16 %v349_v62  ;;  %v397_v57 = vld [vmem:[%s1348_s7 + $0x4c] sm:$0x1] }
  0x1f   : > { %490 = vrot.lane.b32.xlu0 %v1408_v4, %s1276_s8  ;;  %770 = vst.msk [vmem:[#allocation2 + $0x28] sm:$0xff] %vm438_vm1, %v1416_v8  ;;  %v1422_v12 = vadd.f32 %v410_v6, %v368_v2  ;;  %v411_v13 = vunpack.c.l.bf16 %v391_v3  ;;  %v362_v14 = vunpack.c.h.bf16 %v340_v44  ;;  %v404_v15 = vunpack.c.h.bf16 %v382_v45  ;;  %v395_v44 = vld [vmem:[%s1348_s7 + $0x44] sm:$0x1] }
  0x20   : > { %441 = vst.msk [vmem:[#allocation2 + $0x20] sm:$0xff] %vm438_vm1, %v1418_v9  ;;  %v1427_v18 = vadd.f32 %v403_v10, %v361_v7  ;;  %v528_v19 = vrot.slane %v1418_v9, 2  ;;  %v370_v20 = vunpack.c.h.bf16 %v348_v50  ;;  %v412_v28 = vunpack.c.h.bf16 %v390_v51  ;;  %v355_v51 = vld [vmem:[%s1343_s28 + $0x4c] sm:$0x1]  ;;  %v1243_v10 = vld [vmem:[%s1789_s2 + $0x38] sm:$0xff]  }
  0x21   : > { %548 = vrot.lane.b32.xlu1 %v1411_v5, %s1277_s9  ;;  %445 = vst.msk [vmem:[#allocation2 + $0x60] sm:$0xff] %vm438_vm1, %v1422_v12  ;;  %v1435_v22 = vadd.f32 %v411_v13, %v369_v11  ;;  %v540_v23 = vrot.slane %v1422_v12, 2  ;;  %v1438_v24 = vadd.f32 %v404_v15, %v362_v14  ;;  %v363_v29 = vunpack.c.l.bf16 %v343_v16 }
  0x22   : > { %v529_v27 = vrot.slane %v1427_v18, 2  ;;  %v405_v32 = vunpack.c.l.bf16 %v385_v21  ;;  %v1451_v35 = vadd.f32 %v412_v28, %v370_v20  ;;  %v371_v36 = vunpack.c.l.bf16 %v351_v26  ;;  %v1244_v26 = vld [vmem:[%s1789_s2 + $0x30] sm:$0xff]  }
  0x23   : > { %546 = vrot.lane.b32.xlu0 %v524_v55, %s1277_s9  ;;  %v541_v31 = vrot.slane %v1435_v22, 2  ;;  %442 = vst.msk [vmem:[#allocation2 + $0x30] sm:$0xff] %vm438_vm1, %v1438_v24  ;;  %v413_v41 = vunpack.c.l.bf16 %v393_v30  ;;  %v531_v45 = vrot.slane %v1438_v24, 2  ;;  %v372_v46 = vunpack.c.l.bf16 %v352_v33  ;;  %v1247_v30 = vld [vmem:[%s1789_s2 + $0x18] sm:$0xff]  }
  0x24   : > { %v1449_v34 = vsel %vm521_vm2, %v528_v19, %v529_v27  ;;  %v1461_v39 = vadd.f32 %v405_v32, %v363_v29  ;;  %446 = vst.msk [vmem:[#allocation2 + $0x70] sm:$0xff] %vm438_vm1, %v1451_v35  ;;  %v543_v49 = vrot.slane %v1451_v35, 2  ;;  %v414_v50 = vunpack.c.l.bf16 %v394_v37  ;;  %v1245_v29 = vld [vmem:[%s1789_s2 + $0x28] sm:$0xff]  }
  0x25   : > { %556 = vrot.lane.b32.xlu1 %v1398_v60, %s1277_s9  ;;  %768 = vst.msk [vmem:[#allocation2 + $0x8] sm:$0xff] %vm438_vm1, %v1449_v34  ;;  %v1459_v38 = vsel %vm521_vm2, %v540_v23, %v541_v31  ;;  %v1472_v47 = vadd.f32 %v413_v41, %v371_v36  ;;  %v373_v53 = vunpack.c.l.bf16 %v353_v43  ;;  %v415_v54 = vunpack.c.l.bf16 %v395_v44  ;;  %v1249_v36 = vld [vmem:[%s1789_s2 + $0x8] sm:$0xff]  }
  0x26   : > { %772 = vst.msk [vmem:[#allocation2 + $0x48] sm:$0xff] %vm438_vm1, %v1459_v38  ;;  %v532_v48 = vrot.slane %v1461_v39, 2  ;;  %v374_v55 = vunpack.c.h.bf16 %v352_v33  ;;  %v416_v56 = vunpack.c.h.bf16 %v394_v37  ;;  %v470_v58 = vrot.slane %v1418_v9, 1 }
  0x27   : > { %554 = vrot.lane.b32.xlu0 %v1416_v8, %s1277_s9  ;;  %v544_v61 = vrot.slane %v1472_v47, 2  ;;  %v471_v62 = vrot.slane %v1427_v18, 1  ;;  %v1490_v63 = vadd.f32 %v414_v50, %v372_v46  ;;  %v1492_v0 = vadd.f32 %v415_v54, %v373_v53 }
  0x28   : > { %v1482_v59 = vsel %vm521_vm2, %v531_v45, %v532_v48  ;;  %v375_v1 = vunpack.c.l.bf16 %v355_v51  ;;  %v1497_v3 = vadd.f32 %v416_v56, %v374_v55  ;;  %v417_v6 = vunpack.c.l.bf16 %v397_v57  ;;  %v1250_v45 = vld [vmem:[%s1789_s2] sm:$0xff]  }
  0x29   : > { %582 = vrot.lane.b32.xlu1 %v1418_v9, %s1278_s10  ;;  %769 = vst.msk [vmem:[#allocation2 + $0x18] sm:$0xff] %vm438_vm1, %v1482_v59  ;;  %v1495_v2 = vsel %vm521_vm2, %v543_v49, %v544_v61  ;;  %v651_v7 = vrot.slane %v1492_v0, 2  ;;  %v482_v11 = vrot.slane %v1422_v12, 1  ;;  %v1514_v16 = vsel %vm463_vm0, %v470_v58, %v471_v62 }
  0x2a   : > { %773 = vst.msk [vmem:[#allocation2 + $0x58] sm:$0xff] %vm438_vm1, %v1495_v2  ;;  %v757_v13 = vrot.slane %v1497_v3, 2  ;;  %v437_v14 = vadd.f32 %v417_v6, %v375_v1  ;;  %v721_v15 = vrot.slane %v1497_v3, 1  ;;  %v483_v18 = vrot.slane %v1435_v22, 1 }
  0x2b   : > { %580 = vrot.lane.b32.xlu0 %v1376_v42, %s1278_s10  ;;  %v650_v42 = vrot.slane %v1490_v63, 2  ;;  %v1279_v23 = vmov 0   ;;  %v473_v31 = vrot.slane %v1438_v24, 1  ;;  %v486_v41 = vrot.slane %v1472_v47, 1  ;;  %v1251_v47 = vld [vmem:[%s1789_s2 + $0x40] sm:$0xff]  }
  0x2c   : > { %v722_v20 = vrot.slane %v437_v14, 1  ;;  %v758_v21 = vrot.slane %v437_v14, 2  ;;  %891 = vmatprep.subr.bf16.mxu0 %v1279_v23  ;;  %1192 = vmatprep.subr.bf16.mxu1 %v1279_v23  ;;  %v1537_v28 = vsel %vm463_vm0, %v482_v11, %v483_v18  ;;  %v777_v32 = vld [vmem:[#allocation2 + $0x8] sm:$0xff]  ;;  %v615_v48 = vrot.slane %v1492_v0, 1 }
  0x2d   : > { %590 = vrot.lane.b32.xlu1 %v1422_v12, %s1278_s10  ;;  %v1518_v19 = vsel %vm521_vm2, %v650_v42, %v651_v7  ;;  %892 = vmatpush1.bf16.msra.mxu0 %v1243_v10  ;;  %v785_v43 = vld [vmem:[#allocation2 + $0x48] sm:$0xff] }
  0x2e   : > { %774 = vst.msk [vmem:[#allocation2 + $0x68] sm:$0xff] %vm438_vm1, %v1518_v19  ;;  %1201 = vmatpush1.bf16.msra.mxu1 %v1243_v10  ;;  %v1530_v22 = vsel %vm463_vm0, %v721_v15, %v722_v20  ;;  %v759_v27 = vsel %vm521_vm2, %v757_v13, %v758_v21  ;;  %893 = vmatprep.subr.bf16.mxu0 %v1279_v23  ;;  %v781_v11 = vld [vmem:[#allocation2 + $0x28] sm:$0xff]  ;;  %v783_v13 = vld [vmem:[#allocation2 + $0x38] sm:$0xff] }
  0x2f   : > { %588 = vrot.lane.b32.xlu0 %v1363_v25, %s1278_s10  ;;  %775 = vst.msk [vmem:[#allocation2 + $0x78] sm:$0xff] %vm438_vm1, %v759_v27  ;;  %1193 = vmatprep.subr.bf16.mxu1 %v1279_v23 }
  0x30   : > { %v779_v33 = vld [vmem:[#allocation2 + $0x18] sm:$0xff] }
  0x31   : > { %619 = vrot.lane.b32.xlu1 %v1514_v16, %s1280_s15  ;;  %894 = vmatpush1.bf16.msra.mxu0 %v1244_v26  ;;  %v793_v37 = vpack.c.bf16 %v779_v33, %v777_v32  ;;  %v787_v44 = vld [vmem:[#allocation2 + $0x58] sm:$0xff] }
  0x32   : > { %1202 = vmatpush1.bf16.msra.mxu1 %v1244_v26  ;;  %895 = vmatprep.subr.bf16.mxu0 %v1279_v23  ;;  %v797_v46 = vpack.c.bf16 %v787_v44, %v785_v43 }
  0x33   : > { %617 = vrot.lane.b32.xlu0 %v1408_v4, %s1280_s15  ;;  %1194 = vmatprep.subr.bf16.mxu1 %v1279_v23  ;;  %v1246_v4 = vld [vmem:[%s1789_s2 + $0x20] sm:$0xff]  }
  0x34   : > { %1164 = vmatprep.mubr.msk.bf16.mxu0 %vm438_vm1, %v793_v37  ;;  %1166 = vmatprep.mubr.msk.bf16.mxu1 %vm438_vm1, %v797_v46 }
  0x35   : > { %627 = vrot.lane.b32.xlu1 %v1537_v28, %s1280_s15  ;;  %896 = vmatpush1.bf16.msra.mxu0 %v1245_v29  ;;  %v789_v21 = vld [vmem:[#allocation2 + $0x68] sm:$0xff] }
  0x36   : > { %1203 = vmatpush1.bf16.msra.mxu1 %v1245_v29  ;;  %897 = vmatprep.subr.bf16.mxu0 %v1279_v23 }
  0x37   : > { %625 = vrot.lane.b32.xlu0 %v1388_v52, %s1280_s15  ;;  %1195 = vmatprep.subr.bf16.mxu1 %v1279_v23 }
  0x39   : > { %655 = vrot.lane.b32.xlu1 %v1449_v34, %s1281_s20  ;;  %898 = vmatpush1.bf16.msra.mxu0 %v1246_v4 }
  0x3a   : > { %1204 = vmatpush1.bf16.msra.mxu1 %v1246_v4  ;;  %899 = vmatprep.subr.bf16.mxu0 %v1279_v23 }
  0x3b   : > { %653 = vrot.lane.b32.xlu0 %v1411_v5, %s1281_s20  ;;  %1196 = vmatprep.subr.bf16.mxu1 %v1279_v23  ;;  %v1248_v5 = vld [vmem:[%s1789_s2 + $0x10] sm:$0xff]  }
  0x3d   : > { %663 = vrot.lane.b32.xlu1 %v1459_v38, %s1281_s20  ;;  %900 = vmatpush1.bf16.msra.mxu0 %v1247_v30 }
  0x3e   : > { %1205 = vmatpush1.bf16.msra.mxu1 %v1247_v30  ;;  %901 = vmatprep.subr.bf16.mxu0 %v1279_v23 }
  0x3f   : > { %661 = vrot.lane.b32.xlu0 %v1398_v60, %s1281_s20  ;;  %v474_v60 = vrot.slane %v1461_v39, 1  ;;  %1197 = vmatprep.subr.bf16.mxu1 %v1279_v23  ;;  %v485_v39 = vrot.slane %v1451_v35, 1 }
  0x41   : > { %689 = vrot.lane.b32.xlu1 %v1438_v24, %s1282_s29  ;;  %902 = vmatpush1.bf16.msra.mxu0 %v1248_v5 }
  0x42   : > { %1206 = vmatpush1.bf16.msra.mxu1 %v1248_v5  ;;  %903 = vmatprep.subr.bf16.mxu0 %v1279_v23 }
  0x43   : > { %687 = vrot.lane.b32.xlu0 %v1418_v9, %s1282_s29  ;;  %v475_v9 = vsel %vm463_vm0, %v473_v31, %v474_v60  ;;  %1198 = vmatprep.subr.bf16.mxu1 %v1279_v23 }
  0x45   : > { %697 = vrot.lane.b32.xlu1 %v1451_v35, %s1282_s29  ;;  %904 = vmatpush1.bf16.msra.mxu0 %v1249_v36 }
  0x46   : > { %1207 = vmatpush1.bf16.msra.mxu1 %v1249_v36  ;;  %905 = vmatprep.subr.bf16.mxu0 %v1279_v23 }
  0x47   : > { %695 = vrot.lane.b32.xlu0 %v1422_v12, %s1282_s29  ;;  %v487_v12 = vsel %vm463_vm0, %v485_v39, %v486_v41  ;;  %1199 = vmatprep.subr.bf16.mxu1 %v1279_v23 }
  0x49   : > { %726 = vrot.lane.b32.xlu1 %v475_v9, %s1283_s13  ;;  %906 = vmatpush1.bf16.msra.mxu0 %v1250_v45 }
  0x4a   : > { %1208 = vmatpush1.bf16.msra.mxu1 %v1250_v45  ;;  %921 = vmatprep.subr.bf16.mxu0 %v1279_v23 }
  0x4b   : > { %724 = vrot.lane.b32.xlu0 %v1514_v16, %s1283_s13  ;;  %1200 = vmatprep.subr.bf16.mxu1 %v1279_v23  ;;  %v791_v23 = vld [vmem:[#allocation2 + $0x78] sm:$0xff] }
  0x4c   : > { %v799_v29 = vpack.c.bf16 %v791_v23, %v789_v21 }
  0x4d   : > { %734 = vrot.lane.b32.xlu1 %v487_v12, %s1283_s13  ;;  %922 = vmatpush2.bf16.msra.mxu0 %v1251_v47 }
  0x4e   : > { %1209 = vmatpush2.bf16.msra.mxu1 %v1251_v47 }
  0x4f   : > { %732 = vrot.lane.b32.xlu0 %v1537_v28, %s1283_s13 }
  0x51   : > { %494 = vrot.lane.b32.xlu1 %v475_v9, %s1276_s8 }
  0x53   : > { %492 = vrot.lane.b32.xlu0 %v1514_v16, %s1276_s8 }
  0x55   : > { %502 = vrot.lane.b32.xlu1 %v487_v12, %s1276_s8 }
  0x57   : > { %500 = vrot.lane.b32.xlu0 %v1537_v28, %s1276_s8  ;;  %s1171_s8 = sshll.u32 %s1799_s21, 5 }
  0x58   : > { %s1746_s26 = scalar_lea.vmem %s1793_s6, %s1171_s8 }
  0x59   : > { %552 = vrot.lane.b32.xlu1 %v1482_v59, %s1277_s9 }
  0x5b   : > { %550 = vrot.lane.b32.xlu0 %v1449_v34, %s1277_s9  ;;  %v614_v34 = vrot.slane %v1490_v63, 1 }
  0x5d   : > { %560 = vrot.lane.b32.xlu1 %v1495_v2, %s1277_s9 }
  0x5f   : > { %558 = vrot.lane.b32.xlu0 %v1459_v38, %s1277_s9  ;;  %v616_v38 = vsel %vm463_vm0, %v614_v34, %v615_v48 }
  0x61   : > { %586 = vrot.lane.b32.xlu1 %v1359_v17, %s1278_s10 }
  0x63   : > { %584 = vrot.lane.b32.xlu0 %v1438_v24, %s1278_s10 }
  0x65   : > { %594 = vrot.lane.b32.xlu1 %v1490_v63, %s1278_s10 }
  0x67   : > { %592 = vrot.lane.b32.xlu0 %v1451_v35, %s1278_s10 }
  0x69   : > { %623 = vrot.lane.b32.xlu1 %v1374_v40, %s1280_s15 }
  0x6b   : > { %621 = vrot.lane.b32.xlu0 %v475_v9, %s1280_s15 }
  0x6d   : > { %631 = vrot.lane.b32.xlu1 %v616_v38, %s1280_s15 }
  0x6f   : > { %629 = vrot.lane.b32.xlu0 %v487_v12, %s1280_s15  ;;  %s1725_s15 = scalar_lea.vmem %s1791_s4, %s1171_s8 }
  0x71   : > { %659 = vrot.lane.b32.xlu1 %v1416_v8, %s1281_s20 }
  0x73   : > { %657 = vrot.lane.b32.xlu0 %v1482_v59, %s1281_s20 }
  0x75   : > { %667 = vrot.lane.b32.xlu1 %v1518_v19, %s1281_s20  ;;  %v795_v19 = vpack.c.bf16 %v783_v13, %v781_v11 }
  0x77   : > { %665 = vrot.lane.b32.xlu0 %v1495_v2, %s1281_s20 }
  0x79   : > { %693 = vrot.lane.b32.xlu1 %v1363_v25, %s1282_s29 }
  0x7b   : > { %691 = vrot.lane.b32.xlu0 %v1359_v17, %s1282_s29 }
  0x7d   : > { %701 = vrot.lane.b32.xlu1 %v1497_v3, %s1282_s29 }
  0x7f   : > { %699 = vrot.lane.b32.xlu0 %v1490_v63, %s1282_s29 }
  0x81   : > { %730 = vrot.lane.b32.xlu1 %v1388_v52, %s1283_s13 }
  0x83   : > { %728 = vrot.lane.b32.xlu0 %v1374_v40, %s1283_s13 }
  0x85   : > { %738 = vrot.lane.b32.xlu1 %v1530_v22, %s1283_s13 }
  0x87   : > { %736 = vrot.lane.b32.xlu0 %v616_v38, %s1283_s13 }
  0x8b   : > { %v497_v25 = vpop.permute.xlu1 %496 }
  0x8c   : > { %517 = vst.msk [vmem:[#allocation2 + $0x40] sm:$0xff] %vm512_vm3, %v497_v25 }
  0x8d   : > { %v489_v17 = vpop.permute.xlu0 %488 }
  0x8e   : > { %513 = vst.msk [vmem:[#allocation2] sm:$0xff] %vm512_vm3, %v489_v17 }
  0x8f   : > { %v499_v8 = vpop.permute.xlu1 %498 }
  0x90   : > { %518 = vst.msk [vmem:[#allocation2 + $0x50] sm:$0xff] %vm512_vm3, %v499_v8 }
  0x91   : > { %v491_v24 = vpop.permute.xlu0 %490 }
  0x92   : > { %514 = vst.msk [vmem:[#allocation2 + $0x10] sm:$0xff] %vm512_vm3, %v491_v24 }
  0x93   : > { %v549_v40 = vpop.permute.xlu1 %548 }
  0x94   : > { %572 = vst.msk [vmem:[#allocation2 + $0x10] sm:$0xff] %vm570_vm4, %v549_v40 }
  0x95   : > { %v547_v52 = vpop.permute.xlu0 %546 }
  0x96   : > { %571 = vst.msk [vmem:[#allocation2] sm:$0xff] %vm570_vm4, %v547_v52 }
  0x97   : > { %v557_v35 = vpop.permute.xlu1 %556 }
  0x98   : > { %576 = vst.msk [vmem:[#allocation2 + $0x50] sm:$0xff] %vm570_vm4, %v557_v35 }
  0x99   : > { %v555_v49 = vpop.permute.xlu0 %554 }
  0x9a   : > { %575 = vst.msk [vmem:[#allocation2 + $0x40] sm:$0xff] %vm570_vm4, %v555_v49 }
  0x9b   : > { %v583_v50 = vpop.permute.xlu1 %582 }
  0x9c   : > { %606 = vst.msk [vmem:[#allocation2 + $0x10] sm:$0xff] %vm604_vm5, %v583_v50 }
  0x9d   : > { %v581_v51 = vpop.permute.xlu0 %580 }
  0x9e   : > { %605 = vst.msk [vmem:[#allocation2] sm:$0xff] %vm604_vm5, %v581_v51 }
  0x9f   : > { %v591_v53 = vpop.permute.xlu1 %590 }
  0xa0   : > { %610 = vst.msk [vmem:[#allocation2 + $0x50] sm:$0xff] %vm604_vm5, %v591_v53  ;;  %v1174_v53 = vld [vmem:[%s1725_s15] sm:$0xff]  }
  0xa1   : > { %v589_v54 = vpop.permute.xlu0 %588 }
  0xa2   : > { %609 = vst.msk [vmem:[#allocation2 + $0x40] sm:$0xff] %vm604_vm5, %v589_v54  ;;  %v1731_v54 = vld [vmem:[%s1790_s3] ss:$0 sm:$0xff] }
  0xa3   : > { %v620_v55 = vpop.permute.xlu1 %619 }
  0xa4   : > { %643 = vst.msk [vmem:[#allocation2 + $0x10] sm:$0xff] %vm641_vm6, %v620_v55  ;;  %v1175_v55 = vunpack.c.l.bf16 %v1174_v53 }
  0xa5   : > { %v618_v56 = vpop.permute.xlu0 %617 }
  0xa6   : > { %642 = vst.msk [vmem:[#allocation2] sm:$0xff] %vm641_vm6, %v618_v56 }
  0xa7   : > { %v628_v57 = vpop.permute.xlu1 %627 }
  0xa8   : > { %647 = vst.msk [vmem:[#allocation2 + $0x50] sm:$0xff] %vm641_vm6, %v628_v57  ;;  %v1190_v57 = vld [vmem:[%s1725_s15 + $0x10] sm:$0xff]  }
  0xa9   : > { %v626_v58 = vpop.permute.xlu0 %625 }
  0xaa   : > { %646 = vst.msk [vmem:[#allocation2 + $0x40] sm:$0xff] %vm641_vm6, %v626_v58 }
  0xab   : > { %v656_v59 = vpop.permute.xlu1 %655 }
  0xac   : > { %679 = vst.msk [vmem:[#allocation2 + $0x10] sm:$0xff] %vm677_vm7, %v656_v59  ;;  %v1738_v59 = vld [vmem:[%s1792_s5] ss:$0 sm:$0xff] }
  0xad   : > { %v654_v61 = vpop.permute.xlu0 %653 }
  0xae   : > { %678 = vst.msk [vmem:[#allocation2] sm:$0xff] %vm677_vm7, %v654_v61 }
  0xaf   : > { %v664_v62 = vpop.permute.xlu1 %663 }
  0xb0   : > { %683 = vst.msk [vmem:[#allocation2 + $0x50] sm:$0xff] %vm677_vm7, %v664_v62 }
  0xb1   : > { %v662_v63 = vpop.permute.xlu0 %661 }
  0xb2   : > { %682 = vst.msk [vmem:[#allocation2 + $0x40] sm:$0xff] %vm677_vm7, %v662_v63  ;;  %v1176_v63 = vunpack.c.h.bf16 %v1174_v53 }
  0xb3   : > { %v690_v0 = vpop.permute.xlu1 %689 }
  0xb4   : > { %713 = vst.msk [vmem:[#allocation2 + $0x10] sm:$0xff] %vm711_vm8, %v690_v0  ;;  %v1183_v0 = vunpack.c.l.bf16 %v1190_v57 }
  0xb5   : > { %v688_v1 = vpop.permute.xlu0 %687 }
  0xb6   : > { %712 = vst.msk [vmem:[#allocation2] sm:$0xff] %vm711_vm8, %v688_v1 }
  0xb7   : > { %v698_v2 = vpop.permute.xlu1 %697 }
  0xb8   : > { %717 = vst.msk [vmem:[#allocation2 + $0x50] sm:$0xff] %vm711_vm8, %v698_v2 }
  0xb9   : > { %v696_v3 = vpop.permute.xlu0 %695 }
  0xba   : > { %716 = vst.msk [vmem:[#allocation2 + $0x40] sm:$0xff] %vm711_vm8, %v696_v3 }
  0xbb   : > { %v727_v6 = vpop.permute.xlu1 %726 }
  0xbc   : > { %750 = vst.msk [vmem:[#allocation2 + $0x10] sm:$0xff] %vm748_vm9, %v727_v6 }
  0xbd   : > { %v725_v42 = vpop.permute.xlu0 %724 }
  0xbe   : > { %749 = vst.msk [vmem:[#allocation2] sm:$0xff] %vm748_vm9, %v725_v42 }
  0xbf   : > { %v735_v7 = vpop.permute.xlu1 %734 }
  0xc0   : > { %754 = vst.msk [vmem:[#allocation2 + $0x50] sm:$0xff] %vm748_vm9, %v735_v7 }
  0xc1   : > { %v733_v10 = vpop.permute.xlu0 %732 }
  0xc2   : > { %753 = vst.msk [vmem:[#allocation2 + $0x40] sm:$0xff] %vm748_vm9, %v733_v10 }
  0xc3   : > { %v495_v14 = vpop.permute.xlu1 %494  ;;  %v778_v15 = vld [vmem:[#allocation2 + $0x10] sm:$0xff] }
  0xc4   : > { %516 = vst.msk [vmem:[#allocation2 + $0x30] sm:$0xff] %vm512_vm3, %v495_v14 }
  0xc5   : > { %v493_v16 = vpop.permute.xlu0 %492  ;;  %v776_v18 = vld [vmem:[#allocation2] sm:$0xff] }
  0xc6   : > { %515 = vst.msk [vmem:[#allocation2 + $0x20] sm:$0xff] %vm512_vm3, %v493_v16  ;;  %v792_v20 = vpack.c.bf16 %v778_v15, %v776_v18  ;;  %v1184_v18 = vunpack.c.h.bf16 %v1190_v57 }
  0xc7   : > { %v503_v26 = vpop.permute.xlu1 %502  ;;  %v786_v22 = vld [vmem:[#allocation2 + $0x50] sm:$0xff] }
  0xc8   : > { %924 = vmatmul.mubr.bf16.vlgmr.msra.gmra.mxu0 %v792_v20  ;;  %520 = vst.msk [vmem:[#allocation2 + $0x70] sm:$0xff] %vm512_vm3, %v503_v26 }
  0xc9   : > { %v501_v27 = vpop.permute.xlu0 %500  ;;  %v784_v28 = vld [vmem:[#allocation2 + $0x40] sm:$0xff]  ;;  %1165 = vmatprep.mubr.msk.bf16.mxu0 %vm438_vm1, %v795_v19 }
  0xca   : > { %519 = vst.msk [vmem:[#allocation2 + $0x60] sm:$0xff] %vm512_vm3, %v501_v27  ;;  %v796_v4 = vpack.c.bf16 %v786_v22, %v784_v28 }
  0xcb   : > { %v553_v30 = vpop.permute.xlu1 %552 }
  0xcc   : > { %940 = vmatmul.mubr.bf16.vlgmr.msra.gmra.mxu1 %v796_v4  ;;  %574 = vst.msk [vmem:[#allocation2 + $0x30] sm:$0xff] %vm570_vm4, %v553_v30 }
  0xcd   : > { %v551_v5 = vpop.permute.xlu0 %550  ;;  %1167 = vmatprep.mubr.msk.bf16.mxu1 %vm438_vm1, %v799_v29 }
  0xce   : > { %573 = vst.msk [vmem:[#allocation2 + $0x20] sm:$0xff] %vm570_vm4, %v551_v5 }
  0xcf   : > { %v561_v31 = vpop.permute.xlu1 %560 }
  0xd0   : > { %578 = vst.msk [vmem:[#allocation2 + $0x70] sm:$0xff] %vm570_vm4, %v561_v31  ;;  %v1189_v31 = vld [vmem:[%s1725_s15 + $0x8] sm:$0xff]  }
  0xd1   : > { %v559_v60 = vpop.permute.xlu0 %558 }
  0xd2   : > { %577 = vst.msk [vmem:[#allocation2 + $0x60] sm:$0xff] %vm570_vm4, %v559_v60  ;;  %v1179_v60 = vunpack.c.l.bf16 %v1189_v31 }
  0xd3   : > { %v587_v32 = vpop.permute.xlu1 %586 }
  0xd4   : > { %608 = vst.msk [vmem:[#allocation2 + $0x30] sm:$0xff] %vm604_vm5, %v587_v32 }
  0xd5   : > { %v585_v33 = vpop.permute.xlu0 %584 }
  0xd6   : > { %607 = vst.msk [vmem:[#allocation2 + $0x20] sm:$0xff] %vm604_vm5, %v585_v33  ;;  %v1191_v33 = vld [vmem:[%s1725_s15 + $0x18] sm:$0xff]  }
  0xd7   : > { %v595_v36 = vpop.permute.xlu1 %594 }
  0xd8   : > { %612 = vst.msk [vmem:[#allocation2 + $0x70] sm:$0xff] %vm604_vm5, %v595_v36 }
  0xd9   : > { %v593_v37 = vpop.permute.xlu0 %592 }
  0xda   : > { %611 = vst.msk [vmem:[#allocation2 + $0x60] sm:$0xff] %vm604_vm5, %v593_v37 }
  0xdb   : > { %v624_v9 = vpop.permute.xlu1 %623 }
  0xdc   : > { %645 = vst.msk [vmem:[#allocation2 + $0x30] sm:$0xff] %vm641_vm6, %v624_v9 }
  0xdd   : > { %v622_v39 = vpop.permute.xlu0 %621 }
  0xde   : > { %644 = vst.msk [vmem:[#allocation2 + $0x20] sm:$0xff] %vm641_vm6, %v622_v39  ;;  %v1180_v39 = vunpack.c.h.bf16 %v1189_v31 }
  0xdf   : > { %v632_v41 = vpop.permute.xlu1 %631 }
  0xe0   : > { %649 = vst.msk [vmem:[#allocation2 + $0x70] sm:$0xff] %vm641_vm6, %v632_v41  ;;  %v1187_v41 = vunpack.c.l.bf16 %v1191_v33 }
  0xe1   : > { %v630_v43 = vpop.permute.xlu0 %629 }
  0xe2   : > { %648 = vst.msk [vmem:[#allocation2 + $0x60] sm:$0xff] %vm641_vm6, %v630_v43 }
  0xe3   : > { %v660_v44 = vpop.permute.xlu1 %659 }
  0xe4   : > { %681 = vst.msk [vmem:[#allocation2 + $0x30] sm:$0xff] %vm677_vm7, %v660_v44 }
  0xe5   : > { %v658_v45 = vpop.permute.xlu0 %657 }
  0xe6   : > { %680 = vst.msk [vmem:[#allocation2 + $0x20] sm:$0xff] %vm677_vm7, %v658_v45 }
  0xe7   : > { %v668_v46 = vpop.permute.xlu1 %667 }
  0xe8   : > { %685 = vst.msk [vmem:[#allocation2 + $0x70] sm:$0xff] %vm677_vm7, %v668_v46 }
  0xe9   : > { %v666_v12 = vpop.permute.xlu0 %665 }
  0xea   : > { %684 = vst.msk [vmem:[#allocation2 + $0x60] sm:$0xff] %vm677_vm7, %v666_v12 }
  0xeb   : > { %v694_v47 = vpop.permute.xlu1 %693 }
  0xec   : > { %715 = vst.msk [vmem:[#allocation2 + $0x30] sm:$0xff] %vm711_vm8, %v694_v47 }
  0xed   : > { %v692_v34 = vpop.permute.xlu0 %691 }
  0xee   : > { %714 = vst.msk [vmem:[#allocation2 + $0x20] sm:$0xff] %vm711_vm8, %v692_v34 }
  0xef   : > { %v702_v48 = vpop.permute.xlu1 %701 }
  0xf0   : > { %719 = vst.msk [vmem:[#allocation2 + $0x70] sm:$0xff] %vm711_vm8, %v702_v48 }
  0xf1   : > { %v700_v38 = vpop.permute.xlu0 %699 }
  0xf2   : > { %718 = vst.msk [vmem:[#allocation2 + $0x60] sm:$0xff] %vm711_vm8, %v700_v38 }
  0xf3   : > { %v731_v25 = vpop.permute.xlu1 %730 }
  0xf4   : > { %752 = vst.msk [vmem:[#allocation2 + $0x30] sm:$0xff] %vm748_vm9, %v731_v25 }
  0xf5   : > { %v729_v17 = vpop.permute.xlu0 %728 }
  0xf6   : > { %751 = vst.msk [vmem:[#allocation2 + $0x20] sm:$0xff] %vm748_vm9, %v729_v17 }
  0xf7   : > { %v739_v8 = vpop.permute.xlu1 %738 }
  0xf8   : > { %756 = vst.msk [vmem:[#allocation2 + $0x70] sm:$0xff] %vm748_vm9, %v739_v8 }
  0xf9   : > { %v737_v24 = vpop.permute.xlu0 %736 }
  0xfa   : > { %755 = vst.msk [vmem:[#allocation2 + $0x60] sm:$0xff] %vm748_vm9, %v737_v24  ;;  %v1188_v24 = vunpack.c.h.bf16 %v1191_v33 }
  0xfb   : > { %v782_v40 = vld [vmem:[#allocation2 + $0x30] sm:$0xff] }
  0xfd   : > { %v780_v52 = vld [vmem:[#allocation2 + $0x20] sm:$0xff] }
  0xfe   : > { %v794_v35 = vpack.c.bf16 %v782_v40, %v780_v52 }
  0xff   : > { %v790_v49 = vld [vmem:[#allocation2 + $0x70] sm:$0xff] }
 0x100   : > { %932 = vmatmul.mubr.bf16.gmra.mxu0 %v794_v35 }
 0x101   : > { %v788_v50 = vld [vmem:[#allocation2 + $0x60] sm:$0xff] }
 0x102   : > { %v798_v51 = vpack.c.bf16 %v790_v49, %v788_v50 }
 0x104   : > { %948 = vmatmul.mubr.bf16.gmra.mxu1 %v798_v51 }
 0x188   : > { %v925_v56 = vpop.f32.mrf.mxu0 }
 0x189   : > { %v926_v58 = vadd.f32 %v1731_v54, %v925_v56 }
 0x18a   : > { %v927_v61 = vpop.f32.mrf.mxu0 }
 0x18b   : > { %v972_v62 = vadd.f32 %v1175_v55, %v926_v58 }
 0x18c   : > { %v928_v1 = vpop.f32.mrf.mxu0  ;;  %v941_v2 = vpop.f32.mrf.mxu1 }
 0x18d   : > { %vm981_vm10 = vcmp.gt.f32.partialorder %v972_v62, 0.0  ;;  %v995_v3 = vmul.f32 %v1738_v59, %v972_v62  ;;  %v929_v6 = vadd.f32 %v1731_v54, %v928_v1  ;;  %v942_v42 = vadd.f32 %v1731_v54, %v941_v2 }
 0x18e   : > { %v930_v7 = vpop.f32.mrf.mxu0  ;;  %v943_v10 = vpop.f32.mrf.mxu1 }
 0x18f   : > { %v1003_v11 = vsel %vm981_vm10, %v972_v62, %v995_v3  ;;  %v973_v13 = vadd.f32 %v1176_v63, %v929_v6  ;;  %v976_v14 = vadd.f32 %v1183_v0, %v942_v42 }
 0x190   : > { %v1011_v15 = vpack.c.bf16 %v1003_v11, %v1003_v11  ;;  %v944_v16 = vpop.f32.mrf.mxu1 }
 0x191   : > { %vm982_vm12 = vcmp.gt.f32.partialorder %v973_v13, 0.0  ;;  %v996_v19 = vmul.f32 %v1738_v59, %v973_v13  ;;  %vm985_vm13 = vcmp.gt.f32.partialorder %v976_v14, 0.0  ;;  %v999_v20 = vmul.f32 %v1738_v59, %v976_v14 }
 0x192   : > { %1020 = vst.msk [vmem:[%s1746_s26] sm:$0xf] %vm1019_vm11, %v1011_v15  ;;  %v945_v21 = vadd.f32 %v1731_v54, %v944_v16  ;;  %v946_v23 = vpop.f32.mrf.mxu1 }
 0x193   : > { %v1004_v26 = vsel %vm982_vm12, %v973_v13, %v996_v19  ;;  %v1007_v22 = vsel %vm985_vm13, %v976_v14, %v999_v20 }
 0x194   : > { %v1012_v27 = vpack.c.bf16 %v1004_v26, %v1004_v26  ;;  %v1015_v28 = vpack.c.bf16 %v1007_v22, %v1007_v22  ;;  %v977_v29 = vadd.f32 %v1184_v18, %v945_v21 }
 0x196   : > { %1021 = vst.msk [vmem:[%s1746_s26 + $0x4] sm:$0xf] %vm1019_vm11, %v1012_v27  ;;  %1024 = vst.msk [vmem:[%s1746_s26 + $0x10] sm:$0xf] %vm1019_vm11, %v1015_v28  ;;  %vm986_vm14 = vcmp.gt.f32.partialorder %v977_v29, 0.0  ;;  %v1000_v4 = vmul.f32 %v1738_v59, %v977_v29 }
 0x198   : > { %v1008_v30 = vsel %vm986_vm14, %v977_v29, %v1000_v4 }
 0x199   : > { %v1016_v5 = vpack.c.bf16 %v1008_v30, %v1008_v30 }
 0x19b   : > { %1025 = vst.msk [vmem:[%s1746_s26 + $0x14] sm:$0xf] %vm1019_vm11, %v1016_v5 }
 0x1c0   : > { %v933_v32 = vpop.f32.mrf.mxu0 }
 0x1c1   : > { %v934_v36 = vadd.f32 %v1731_v54, %v933_v32 }
 0x1c2   : > { %v935_v37 = vpop.f32.mrf.mxu0 }
 0x1c3   : > { %v974_v9 = vadd.f32 %v1179_v60, %v934_v36 }
 0x1c4   : > { %v936_v43 = vpop.f32.mrf.mxu0  ;;  %v949_v44 = vpop.f32.mrf.mxu1 }
 0x1c5   : > { %vm983_vm15 = vcmp.gt.f32.partialorder %v974_v9, 0.0  ;;  %v997_v45 = vmul.f32 %v1738_v59, %v974_v9  ;;  %v937_v46 = vadd.f32 %v1731_v54, %v936_v43  ;;  %v950_v12 = vadd.f32 %v1731_v54, %v949_v44 }
 0x1c6   : > { %v938_v47 = vpop.f32.mrf.mxu0  ;;  %v951_v34 = vpop.f32.mrf.mxu1 }
 0x1c7   : > { %v1005_v48 = vsel %vm983_vm15, %v974_v9, %v997_v45  ;;  %v975_v38 = vadd.f32 %v1180_v39, %v937_v46  ;;  %v978_v25 = vadd.f32 %v1187_v41, %v950_v12 }
 0x1c8   : > { %v1013_v17 = vpack.c.bf16 %v1005_v48, %v1005_v48  ;;  %v952_v8 = vpop.f32.mrf.mxu1 }
 0x1c9   : > { %vm984_vm0 = vcmp.gt.f32.partialorder %v975_v38, 0.0  ;;  %v998_v40 = vmul.f32 %v1738_v59, %v975_v38  ;;  %vm987_vm1 = vcmp.gt.f32.partialorder %v978_v25, 0.0  ;;  %v1001_v52 = vmul.f32 %v1738_v59, %v978_v25 }
 0x1ca   : > { %1022 = vst.msk [vmem:[%s1746_s26 + $0x8] sm:$0xf] %vm1019_vm11, %v1013_v17  ;;  %v953_v35 = vadd.f32 %v1731_v54, %v952_v8  ;;  %v954_v49 = vpop.f32.mrf.mxu1 }
 0x1cb   : > { %v1006_v50 = vsel %vm984_vm0, %v975_v38, %v998_v40  ;;  %v1009_v51 = vsel %vm987_vm1, %v978_v25, %v1001_v52 }
 0x1cc   : > { %v1014_v53 = vpack.c.bf16 %v1006_v50, %v1006_v50  ;;  %v1017_v55 = vpack.c.bf16 %v1009_v51, %v1009_v51  ;;  %v979_v56 = vadd.f32 %v1188_v24, %v953_v35 }
 0x1ce   : > { %1023 = vst.msk [vmem:[%s1746_s26 + $0xc] sm:$0xf] %vm1019_vm11, %v1014_v53  ;;  %1026 = vst.msk [vmem:[%s1746_s26 + $0x18] sm:$0xf] %vm1019_vm11, %v1017_v55  ;;  %vm988_vm2 = vcmp.gt.f32.partialorder %v979_v56, 0.0  ;;  %v1002_v57 = vmul.f32 %v1738_v59, %v979_v56 }
 0x1d0   : > { %v1010_v58 = vsel %vm988_vm2, %v979_v56, %v1002_v57 }
 0x1d1   : > { %v1018_v61 = vpack.c.bf16 %v1010_v58, %v1010_v58 }
 0x1d3   : > { %1027 = vst.msk [vmem:[%s1746_s26 + $0x1c] sm:$0xf] %vm1019_vm11, %v1018_v61 }
 0x1d4 PF: > { %s16_s23 = sadd.s32 1, %s1274_s23   ;;  %s1794_s21 = smov %s1270_s22 }
 0x1d5   : > { %p13_p5 = scmp.ge.s32.totalorder %s16_s23, 4   ;;  %s1795_s22 = smov %s1797_s24 }
 0x1d7   :  { %15 = sbr.rel (!%p13_p5) target bundleno = 2 (0x2), region = 82 }

// kernel: _lambda_.11
= control target key start
LH: loop header
LB: loop body
LE: loop exit
PB: predicated region body
PF: predicated region fallthrough
CT: control target
= control target key end

     0   :  { %s1198_s15 = smov 0   ;;  %s1200_s16 = smov 0   ;;  %s1566_s0 = inlined_call_operand.vmem [shape: bf16[2,10,10,16], index: 0, kind: input, shape index: {}]   ;;  %s1567_s1 = inlined_call_operand.vmem [shape: bf16[144,16], index: 1, kind: input, shape index: {}]   ;;  %s1568_s2 = inlined_call_operand.vmem [shape: f32[1,16], index: 2, kind: input, shape index: {}]   ;;  %s1569_s3 = inlined_call_operand.vmem [shape: f32[1,16], index: 3, kind: input, shape index: {}]   ;;  %s1570_s4 = inlined_call_operand.vmem [shape: bf16[2,8,8,16], index: 4, kind: output, shape index: {}]  }
   0x1   :  { %s1202_s17 = smov 0  }
   0x2 LB: > { %s26_s18 = sadd.s32 1, %s1159_s16  ;;  %p919_p0 = scmp.ge.s32.totalorder %s1163_s17, 1  ;;  %s1163_s17 = sphi %s1202_s17, %s14_s17   ;;  %s1159_s16 = sphi %s1200_s16, %s1572_s16   ;;  %s1155_s15 = sphi %s1198_s15, %s1571_s15  }
   0x3   : > { %p28_p1 = scmp.ge.s32.totalorder %s26_s18, 2  ;;  %p176_p2 = scmp.lt.s32.totalorder %s1163_s17, 3 }
   0x5   : > { %s1574_s18 = smov (%p28_p1, %s26_s18), 0  ;;  %p177_p3 = pnand %p919_p0, %p176_p2 }
   0x6   : > { %p206_p4 = scmp.lt.s32.totalorder (!%p177_p3), %s1155_s15, 1  ;;  %s1166_s27 = smov (!%p177_p3), 48  }
   0x7   : > { %180 = sbr.rel (%p177_p3) target bundleno = 406 (0x196), region = 36  ;;  %s1167_s6 = smov (!%p177_p3), 32  }
   0x8   : > { %s1168_s7 = smov (!%p177_p3), 16   ;;  %s1169_s12 = smov (!%p177_p3), 64  }
   0x9   : > { %s1170_s19 = smov (!%p177_p3), 80   ;;  %s1171_s22 = smov (!%p177_p3), 96  }
   0xa   : > { %s1172_s25 = smov (!%p177_p3), 112  }
   0xc   : > { %v1165_v0 = vmov 0   ;;  %s1576_s15 = smov (!%p206_p4, %s1155_s15), 1  ;;  %v1132_v1 = vld [vmem:[%s1567_s1 + $0x38] sm:$0xff]   ;;  %vm349_vm0 = vcmask 1045504   ;;  %v1133_v2 = vld [vmem:[%s1567_s1 + $0x30] sm:$0xff]   ;;  %vm291_vm1 = vcmask 1046528  }
   0xd   : > { %719 = vmatprep.subr.bf16.mxu0 %v1165_v0  ;;  %941 = vmatprep.subr.bf16.mxu1 %v1165_v0  ;;  %s959_s21 = smul.u32 80, %s1576_s15  ;;  %vm266_vm2 = vcmask 130048   ;;  %v1134_v37 = vld [vmem:[%s1567_s1 + $0x28] sm:$0xff]   ;;  %v1135_v46 = vld [vmem:[%s1567_s1 + $0x20] sm:$0xff]   ;;  %v1136_v63 = vld [vmem:[%s1567_s1 + $0x18] sm:$0xff]   ;;  %vm340_vm3 = vcmask 261248  }
   0xe   : > { %720 = vmatpush1.bf16.msra.mxu0 %v1132_v1  ;;  %950 = vmatpush1.bf16.msra.mxu1 %v1132_v1  ;;  %vm398_vm4 = vcmask 392448   ;;  %vm432_vm5 = vcmask 523648   ;;  %vm469_vm6 = vcmask 654848   ;;  %vm505_vm7 = vcmask 786048   ;;  %s940_s30 = sshll.u32 %s1576_s15, 5 }
   0xf   : > { %721 = vmatprep.subr.bf16.mxu0 %v1165_v0  ;;  %942 = vmatprep.subr.bf16.mxu1 %v1165_v0  ;;  %s1232_s26 = scalar_lea.vmem %s1566_s0, %s959_s21  ;;  %vm539_vm8 = vcmask 917248   ;;  %vm576_vm9 = vcmask 1048448   ;;  %vm823_vm12 = vcmask 125952  }
  0x10   : > { %v236_v3 = vld [vmem:[%s1232_s26 + $0x28] ss:$8 sps:$4 sm:$0xff]   ;;  %v1237_v5 = vld [vmem:[%s1232_s26] ss:$56 sps:$4 sm:$0xff]   ;;  %v227_v10 = vld [vmem:[%s1232_s26 + $0x4] sm:$0x1] }
  0x11   : > { %v228_v4 = vld [vmem:[%s1232_s26 + $0x8] ss:$8 sps:$4 sm:$0xff]   ;;  %v1239_v6 = vunpack.c.l.bf16 %v236_v3  ;;  %v1241_v7 = vunpack.c.h.bf16 %v236_v3  ;;  %v229_v11 = vld [vmem:[%s1232_s26 + $0xc] sm:$0x1]  ;;  %v1248_v12 = vld [vmem:[%s1232_s26 + $0x18] ss:$8 sps:$4 sm:$0xff]   ;;  %v246_v13 = vunpack.c.l.bf16 %v1237_v5  ;;  %v247_v14 = vunpack.c.l.bf16 %v227_v10 }
  0x12   : > { %v248_v8 = vunpack.c.l.bf16 %v228_v4  ;;  %v1243_v9 = vunpack.c.h.bf16 %v228_v4  ;;  %722 = vmatpush1.bf16.msra.mxu0 %v1133_v2  ;;  %951 = vmatpush1.bf16.msra.mxu1 %v1133_v2  ;;  %v249_v15 = vunpack.c.l.bf16 %v229_v11  ;;  %v235_v16 = vld [vmem:[%s1232_s26 + $0x24] sm:$0x1]  ;;  %v237_v17 = vld [vmem:[%s1232_s26 + $0x2c] sm:$0x1]  ;;  %v1254_v18 = vunpack.c.h.bf16 %v1248_v12  ;;  %v239_v31 = vld [vmem:[%s1232_s26 + $0x34] sm:$0x1] }
  0x13   : > { %723 = vmatprep.subr.bf16.mxu0 %v1165_v0  ;;  %943 = vmatprep.subr.bf16.mxu1 %v1165_v0  ;;  %v997_v19 = vpack.i.bf16 %v1241_v7, %v1239_v6  ;;  %272 = vst.msk [vmem:[#allocation2 + $0x50] sm:$0xff] %vm266_vm2, %v1239_v6  ;;  %273 = vst.msk [vmem:[#allocation2 + $0x60] sm:$0xff] %vm266_vm2, %v1241_v7  ;;  %v350_v23 = vrot.slane %v246_v13, 2  ;;  %v351_v24 = vrot.slane %v247_v14, 2  ;;  %v292_v26 = vrot.slane %v246_v13, 1 }
  0x14   : > { %v992_v20 = vpack.i.bf16 %v1243_v9, %v248_v8  ;;  %v353_v21 = vrot.slane %v248_v8, 2  ;;  %v295_v22 = vrot.slane %v248_v8, 1  ;;  %268 = vst.msk [vmem:[#allocation2 + $0x10] sm:$0xff] %vm266_vm2, %v248_v8  ;;  %269 = vst.msk [vmem:[#allocation2 + $0x20] sm:$0xff] %vm266_vm2, %v1243_v9  ;;  %v354_v25 = vrot.slane %v249_v15, 2 }
  0x15   : > { %267 = vst.msk [vmem:[#allocation2] sm:$0xff] %vm266_vm2, %v246_v13  ;;  %271 = vst.msk [vmem:[#allocation2 + $0x40] sm:$0xff] %vm266_vm2, %v1254_v18  ;;  %998 = vrot.lane.b32.xlu1 %v997_v19, %s1166_s27  ;;  %v293_v27 = vrot.slane %v247_v14, 1  ;;  %v296_v28 = vrot.slane %v249_v15, 1  ;;  %v255_v29 = vunpack.c.l.bf16 %v235_v16  ;;  %v257_v30 = vunpack.c.l.bf16 %v237_v17  ;;  %v231_v36 = vld [vmem:[%s1232_s26 + $0x14] sm:$0x1] }
  0x16   : > { %993 = vrot.lane.b32.xlu0 %v992_v20, %s1166_s27  ;;  %v352_v32 = vsel %vm349_vm0, %v350_v23, %v351_v24  ;;  %v1276_v33 = vsel %vm349_vm0, %v353_v21, %v354_v25  ;;  %v362_v34 = vrot.slane %v1254_v18, 2  ;;  %v365_v35 = vrot.slane %v1239_v6, 2  ;;  %724 = vmatpush1.bf16.msra.mxu0 %v1134_v37  ;;  %v241_v8 = vld [vmem:[%s1232_s26 + $0x3c] sm:$0x1]  ;;  %v1137_v17 = vld [vmem:[%s1567_s1 + $0x10] sm:$0xff]  }
  0x17   : > { %v1012_v38 = vpack.i.bf16 %v1276_v33, %v352_v32  ;;  %v294_v39 = vsel %vm291_vm1, %v292_v26, %v293_v27  ;;  %v1287_v40 = vsel %vm291_vm1, %v295_v22, %v296_v28  ;;  %v363_v41 = vrot.slane %v255_v29, 2  ;;  %952 = vmatpush1.bf16.msra.mxu1 %v1134_v37  ;;  %725 = vmatprep.subr.bf16.mxu0 %v1165_v0  ;;  %v233_v15 = vld [vmem:[%s1232_s26 + $0x1c] sm:$0x1]  ;;  %v242_v23 = vld [vmem:[%s1232_s26 + $0x40] ss:$8 sps:$4 sm:$0xff]  }
  0x18   : > { %v1002_v42 = vpack.i.bf16 %v1287_v40, %v294_v39  ;;  %v366_v43 = vrot.slane %v257_v30, 2  ;;  %v304_v44 = vrot.slane %v1254_v18, 1  ;;  %v305_v45 = vrot.slane %v255_v29, 1  ;;  %944 = vmatprep.subr.bf16.mxu1 %v1165_v0  ;;  %v1376_v28 = vld [vmem:[%s1232_s26 + $0x44] sm:$0x1] }
  0x19   : > { %1013 = vrot.lane.b32.xlu1 %v1012_v38, %s1167_s6  ;;  %v1296_v47 = vsel %vm349_vm0, %v362_v34, %v363_v41  ;;  %v307_v48 = vrot.slane %v1239_v6, 1  ;;  %v308_v49 = vrot.slane %v257_v30, 1  ;;  %v259_v50 = vunpack.c.l.bf16 %v239_v31 }
  0x1a   : > { %1003 = vrot.lane.b32.xlu0 %v1002_v42, %s1168_s7  ;;  %v1302_v51 = vsel %vm349_vm0, %v365_v35, %v366_v43  ;;  %598 = vst.msk [vmem:[#allocation2 + $0x28] sm:$0xff] %vm266_vm2, %v1296_v47  ;;  %v1307_v52 = vsel %vm291_vm1, %v304_v44, %v305_v45  ;;  %v310_v53 = vrot.slane %v1241_v7, 1  ;;  %v251_v54 = vunpack.c.l.bf16 %v231_v36  ;;  %726 = vmatpush1.bf16.msra.mxu0 %v1135_v46 }
  0x1b   : > { %599 = vst.msk [vmem:[#allocation2 + $0x38] sm:$0xff] %vm266_vm2, %v1302_v51  ;;  %v1017_v55 = vpack.i.bf16 %v1302_v51, %v1296_v47  ;;  %v309_v56 = vsel %vm291_vm1, %v307_v48, %v308_v49  ;;  %v311_v57 = vrot.slane %v259_v50, 1  ;;  %v298_v58 = vrot.slane %v1243_v9, 1  ;;  %953 = vmatpush1.bf16.msra.mxu1 %v1135_v46  ;;  %727 = vmatprep.subr.bf16.mxu0 %v1165_v0 }
  0x1c   : > { %v1318_v59 = vpack.i.bf16 %v309_v56, %v1307_v52  ;;  %v299_v60 = vrot.slane %v251_v54, 1  ;;  %v368_v61 = vrot.slane %v1241_v7, 2  ;;  %v369_v62 = vrot.slane %v259_v50, 2  ;;  %945 = vmatprep.subr.bf16.mxu1 %v1165_v0 }
  0x1d   : > { %1018 = vrot.lane.b32.xlu1 %v1017_v55, %s1167_s6  ;;  %v1326_v1 = vsel %vm291_vm1, %v310_v53, %v311_v57  ;;  %v356_v2 = vrot.slane %v1243_v9, 2  ;;  %v357_v3 = vrot.slane %v251_v54, 2  ;;  %v1330_v4 = vunpack.c.h.bf16 %v1237_v5  ;;  %v1140_v53 = vld [vmem:[%s1567_s1 + $0x40] sm:$0xff]  }
  0x1e   : > { %1008 = vrot.lane.b32.xlu0 %v1318_v59, %s1168_s7  ;;  %v1027_v10 = vpack.i.bf16 %v1326_v1, %v309_v56  ;;  %v1338_v11 = vsel %vm291_vm1, %v298_v58, %v299_v60  ;;  %v1341_v13 = vsel %vm349_vm0, %v368_v61, %v369_v62  ;;  %v1344_v14 = vunpack.c.l.bf16 %v1248_v12  ;;  %728 = vmatpush1.bf16.msra.mxu0 %v1136_v63 }
  0x1f   : > { %v1022_v5 = vpack.i.bf16 %v1338_v11, %v1287_v40  ;;  %600 = vst.msk [vmem:[#allocation2 + $0x48] sm:$0xff] %vm266_vm2, %v1341_v13  ;;  %v1353_v16 = vsel %vm349_vm0, %v356_v2, %v357_v3  ;;  %274 = vst.msk [vmem:[#allocation2 + $0x70] sm:$0xff] %vm266_vm2, %v1330_v4  ;;  %v261_v12 = vunpack.c.l.bf16 %v241_v8  ;;  %954 = vmatpush1.bf16.msra.mxu1 %v1136_v63  ;;  %v253_v21 = vunpack.c.l.bf16 %v233_v15  ;;  %v1402_v40 = vld [vmem:[%s1232_s26 + $0x4c] sm:$0x1] }
  0x20   : > { %596 = vst.msk [vmem:[#allocation2 + $0x8] sm:$0xff] %vm266_vm2, %v1353_v16  ;;  %270 = vst.msk [vmem:[#allocation2 + $0x30] sm:$0xff] %vm266_vm2, %v1344_v14  ;;  %v1037_v19 = vpack.i.bf16 %v1341_v13, %v1302_v51  ;;  %v1032_v20 = vpack.i.bf16 %v1353_v16, %v1276_v33  ;;  %v371_v22 = vrot.slane %v1330_v4, 2  ;;  %729 = vmatprep.subr.bf16.mxu0 %v1165_v0  ;;  %v313_v24 = vrot.slane %v1330_v4, 1  ;;  %v1138_v33 = vld [vmem:[%s1567_s1 + $0x8] sm:$0xff]  }
  0x21   : > { %1028 = vrot.lane.b32.xlu1 %v1027_v10, %s1169_s12  ;;  %v314_v25 = vrot.slane %v261_v12, 1  ;;  %v372_v26 = vrot.slane %v261_v12, 2  ;;  %v359_v27 = vrot.slane %v1344_v14, 2  ;;  %946 = vmatprep.subr.bf16.mxu1 %v1165_v0  ;;  %v301_v29 = vrot.slane %v1344_v14, 1 }
  0x22   : > { %1023 = vrot.lane.b32.xlu0 %v1022_v5, %s1169_s12  ;;  %v302_v30 = vrot.slane %v253_v21, 1  ;;  %v360_v31 = vrot.slane %v253_v21, 2  ;;  %730 = vmatpush1.bf16.msra.mxu0 %v1137_v17  ;;  %v1047_v34 = vpack.i.bf16 %v1330_v4, %v1241_v7  ;;  %v1391_v35 = vunpack.c.l.bf16 %v242_v23 }
  0x23   : > { %v1381_v32 = vsel %vm349_vm0, %v371_v22, %v372_v26  ;;  %955 = vmatpush1.bf16.msra.mxu1 %v1137_v17  ;;  %v263_v36 = vunpack.c.l.bf16 %v1376_v28  ;;  %v1042_v37 = vpack.i.bf16 %v1344_v14, %v1243_v9  ;;  %v315_v38 = vsel %vm291_vm1, %v313_v24, %v314_v25  ;;  %731 = vmatprep.subr.bf16.mxu0 %v1165_v0  ;;  %v1139_v9 = vld [vmem:[%s1567_s1] sm:$0xff]  }
  0x24   : > { %601 = vst.msk [vmem:[#allocation2 + $0x58] sm:$0xff] %vm266_vm2, %v1381_v32  ;;  %v1399_v39 = vsel %vm349_vm0, %v359_v27, %v360_v31  ;;  %v303_v7 = vsel %vm291_vm1, %v301_v29, %v302_v30  ;;  %v478_v41 = vrot.slane %v1391_v35, 2  ;;  %v1409_v43 = vunpack.c.h.bf16 %v242_v23  ;;  %947 = vmatprep.subr.bf16.mxu1 %v1165_v0 }
  0x25   : > { %1038 = vrot.lane.b32.xlu1 %v1037_v19, %s1170_s19  ;;  %597 = vst.msk [vmem:[#allocation2 + $0x18] sm:$0xff] %vm266_vm2, %v1399_v39  ;;  %v479_v42 = vrot.slane %v263_v36, 2  ;;  %v1057_v44 = vpack.i.bf16 %v315_v38, %v1326_v1  ;;  %v265_v48 = vunpack.c.l.bf16 %v1402_v40  ;;  %v1052_v49 = vpack.i.bf16 %v303_v7, %v1338_v11 }
  0x26   : > { %1033 = vrot.lane.b32.xlu0 %v1032_v20, %s1170_s19  ;;  %732 = vmatpush1.bf16.msra.mxu0 %v1138_v33  ;;  %v585_v46 = vrot.slane %v1409_v43, 2  ;;  %v613_v50 = vld [vmem:[#allocation2 + $0x48] sm:$0xff]  ;;  %v1077_v61 = vpack.i.bf16 %v1381_v32, %v1341_v13  ;;  %v1072_v62 = vpack.i.bf16 %v1399_v39, %v1353_v16  ;;  %v443_v63 = vrot.slane %v263_v36, 1 }
  0x27   : > { %956 = vmatpush1.bf16.msra.mxu1 %v1138_v33  ;;  %v480_v45 = vsel %vm349_vm0, %v478_v41, %v479_v42  ;;  %733 = vmatprep.subr.bf16.mxu0 %v1165_v0  ;;  %v586_v51 = vrot.slane %v265_v48, 2  ;;  %v605_v54 = vld [vmem:[#allocation2 + $0x8] sm:$0xff]  ;;  %v1087_v1 = vpack.i.bf16 %v1391_v35, %v1330_v4  ;;  %v1082_v2 = vpack.i.bf16 %v1254_v18, %v1344_v14 }
  0x28   : > { %602 = vst.msk [vmem:[#allocation2 + $0x68] sm:$0xff] %vm266_vm2, %v480_v45  ;;  %948 = vmatprep.subr.bf16.mxu1 %v1165_v0  ;;  %v1092_v10 = vpack.i.bf16 %v1307_v52, %v303_v7  ;;  %v1107_v11 = vpack.i.bf16 %v480_v45, %v1381_v32  ;;  %v1102_v4 = vpack.i.bf16 %v1296_v47, %v1399_v39  ;;  %v549_v13 = vrot.slane %v1409_v43, 1 }
  0x29   : > { %1048 = vrot.lane.b32.xlu1 %v1047_v34, %s1171_s22  ;;  %v587_v56 = vsel %vm349_vm0, %v585_v46, %v586_v51  ;;  %v550_v14 = vrot.slane %v265_v48, 1  ;;  %v1117_v15 = vpack.i.bf16 %v1409_v43, %v1391_v35  ;;  %v1112_v52 = vpack.i.bf16 %v1239_v6, %v1254_v18 }
  0x2a   : > { %1043 = vrot.lane.b32.xlu0 %v1042_v37, %s1171_s22  ;;  %734 = vmatpush1.bf16.msra.mxu0 %v1139_v9  ;;  %603 = vst.msk [vmem:[#allocation2 + $0x78] sm:$0xff] %vm266_vm2, %v587_v56 }
  0x2b   : > { %957 = vmatpush1.bf16.msra.mxu1 %v1139_v9  ;;  %v615_v55 = vld [vmem:[#allocation2 + $0x58] sm:$0xff]  ;;  %749 = vmatprep.subr.bf16.mxu0 %v1165_v0  ;;  %v551_v5 = vsel %vm291_vm1, %v549_v13, %v550_v14 }
  0x2c   : > { %v625_v57 = vpack.c.bf16 %v615_v55, %v613_v50  ;;  %949 = vmatprep.subr.bf16.mxu1 %v1165_v0  ;;  %v607_v58 = vld [vmem:[#allocation2 + $0x18] sm:$0xff]  ;;  %v442_v0 = vrot.slane %v1391_v35, 1 }
  0x2d   : > { %1058 = vrot.lane.b32.xlu1 %v1057_v44, %s1172_s25  ;;  %v621_v60 = vpack.c.bf16 %v607_v58, %v605_v54 }
  0x2e   : > { %1053 = vrot.lane.b32.xlu0 %v1052_v49, %s1172_s25  ;;  %935 = vmatprep.mubr.msk.bf16.mxu1 %vm266_vm2, %v625_v57  ;;  %v444_v3 = vsel %vm291_vm1, %v442_v0, %v443_v63 }
  0x2f   : > { %750 = vmatpush2.bf16.msra.mxu0 %v1140_v53  ;;  %958 = vmatpush2.bf16.msra.mxu1 %v1140_v53  ;;  %v1097_v8 = vpack.i.bf16 %v444_v3, %v315_v38  ;;  %v1127_v16 = vpack.i.bf16 %v551_v5, %v444_v3 }
  0x30   : > { %933 = vmatprep.mubr.msk.bf16.mxu0 %vm266_vm2, %v621_v60 }
  0x31   : > { %1068 = vrot.lane.b32.xlu1 %v1057_v44, %s1168_s7  ;;  %v619_v0 = vld [vmem:[#allocation2 + $0x78] sm:$0xff] }
  0x32   : > { %1063 = vrot.lane.b32.xlu0 %v1052_v49, %s1168_s7  ;;  %s1539_s7 = scalar_lea.vmem %s1570_s4, %s940_s30 }
  0x35   : > { %1078 = vrot.lane.b32.xlu1 %v1077_v61, %s1167_s6 }
  0x36   : > { %1073 = vrot.lane.b32.xlu0 %v1072_v62, %s1167_s6  ;;  %v617_v62 = vld [vmem:[#allocation2 + $0x68] sm:$0xff] }
  0x39   : > { %1088 = vrot.lane.b32.xlu1 %v1087_v1, %s1166_s27  ;;  %v609_v1 = vld [vmem:[#allocation2 + $0x28] sm:$0xff] }
  0x3a   : > { %1083 = vrot.lane.b32.xlu0 %v1082_v2, %s1166_s27  ;;  %v611_v2 = vld [vmem:[#allocation2 + $0x38] sm:$0xff] }
  0x3d   : > { %1098 = vrot.lane.b32.xlu1 %v1097_v8, %s1169_s12 }
  0x3e   : > { %1093 = vrot.lane.b32.xlu0 %v1092_v10, %s1169_s12 }
  0x41   : > { %1108 = vrot.lane.b32.xlu1 %v1107_v11, %s1170_s19 }
  0x42   : > { %1103 = vrot.lane.b32.xlu0 %v1102_v4, %s1170_s19 }
  0x45   : > { %1118 = vrot.lane.b32.xlu1 %v1117_v15, %s1171_s22  ;;  %v627_v15 = vpack.c.bf16 %v619_v0, %v617_v62 }
  0x46   : > { %1113 = vrot.lane.b32.xlu0 %v1112_v52, %s1171_s22 }
  0x49   : > { %1128 = vrot.lane.b32.xlu1 %v1127_v16, %s1172_s25 }
  0x4a   : > { %1123 = vrot.lane.b32.xlu0 %v1318_v59, %s1172_s25 }
  0x87   : > { %v999_v47 = vpop.permute.xlu1 %998 }
  0x88   : > { %v994_v12 = vpop.permute.xlu0 %993  ;;  %v1001_v29 = vunpack.i.h.bf16 %v999_v47  ;;  %v1000_v30 = vunpack.i.l.bf16 %v999_v47  ;;  %v623_v47 = vpack.c.bf16 %v611_v2, %v609_v1 }
  0x89   : > { %v996_v22 = vunpack.i.h.bf16 %v994_v12  ;;  %v995_v23 = vunpack.i.l.bf16 %v994_v12 }
  0x8b   : > { %v1014_v17 = vpop.permute.xlu1 %1013 }
  0x8c   : > { %v1016_v19 = vunpack.i.h.bf16 %v1014_v17  ;;  %v1015_v20 = vunpack.i.l.bf16 %v1014_v17  ;;  %v1004_v21 = vpop.permute.xlu0 %1003 }
  0x8d   : > { %v1006_v6 = vunpack.i.h.bf16 %v1004_v21  ;;  %v1005_v18 = vunpack.i.l.bf16 %v1004_v21 }
  0x8f   : > { %342 = vst.msk [vmem:[#allocation2 + $0x10] sm:$0xff] %vm340_vm3, %v1006_v6  ;;  %341 = vst.msk [vmem:[#allocation2] sm:$0xff] %vm340_vm3, %v1005_v18  ;;  %v1019_v24 = vpop.permute.xlu1 %1018 }
  0x90   : > { %400 = vst.msk [vmem:[#allocation2 + $0x10] sm:$0xff] %vm398_vm4, %v1016_v19  ;;  %399 = vst.msk [vmem:[#allocation2] sm:$0xff] %vm398_vm4, %v1015_v20  ;;  %v1021_v59 = vunpack.i.h.bf16 %v1019_v24  ;;  %v1020_v25 = vunpack.i.l.bf16 %v1019_v24  ;;  %v1009_v26 = vpop.permute.xlu0 %1008 }
  0x91   : > { %v1011_v27 = vunpack.i.h.bf16 %v1009_v26  ;;  %v1010_v28 = vunpack.i.l.bf16 %v1009_v26  ;;  %433 = vst.msk [vmem:[#allocation2] sm:$0xff] %vm432_vm5, %v995_v23  ;;  %434 = vst.msk [vmem:[#allocation2 + $0x10] sm:$0xff] %vm432_vm5, %v996_v22 }
  0x93   : > { %346 = vst.msk [vmem:[#allocation2 + $0x50] sm:$0xff] %vm340_vm3, %v1011_v27  ;;  %345 = vst.msk [vmem:[#allocation2 + $0x40] sm:$0xff] %vm340_vm3, %v1010_v28  ;;  %v1029_v31 = vpop.permute.xlu1 %1028 }
  0x94   : > { %404 = vst.msk [vmem:[#allocation2 + $0x50] sm:$0xff] %vm398_vm4, %v1021_v59  ;;  %403 = vst.msk [vmem:[#allocation2 + $0x40] sm:$0xff] %vm398_vm4, %v1020_v25  ;;  %v1031_v32 = vunpack.i.h.bf16 %v1029_v31  ;;  %v1030_v33 = vunpack.i.l.bf16 %v1029_v31  ;;  %v1024_v34 = vpop.permute.xlu0 %1023 }
  0x95   : > { %437 = vst.msk [vmem:[#allocation2 + $0x40] sm:$0xff] %vm432_vm5, %v1000_v30  ;;  %438 = vst.msk [vmem:[#allocation2 + $0x50] sm:$0xff] %vm432_vm5, %v1001_v29  ;;  %v1026_v35 = vunpack.i.h.bf16 %v1024_v34  ;;  %v1025_v36 = vunpack.i.l.bf16 %v1024_v34 }
  0x96   : > { %474 = vst.msk [vmem:[#allocation2 + $0x40] sm:$0xff] %vm469_vm6, %v1030_v33  ;;  %475 = vst.msk [vmem:[#allocation2 + $0x50] sm:$0xff] %vm469_vm6, %v1031_v32 }
  0x97   : > { %470 = vst.msk [vmem:[#allocation2] sm:$0xff] %vm469_vm6, %v1025_v36  ;;  %471 = vst.msk [vmem:[#allocation2 + $0x10] sm:$0xff] %vm469_vm6, %v1026_v35  ;;  %v1039_v37 = vpop.permute.xlu1 %1038 }
  0x98   : > { %v1041_v38 = vunpack.i.h.bf16 %v1039_v37  ;;  %v1040_v39 = vunpack.i.l.bf16 %v1039_v37  ;;  %v1034_v40 = vpop.permute.xlu0 %1033 }
  0x99   : > { %v1036_v7 = vunpack.i.h.bf16 %v1034_v40  ;;  %v1035_v41 = vunpack.i.l.bf16 %v1034_v40 }
  0x9a   : > { %510 = vst.msk [vmem:[#allocation2 + $0x40] sm:$0xff] %vm505_vm7, %v1040_v39  ;;  %511 = vst.msk [vmem:[#allocation2 + $0x50] sm:$0xff] %vm505_vm7, %v1041_v38 }
  0x9b   : > { %506 = vst.msk [vmem:[#allocation2] sm:$0xff] %vm505_vm7, %v1035_v41  ;;  %507 = vst.msk [vmem:[#allocation2 + $0x10] sm:$0xff] %vm505_vm7, %v1036_v7  ;;  %v1049_v42 = vpop.permute.xlu1 %1048 }
  0x9c   : > { %v1051_v43 = vunpack.i.h.bf16 %v1049_v42  ;;  %v1050_v9 = vunpack.i.l.bf16 %v1049_v42  ;;  %v1044_v44 = vpop.permute.xlu0 %1043 }
  0x9d   : > { %v1046_v45 = vunpack.i.h.bf16 %v1044_v44  ;;  %v1045_v46 = vunpack.i.l.bf16 %v1044_v44 }
  0x9e   : > { %544 = vst.msk [vmem:[#allocation2 + $0x40] sm:$0xff] %vm539_vm8, %v1050_v9  ;;  %545 = vst.msk [vmem:[#allocation2 + $0x50] sm:$0xff] %vm539_vm8, %v1051_v43 }
  0x9f   : > { %540 = vst.msk [vmem:[#allocation2] sm:$0xff] %vm539_vm8, %v1045_v46  ;;  %541 = vst.msk [vmem:[#allocation2 + $0x10] sm:$0xff] %vm539_vm8, %v1046_v45  ;;  %v1059_v48 = vpop.permute.xlu1 %1058 }
  0xa0   : > { %v1061_v49 = vunpack.i.h.bf16 %v1059_v48  ;;  %v1060_v50 = vunpack.i.l.bf16 %v1059_v48  ;;  %v1054_v51 = vpop.permute.xlu0 %1053 }
  0xa1   : > { %v1056_v53 = vunpack.i.h.bf16 %v1054_v51  ;;  %v1055_v54 = vunpack.i.l.bf16 %v1054_v51  ;;  %v937_v51 = vld [vmem:[%s1569_s3] ss:$0 sm:$0xff] }
  0xa2   : > { %581 = vst.msk [vmem:[#allocation2 + $0x40] sm:$0xff] %vm576_vm9, %v1060_v50  ;;  %582 = vst.msk [vmem:[#allocation2 + $0x50] sm:$0xff] %vm576_vm9, %v1061_v49  ;;  %v923_v50 = vld [vmem:[%s1568_s2] ss:$0 sm:$0xff] }
  0xa3   : > { %577 = vst.msk [vmem:[#allocation2] sm:$0xff] %vm576_vm9, %v1055_v54  ;;  %578 = vst.msk [vmem:[#allocation2 + $0x10] sm:$0xff] %vm576_vm9, %v1056_v53  ;;  %v1069_v55 = vpop.permute.xlu1 %1068 }
  0xa4   : > { %v1071_v56 = vunpack.i.h.bf16 %v1069_v55  ;;  %v1070_v57 = vunpack.i.l.bf16 %v1069_v55  ;;  %v1064_v58 = vpop.permute.xlu0 %1063 }
  0xa5   : > { %v1066_v60 = vunpack.i.h.bf16 %v1064_v58  ;;  %v1065_v61 = vunpack.i.l.bf16 %v1064_v58 }
  0xa6   : > { %348 = vst.msk [vmem:[#allocation2 + $0x70] sm:$0xff] %vm340_vm3, %v1071_v56  ;;  %347 = vst.msk [vmem:[#allocation2 + $0x60] sm:$0xff] %vm340_vm3, %v1070_v57 }
  0xa7   : > { %344 = vst.msk [vmem:[#allocation2 + $0x30] sm:$0xff] %vm340_vm3, %v1066_v60  ;;  %343 = vst.msk [vmem:[#allocation2 + $0x20] sm:$0xff] %vm340_vm3, %v1065_v61  ;;  %v1079_v63 = vpop.permute.xlu1 %1078 }
  0xa8   : > { %v1081_v3 = vunpack.i.h.bf16 %v1079_v63  ;;  %v1080_v8 = vunpack.i.l.bf16 %v1079_v63  ;;  %v1074_v10 = vpop.permute.xlu0 %1073 }
  0xa9   : > { %v1076_v11 = vunpack.i.h.bf16 %v1074_v10  ;;  %v1075_v4 = vunpack.i.l.bf16 %v1074_v10  ;;  %v612_v13 = vld [vmem:[#allocation2 + $0x40] sm:$0xff]  ;;  %v614_v14 = vld [vmem:[#allocation2 + $0x50] sm:$0xff] }
  0xaa   : > { %405 = vst.msk [vmem:[#allocation2 + $0x60] sm:$0xff] %vm398_vm4, %v1080_v8  ;;  %406 = vst.msk [vmem:[#allocation2 + $0x70] sm:$0xff] %vm398_vm4, %v1081_v3  ;;  %v604_v52 = vld [vmem:[#allocation2] sm:$0xff]  ;;  %v606_v5 = vld [vmem:[#allocation2 + $0x10] sm:$0xff]  ;;  %v624_v16 = vpack.c.bf16 %v614_v14, %v612_v13 }
  0xab   : > { %401 = vst.msk [vmem:[#allocation2 + $0x20] sm:$0xff] %vm398_vm4, %v1075_v4  ;;  %402 = vst.msk [vmem:[#allocation2 + $0x30] sm:$0xff] %vm398_vm4, %v1076_v11  ;;  %v1089_v12 = vpop.permute.xlu1 %1088  ;;  %v620_v17 = vpack.c.bf16 %v606_v5, %v604_v52 }
  0xac   : > { %v1091_v19 = vunpack.i.h.bf16 %v1089_v12  ;;  %v1090_v20 = vunpack.i.l.bf16 %v1089_v12  ;;  %v1084_v21 = vpop.permute.xlu0 %1083  ;;  %768 = vmatmul.mubr.bf16.vlgmr.msra.gmra.mxu1 %v624_v16 }
  0xad   : > { %v1086_v6 = vunpack.i.h.bf16 %v1084_v21  ;;  %v1085_v18 = vunpack.i.l.bf16 %v1084_v21  ;;  %752 = vmatmul.mubr.bf16.vlgmr.msra.gmra.mxu0 %v620_v17  ;;  %936 = vmatprep.mubr.msk.bf16.mxu1 %vm266_vm2, %v627_v15 }
  0xae   : > { %439 = vst.msk [vmem:[#allocation2 + $0x60] sm:$0xff] %vm432_vm5, %v1090_v20  ;;  %440 = vst.msk [vmem:[#allocation2 + $0x70] sm:$0xff] %vm432_vm5, %v1091_v19  ;;  %934 = vmatprep.mubr.msk.bf16.mxu0 %vm266_vm2, %v623_v47 }
  0xaf   : > { %435 = vst.msk [vmem:[#allocation2 + $0x20] sm:$0xff] %vm432_vm5, %v1085_v18  ;;  %436 = vst.msk [vmem:[#allocation2 + $0x30] sm:$0xff] %vm432_vm5, %v1086_v6  ;;  %v1099_v22 = vpop.permute.xlu1 %1098 }
  0xb0   : > { %v1101_v23 = vunpack.i.h.bf16 %v1099_v22  ;;  %v1100_v24 = vunpack.i.l.bf16 %v1099_v22  ;;  %v1094_v59 = vpop.permute.xlu0 %1093 }
  0xb1   : > { %v1096_v25 = vunpack.i.h.bf16 %v1094_v59  ;;  %v1095_v26 = vunpack.i.l.bf16 %v1094_v59 }
  0xb2   : > { %476 = vst.msk [vmem:[#allocation2 + $0x60] sm:$0xff] %vm469_vm6, %v1100_v24  ;;  %477 = vst.msk [vmem:[#allocation2 + $0x70] sm:$0xff] %vm469_vm6, %v1101_v23 }
  0xb3   : > { %472 = vst.msk [vmem:[#allocation2 + $0x20] sm:$0xff] %vm469_vm6, %v1095_v26  ;;  %473 = vst.msk [vmem:[#allocation2 + $0x30] sm:$0xff] %vm469_vm6, %v1096_v25  ;;  %v1109_v27 = vpop.permute.xlu1 %1108 }
  0xb4   : > { %v1111_v28 = vunpack.i.h.bf16 %v1109_v27  ;;  %v1110_v29 = vunpack.i.l.bf16 %v1109_v27  ;;  %v1104_v30 = vpop.permute.xlu0 %1103 }
  0xb5   : > { %v1106_v31 = vunpack.i.h.bf16 %v1104_v30  ;;  %v1105_v32 = vunpack.i.l.bf16 %v1104_v30 }
  0xb6   : > { %512 = vst.msk [vmem:[#allocation2 + $0x60] sm:$0xff] %vm505_vm7, %v1110_v29  ;;  %513 = vst.msk [vmem:[#allocation2 + $0x70] sm:$0xff] %vm505_vm7, %v1111_v28 }
  0xb7   : > { %508 = vst.msk [vmem:[#allocation2 + $0x20] sm:$0xff] %vm505_vm7, %v1105_v32  ;;  %509 = vst.msk [vmem:[#allocation2 + $0x30] sm:$0xff] %vm505_vm7, %v1106_v31  ;;  %v1119_v33 = vpop.permute.xlu1 %1118 }
  0xb8   : > { %v1121_v34 = vunpack.i.h.bf16 %v1119_v33  ;;  %v1120_v35 = vunpack.i.l.bf16 %v1119_v33  ;;  %v1114_v36 = vpop.permute.xlu0 %1113 }
  0xb9   : > { %v1116_v37 = vunpack.i.h.bf16 %v1114_v36  ;;  %v1115_v38 = vunpack.i.l.bf16 %v1114_v36 }
  0xba   : > { %546 = vst.msk [vmem:[#allocation2 + $0x60] sm:$0xff] %vm539_vm8, %v1120_v35  ;;  %547 = vst.msk [vmem:[#allocation2 + $0x70] sm:$0xff] %vm539_vm8, %v1121_v34 }
  0xbb   : > { %542 = vst.msk [vmem:[#allocation2 + $0x20] sm:$0xff] %vm539_vm8, %v1115_v38  ;;  %543 = vst.msk [vmem:[#allocation2 + $0x30] sm:$0xff] %vm539_vm8, %v1116_v37  ;;  %v1129_v39 = vpop.permute.xlu1 %1128 }
  0xbc   : > { %v1131_v40 = vunpack.i.h.bf16 %v1129_v39  ;;  %v1130_v7 = vunpack.i.l.bf16 %v1129_v39  ;;  %v1124_v41 = vpop.permute.xlu0 %1123 }
  0xbd   : > { %v1126_v42 = vunpack.i.h.bf16 %v1124_v41  ;;  %v1125_v43 = vunpack.i.l.bf16 %v1124_v41 }
  0xbe   : > { %583 = vst.msk [vmem:[#allocation2 + $0x60] sm:$0xff] %vm576_vm9, %v1130_v7  ;;  %584 = vst.msk [vmem:[#allocation2 + $0x70] sm:$0xff] %vm576_vm9, %v1131_v40 }
  0xbf   : > { %579 = vst.msk [vmem:[#allocation2 + $0x20] sm:$0xff] %vm576_vm9, %v1125_v43  ;;  %580 = vst.msk [vmem:[#allocation2 + $0x30] sm:$0xff] %vm576_vm9, %v1126_v42 }
  0xc5   : > { %v616_v9 = vld [vmem:[#allocation2 + $0x60] sm:$0xff]  ;;  %v618_v44 = vld [vmem:[#allocation2 + $0x70] sm:$0xff] }
  0xc6   : > { %v608_v45 = vld [vmem:[#allocation2 + $0x20] sm:$0xff]  ;;  %v610_v46 = vld [vmem:[#allocation2 + $0x30] sm:$0xff]  ;;  %v626_v48 = vpack.c.bf16 %v618_v44, %v616_v9 }
  0xc7   : > { %v622_v49 = vpack.c.bf16 %v610_v46, %v608_v45 }
  0xc8   : > { %776 = vmatmul.mubr.bf16.gmra.mxu1 %v626_v48 }
  0xc9   : > { %760 = vmatmul.mubr.bf16.gmra.mxu0 %v622_v49 }
 0x16c   : > { %v769_v53 = vpop.f32.mrf.mxu1 }
 0x16d   : > { %v753_v54 = vpop.f32.mrf.mxu0  ;;  %v770_v55 = vadd.f32 %v923_v50, %v769_v53 }
 0x16e   : > { %v754_v56 = vadd.f32 %v923_v50, %v753_v54  ;;  %v771_v57 = vpop.f32.mrf.mxu1 }
 0x16f   : > { %vm789_vm10 = vcmp.gt.f32.partialorder %v770_v55, 0.0  ;;  %v803_v58 = vmul.f32 %v937_v51, %v770_v55  ;;  %v755_v60 = vpop.f32.mrf.mxu0 }
 0x170   : > { %vm785_vm11 = vcmp.gt.f32.partialorder %v754_v56, 0.0  ;;  %v799_v61 = vmul.f32 %v937_v51, %v754_v56  ;;  %v772_v62 = vpop.f32.mrf.mxu1 }
 0x171   : > { %v811_v0 = vsel %vm789_vm10, %v770_v55, %v803_v58  ;;  %v756_v63 = vpop.f32.mrf.mxu0  ;;  %v773_v1 = vadd.f32 %v923_v50, %v772_v62 }
 0x172   : > { %v807_v2 = vsel %vm785_vm11, %v754_v56, %v799_v61  ;;  %v819_v3 = vpack.c.bf16 %v811_v0, %v811_v0  ;;  %v757_v8 = vadd.f32 %v923_v50, %v756_v63  ;;  %v774_v10 = vpop.f32.mrf.mxu1 }
 0x173   : > { %v815_v11 = vpack.c.bf16 %v807_v2, %v807_v2  ;;  %vm790_vm13 = vcmp.gt.f32.partialorder %v773_v1, 0.0  ;;  %v804_v4 = vmul.f32 %v937_v51, %v773_v1  ;;  %v758_v13 = vpop.f32.mrf.mxu0 }
 0x174   : > { %828 = vst.msk [vmem:[%s1539_s7 + $0x10] sm:$0xf] %vm823_vm12, %v819_v3  ;;  %vm786_vm14 = vcmp.gt.f32.partialorder %v757_v8, 0.0  ;;  %v800_v14 = vmul.f32 %v937_v51, %v757_v8 }
 0x175   : > { %824 = vst.msk [vmem:[%s1539_s7] sm:$0xf] %vm823_vm12, %v815_v11  ;;  %v812_v15 = vsel %vm790_vm13, %v773_v1, %v804_v4 }
 0x176   : > { %v808_v52 = vsel %vm786_vm14, %v757_v8, %v800_v14  ;;  %v820_v5 = vpack.c.bf16 %v812_v15, %v812_v15 }
 0x177   : > { %v816_v16 = vpack.c.bf16 %v808_v52, %v808_v52 }
 0x178   : > { %829 = vst.msk [vmem:[%s1539_s7 + $0x14] sm:$0xf] %vm823_vm12, %v820_v5 }
 0x179   : > { %825 = vst.msk [vmem:[%s1539_s7 + $0x4] sm:$0xf] %vm823_vm12, %v816_v16 }
 0x188   : > { %v777_v47 = vpop.f32.mrf.mxu1 }
 0x189   : > { %v761_v12 = vpop.f32.mrf.mxu0  ;;  %v778_v17 = vadd.f32 %v923_v50, %v777_v47 }
 0x18a   : > { %v762_v19 = vadd.f32 %v923_v50, %v761_v12  ;;  %v779_v20 = vpop.f32.mrf.mxu1 }
 0x18b   : > { %vm791_vm15 = vcmp.gt.f32.partialorder %v778_v17, 0.0  ;;  %v805_v21 = vmul.f32 %v937_v51, %v778_v17  ;;  %v763_v6 = vpop.f32.mrf.mxu0 }
 0x18c   : > { %vm787_vm0 = vcmp.gt.f32.partialorder %v762_v19, 0.0  ;;  %v801_v18 = vmul.f32 %v937_v51, %v762_v19  ;;  %v780_v22 = vpop.f32.mrf.mxu1 }
 0x18d   : > { %v813_v23 = vsel %vm791_vm15, %v778_v17, %v805_v21  ;;  %v764_v24 = vpop.f32.mrf.mxu0  ;;  %v781_v59 = vadd.f32 %v923_v50, %v780_v22 }
 0x18e   : > { %v809_v25 = vsel %vm787_vm0, %v762_v19, %v801_v18  ;;  %v821_v26 = vpack.c.bf16 %v813_v23, %v813_v23  ;;  %v765_v27 = vadd.f32 %v923_v50, %v764_v24  ;;  %v782_v28 = vpop.f32.mrf.mxu1 }
 0x18f   : > { %v817_v29 = vpack.c.bf16 %v809_v25, %v809_v25  ;;  %vm792_vm1 = vcmp.gt.f32.partialorder %v781_v59, 0.0  ;;  %v806_v30 = vmul.f32 %v937_v51, %v781_v59  ;;  %v766_v31 = vpop.f32.mrf.mxu0 }
 0x190   : > { %830 = vst.msk [vmem:[%s1539_s7 + $0x18] sm:$0xf] %vm823_vm12, %v821_v26  ;;  %vm788_vm2 = vcmp.gt.f32.partialorder %v765_v27, 0.0  ;;  %v802_v32 = vmul.f32 %v937_v51, %v765_v27 }
 0x191   : > { %826 = vst.msk [vmem:[%s1539_s7 + $0x8] sm:$0xf] %vm823_vm12, %v817_v29  ;;  %v814_v33 = vsel %vm792_vm1, %v781_v59, %v806_v30 }
 0x192   : > { %v810_v34 = vsel %vm788_vm2, %v765_v27, %v802_v32  ;;  %v822_v35 = vpack.c.bf16 %v814_v33, %v814_v33 }
 0x193   : > { %v818_v36 = vpack.c.bf16 %v810_v34, %v810_v34 }
 0x194   : > { %831 = vst.msk [vmem:[%s1539_s7 + $0x1c] sm:$0xf] %vm823_vm12, %v822_v35 }
 0x195   : > { %827 = vst.msk [vmem:[%s1539_s7 + $0xc] sm:$0xf] %vm823_vm12, %v818_v36 }
 0x196 PF: > { %s14_s17 = sadd.s32 1, %s1163_s17   ;;  %s1571_s15 = smov %s1159_s16 }
 0x197   : > { %p11_p5 = scmp.ge.s32.totalorder %s14_s17, 4   ;;  %s1572_s16 = smov %s1574_s18 }
 0x199   :  { %13 = sbr.rel (!%p11_p5) target bundleno = 2 (0x2), region = 67 }

// kernel: tile.6
= control target key start
LH: loop header
LB: loop body
LE: loop exit
PB: predicated region body
PF: predicated region fallthrough
CT: control target
= control target key end

     0   :  { %s20_s0 = inlined_call_operand.<no memory space> [shape: f32[], index: 0, kind: input, shape index: {}]   ;;  %s21_s1 = inlined_call_operand.vmem [shape: f32[1,128], index: 1, kind: output, shape index: {}]  }
   0x1   :  { %v2_v0 = vstv %s20_s0 }
   0x2   :  { %3 = vst [vmem:[%s21_s1] sm:$0x1] %v2_v0 }

// kernel: _lambda_.13
= control target key start
LH: loop header
LB: loop body
LE: loop exit
PB: predicated region body
PF: predicated region fallthrough
CT: control target
= control target key end

     0   :  { %s474_s15 = smov 0   ;;  %s476_s16 = smov 0   ;;  %s513_s0 = inlined_call_operand.vmem [shape: bf16[2,8,128], index: 0, kind: input, shape index: {}]   ;;  %s514_s1 = inlined_call_operand.vmem [shape: bf16[2,8,128], index: 1, kind: input, shape index: {}]   ;;  %s515_s2 = inlined_call_operand.vmem [shape: f32[2,1,128], index: 2, kind: input, shape index: {}]   ;;  %s516_s3 = inlined_call_operand.vmem [shape: f32[1,128], index: 3, kind: input, shape index: {}]   ;;  %s517_s4 = inlined_call_operand.vmem [shape: bf16[2,8,128], index: 4, kind: output, shape index: {}]  }
   0x1   :  { %s478_s17 = smov 0  }
   0x2 LB: > { %s26_s18 = sadd.s32 1, %s443_s16  ;;  %p393_p0 = scmp.ge.s32.totalorder %s447_s17, 1  ;;  %s447_s17 = sphi %s478_s17, %s14_s17   ;;  %s443_s16 = sphi %s476_s16, %s519_s16   ;;  %s439_s15 = sphi %s474_s15, %s518_s15  }
   0x3   : > { %p28_p1 = scmp.ge.s32.totalorder %s26_s18, 2  ;;  %p202_p2 = scmp.lt.s32.totalorder %s447_s17, 3 }
   0x5   : > { %s521_s18 = smov (%p28_p1, %s26_s18), 0  ;;  %p203_p3 = pnand %p393_p0, %p202_p2 }
   0x6   : > { %p242_p4 = scmp.lt.s32.totalorder (!%p203_p3), %s439_s15, 1 }
   0x7   : > { %206 = sbr.rel (%p203_p3) target bundleno = 28 (0x1c), region = 36 }
   0xc   : > { %s523_s15 = smov (!%p242_p4, %s439_s15), 1  ;;  %v398_v6 = vld [vmem:[%s516_s3] ss:$0 sm:$0xff] }
   0xd   : > { %s394_s19 = sshll.u32 %s523_s15, 2  ;;  %s258_s22 = scalar_lea.vmem %s515_s2, %s523_s15 }
   0xe   : > { %s248_s25 = scalar_lea.vmem %s513_s0, %s394_s19  ;;  %s255_s28 = scalar_lea.vmem %s514_s1, %s394_s19  ;;  %v397_v1 = vld [vmem:[%s258_s22] ss:$0 sm:$0xff] }
   0xf   : > { %v266_v0 = vld [vmem:[%s248_s25] sm:$0xf]  ;;  %s265_s7 = scalar_lea.vmem %s517_s4, %s394_s19 }
  0x10   : > { %v276_v2 = vld [vmem:[%s255_s28] sm:$0xf]  ;;  %v267_v3 = vunpack.c.l.bf16 %v266_v0 }
  0x11   : > { %v277_v4 = vunpack.c.l.bf16 %v276_v2 }
  0x12   : > { %v275_v5 = vmul.f32 %v397_v1, %v267_v3 }
  0x14   : > { %v278_v7 = vadd.f32 %v277_v4, %v275_v5 }
  0x16   : > { %vm280_vm0 = vcmp.gt.f32.partialorder %v278_v7, 0.0  ;;  %v287_v8 = vmul.f32 %v398_v6, %v278_v7 }
  0x18   : > { %v288_v9 = vsel %vm280_vm0, %v278_v7, %v287_v8 }
  0x19   : > { %v289_v10 = vpack.c.bf16 %v288_v9, %v288_v9 }
  0x1b   : > { %290 = vst [vmem:[%s265_s7] sm:$0xf] %v289_v10 }
  0x1c PF: > { %s14_s17 = sadd.s32 1, %s447_s17   ;;  %s518_s15 = smov %s443_s16 }
  0x1d   : > { %p11_p5 = scmp.ge.s32.totalorder %s14_s17, 4   ;;  %s519_s16 = smov %s521_s18 }
  0x1f   :  { %13 = sbr.rel (!%p11_p5) target bundleno = 2 (0x2), region = 72 }

// kernel: _lambda_.12
= control target key start
LH: loop header
LB: loop body
LE: loop exit
PB: predicated region body
PF: predicated region fallthrough
CT: control target
= control target key end

     0   :  { %s1134_s12 = smov 0   ;;  %s1136_s13 = smov 0   ;;  %s1499_s0 = inlined_call_operand.vmem [shape: bf16[2,10,10,16], index: 0, kind: input, shape index: {}]   ;;  %s1500_s1 = inlined_call_operand.vmem [shape: bf16[144,16], index: 1, kind: input, shape index: {}]   ;;  %s1501_s2 = inlined_call_operand.vmem [shape: f32[1,16], index: 2, kind: input, shape index: {}]   ;;  %s1502_s3 = inlined_call_operand.vmem [shape: bf16[2,8,8,16], index: 3, kind: output, shape index: {}]  }
   0x1   :  { %s1138_s14 = smov 0  }
   0x2 LB: > { %s25_s15 = sadd.s32 1, %s1100_s13  ;;  %p861_p0 = scmp.ge.s32.totalorder %s1104_s14, 1  ;;  %s1104_s14 = sphi %s1138_s14, %s13_s14   ;;  %s1100_s13 = sphi %s1136_s13, %s1504_s13   ;;  %s1096_s12 = sphi %s1134_s12, %s1503_s12  }
   0x3   : > { %p27_p1 = scmp.ge.s32.totalorder %s25_s15, 2  ;;  %p151_p2 = scmp.lt.s32.totalorder %s1104_s14, 3 }
   0x5   : > { %s1506_s15 = smov (%p27_p1, %s25_s15), 0  ;;  %p152_p3 = pnand %p861_p0, %p151_p2 }
   0x6   : > { %p179_p4 = scmp.lt.s32.totalorder (!%p152_p3), %s1096_s12, 1  ;;  %s1107_s24 = smov (!%p152_p3), 48  }
   0x7   : > { %155 = sbr.rel (%p152_p3) target bundleno = 403 (0x193), region = 32  ;;  %s1108_s29 = smov (!%p152_p3), 32  }
   0x8   : > { %s1109_s30 = smov (!%p152_p3), 16   ;;  %s1110_s8 = smov (!%p152_p3), 64  }
   0x9   : > { %s1111_s11 = smov (!%p152_p3), 80   ;;  %s1113_s21 = smov (!%p152_p3), 112  }
   0xc   : > { %v1106_v0 = vmov 0   ;;  %s1508_s12 = smov (!%p179_p4, %s1096_s12), 1  ;;  %v1073_v1 = vld [vmem:[%s1500_s1 + $0x38] sm:$0xff]   ;;  %vm322_vm0 = vcmask 1045504   ;;  %v1074_v2 = vld [vmem:[%s1500_s1 + $0x30] sm:$0xff]   ;;  %vm264_vm1 = vcmask 1046528  }
   0xd   : > { %692 = vmatprep.subr.bf16.mxu0 %v1106_v0  ;;  %882 = vmatprep.subr.bf16.mxu1 %v1106_v0  ;;  %s900_s18 = smul.u32 80, %s1508_s12  ;;  %vm239_vm2 = vcmask 130048   ;;  %v1075_v37 = vld [vmem:[%s1500_s1 + $0x28] sm:$0xff]   ;;  %v1076_v46 = vld [vmem:[%s1500_s1 + $0x20] sm:$0xff]   ;;  %v1077_v63 = vld [vmem:[%s1500_s1 + $0x18] sm:$0xff]   ;;  %vm313_vm3 = vcmask 261248  }
   0xe   : > { %693 = vmatpush1.bf16.msra.mxu0 %v1073_v1  ;;  %891 = vmatpush1.bf16.msra.mxu1 %v1073_v1  ;;  %vm371_vm4 = vcmask 392448   ;;  %vm405_vm5 = vcmask 523648   ;;  %vm442_vm6 = vcmask 654848   ;;  %vm478_vm7 = vcmask 786048  }
   0xf   : > { %694 = vmatprep.subr.bf16.mxu0 %v1106_v0  ;;  %883 = vmatprep.subr.bf16.mxu1 %v1106_v0  ;;  %s1168_s23 = scalar_lea.vmem %s1499_s0, %s900_s18  ;;  %s1112_s18 = smov 96   ;;  %vm512_vm8 = vcmask 917248   ;;  %vm549_vm9 = vcmask 1048448   ;;  %vm765_vm10 = vcmask 125952  }
  0x10   : > { %v209_v3 = vld [vmem:[%s1168_s23 + $0x28] ss:$8 sps:$4 sm:$0xff]   ;;  %v1173_v5 = vld [vmem:[%s1168_s23] ss:$56 sps:$4 sm:$0xff]   ;;  %v200_v10 = vld [vmem:[%s1168_s23 + $0x4] sm:$0x1] }
  0x11   : > { %v201_v4 = vld [vmem:[%s1168_s23 + $0x8] ss:$8 sps:$4 sm:$0xff]   ;;  %v1175_v6 = vunpack.c.l.bf16 %v209_v3  ;;  %v1177_v7 = vunpack.c.h.bf16 %v209_v3  ;;  %v202_v11 = vld [vmem:[%s1168_s23 + $0xc] sm:$0x1]  ;;  %v1184_v12 = vld [vmem:[%s1168_s23 + $0x18] ss:$8 sps:$4 sm:$0xff]   ;;  %v219_v13 = vunpack.c.l.bf16 %v1173_v5  ;;  %v220_v14 = vunpack.c.l.bf16 %v200_v10 }
  0x12   : > { %v221_v8 = vunpack.c.l.bf16 %v201_v4  ;;  %v1179_v9 = vunpack.c.h.bf16 %v201_v4  ;;  %695 = vmatpush1.bf16.msra.mxu0 %v1074_v2  ;;  %892 = vmatpush1.bf16.msra.mxu1 %v1074_v2  ;;  %v222_v15 = vunpack.c.l.bf16 %v202_v11  ;;  %v208_v16 = vld [vmem:[%s1168_s23 + $0x24] sm:$0x1]  ;;  %v210_v17 = vld [vmem:[%s1168_s23 + $0x2c] sm:$0x1]  ;;  %v1190_v18 = vunpack.c.h.bf16 %v1184_v12  ;;  %v212_v31 = vld [vmem:[%s1168_s23 + $0x34] sm:$0x1] }
  0x13   : > { %696 = vmatprep.subr.bf16.mxu0 %v1106_v0  ;;  %884 = vmatprep.subr.bf16.mxu1 %v1106_v0  ;;  %v938_v19 = vpack.i.bf16 %v1177_v7, %v1175_v6  ;;  %245 = vst.msk [vmem:[#allocation2 + $0x50] sm:$0xff] %vm239_vm2, %v1175_v6  ;;  %246 = vst.msk [vmem:[#allocation2 + $0x60] sm:$0xff] %vm239_vm2, %v1177_v7  ;;  %v323_v23 = vrot.slane %v219_v13, 2  ;;  %v324_v24 = vrot.slane %v220_v14, 2  ;;  %v265_v26 = vrot.slane %v219_v13, 1 }
  0x14   : > { %v933_v20 = vpack.i.bf16 %v1179_v9, %v221_v8  ;;  %v326_v21 = vrot.slane %v221_v8, 2  ;;  %v268_v22 = vrot.slane %v221_v8, 1  ;;  %241 = vst.msk [vmem:[#allocation2 + $0x10] sm:$0xff] %vm239_vm2, %v221_v8  ;;  %242 = vst.msk [vmem:[#allocation2 + $0x20] sm:$0xff] %vm239_vm2, %v1179_v9  ;;  %v327_v25 = vrot.slane %v222_v15, 2 }
  0x15   : > { %240 = vst.msk [vmem:[#allocation2] sm:$0xff] %vm239_vm2, %v219_v13  ;;  %244 = vst.msk [vmem:[#allocation2 + $0x40] sm:$0xff] %vm239_vm2, %v1190_v18  ;;  %939 = vrot.lane.b32.xlu1 %v938_v19, %s1107_s24  ;;  %v266_v27 = vrot.slane %v220_v14, 1  ;;  %v269_v28 = vrot.slane %v222_v15, 1  ;;  %v228_v29 = vunpack.c.l.bf16 %v208_v16  ;;  %v230_v30 = vunpack.c.l.bf16 %v210_v17  ;;  %v204_v36 = vld [vmem:[%s1168_s23 + $0x14] sm:$0x1] }
  0x16   : > { %934 = vrot.lane.b32.xlu0 %v933_v20, %s1107_s24  ;;  %v325_v32 = vsel %vm322_vm0, %v323_v23, %v324_v24  ;;  %v1212_v33 = vsel %vm322_vm0, %v326_v21, %v327_v25  ;;  %v335_v34 = vrot.slane %v1190_v18, 2  ;;  %v338_v35 = vrot.slane %v1175_v6, 2  ;;  %697 = vmatpush1.bf16.msra.mxu0 %v1075_v37  ;;  %v214_v8 = vld [vmem:[%s1168_s23 + $0x3c] sm:$0x1]  ;;  %v1078_v17 = vld [vmem:[%s1500_s1 + $0x10] sm:$0xff]  }
  0x17   : > { %v953_v38 = vpack.i.bf16 %v1212_v33, %v325_v32  ;;  %v267_v39 = vsel %vm264_vm1, %v265_v26, %v266_v27  ;;  %v1223_v40 = vsel %vm264_vm1, %v268_v22, %v269_v28  ;;  %v336_v41 = vrot.slane %v228_v29, 2  ;;  %893 = vmatpush1.bf16.msra.mxu1 %v1075_v37  ;;  %698 = vmatprep.subr.bf16.mxu0 %v1106_v0  ;;  %v206_v15 = vld [vmem:[%s1168_s23 + $0x1c] sm:$0x1]  ;;  %v215_v23 = vld [vmem:[%s1168_s23 + $0x40] ss:$8 sps:$4 sm:$0xff]  }
  0x18   : > { %v943_v42 = vpack.i.bf16 %v1223_v40, %v267_v39  ;;  %v339_v43 = vrot.slane %v230_v30, 2  ;;  %v277_v44 = vrot.slane %v1190_v18, 1  ;;  %v278_v45 = vrot.slane %v228_v29, 1  ;;  %885 = vmatprep.subr.bf16.mxu1 %v1106_v0  ;;  %v1312_v28 = vld [vmem:[%s1168_s23 + $0x44] sm:$0x1] }
  0x19   : > { %954 = vrot.lane.b32.xlu1 %v953_v38, %s1108_s29  ;;  %v1232_v47 = vsel %vm322_vm0, %v335_v34, %v336_v41  ;;  %v280_v48 = vrot.slane %v1175_v6, 1  ;;  %v281_v49 = vrot.slane %v230_v30, 1  ;;  %v232_v50 = vunpack.c.l.bf16 %v212_v31 }
  0x1a   : > { %944 = vrot.lane.b32.xlu0 %v943_v42, %s1109_s30  ;;  %v1238_v51 = vsel %vm322_vm0, %v338_v35, %v339_v43  ;;  %571 = vst.msk [vmem:[#allocation2 + $0x28] sm:$0xff] %vm239_vm2, %v1232_v47  ;;  %v1243_v52 = vsel %vm264_vm1, %v277_v44, %v278_v45  ;;  %v283_v53 = vrot.slane %v1177_v7, 1  ;;  %v224_v54 = vunpack.c.l.bf16 %v204_v36  ;;  %699 = vmatpush1.bf16.msra.mxu0 %v1076_v46 }
  0x1b   : > { %572 = vst.msk [vmem:[#allocation2 + $0x38] sm:$0xff] %vm239_vm2, %v1238_v51  ;;  %v958_v55 = vpack.i.bf16 %v1238_v51, %v1232_v47  ;;  %v282_v56 = vsel %vm264_vm1, %v280_v48, %v281_v49  ;;  %v284_v57 = vrot.slane %v232_v50, 1  ;;  %v271_v58 = vrot.slane %v1179_v9, 1  ;;  %894 = vmatpush1.bf16.msra.mxu1 %v1076_v46  ;;  %700 = vmatprep.subr.bf16.mxu0 %v1106_v0 }
  0x1c   : > { %v1254_v59 = vpack.i.bf16 %v282_v56, %v1243_v52  ;;  %v272_v60 = vrot.slane %v224_v54, 1  ;;  %v341_v61 = vrot.slane %v1177_v7, 2  ;;  %v342_v62 = vrot.slane %v232_v50, 2  ;;  %886 = vmatprep.subr.bf16.mxu1 %v1106_v0 }
  0x1d   : > { %959 = vrot.lane.b32.xlu1 %v958_v55, %s1108_s29  ;;  %v1262_v1 = vsel %vm264_vm1, %v283_v53, %v284_v57  ;;  %v329_v2 = vrot.slane %v1179_v9, 2  ;;  %v330_v3 = vrot.slane %v224_v54, 2  ;;  %v1266_v4 = vunpack.c.h.bf16 %v1173_v5  ;;  %v1081_v53 = vld [vmem:[%s1500_s1 + $0x40] sm:$0xff]  }
  0x1e   : > { %949 = vrot.lane.b32.xlu0 %v1254_v59, %s1109_s30  ;;  %v968_v10 = vpack.i.bf16 %v1262_v1, %v282_v56  ;;  %v1274_v11 = vsel %vm264_vm1, %v271_v58, %v272_v60  ;;  %v1277_v13 = vsel %vm322_vm0, %v341_v61, %v342_v62  ;;  %v1280_v14 = vunpack.c.l.bf16 %v1184_v12  ;;  %701 = vmatpush1.bf16.msra.mxu0 %v1077_v63 }
  0x1f   : > { %v963_v5 = vpack.i.bf16 %v1274_v11, %v1223_v40  ;;  %573 = vst.msk [vmem:[#allocation2 + $0x48] sm:$0xff] %vm239_vm2, %v1277_v13  ;;  %v1289_v16 = vsel %vm322_vm0, %v329_v2, %v330_v3  ;;  %247 = vst.msk [vmem:[#allocation2 + $0x70] sm:$0xff] %vm239_vm2, %v1266_v4  ;;  %v234_v12 = vunpack.c.l.bf16 %v214_v8  ;;  %895 = vmatpush1.bf16.msra.mxu1 %v1077_v63  ;;  %v226_v21 = vunpack.c.l.bf16 %v206_v15  ;;  %v1338_v40 = vld [vmem:[%s1168_s23 + $0x4c] sm:$0x1] }
  0x20   : > { %569 = vst.msk [vmem:[#allocation2 + $0x8] sm:$0xff] %vm239_vm2, %v1289_v16  ;;  %243 = vst.msk [vmem:[#allocation2 + $0x30] sm:$0xff] %vm239_vm2, %v1280_v14  ;;  %v978_v19 = vpack.i.bf16 %v1277_v13, %v1238_v51  ;;  %v973_v20 = vpack.i.bf16 %v1289_v16, %v1212_v33  ;;  %v344_v22 = vrot.slane %v1266_v4, 2  ;;  %702 = vmatprep.subr.bf16.mxu0 %v1106_v0  ;;  %v286_v24 = vrot.slane %v1266_v4, 1  ;;  %v1079_v33 = vld [vmem:[%s1500_s1 + $0x8] sm:$0xff]  }
  0x21   : > { %969 = vrot.lane.b32.xlu1 %v968_v10, %s1110_s8  ;;  %v287_v25 = vrot.slane %v234_v12, 1  ;;  %v345_v26 = vrot.slane %v234_v12, 2  ;;  %v332_v27 = vrot.slane %v1280_v14, 2  ;;  %887 = vmatprep.subr.bf16.mxu1 %v1106_v0  ;;  %v274_v29 = vrot.slane %v1280_v14, 1 }
  0x22   : > { %964 = vrot.lane.b32.xlu0 %v963_v5, %s1110_s8  ;;  %v275_v30 = vrot.slane %v226_v21, 1  ;;  %v333_v31 = vrot.slane %v226_v21, 2  ;;  %703 = vmatpush1.bf16.msra.mxu0 %v1078_v17  ;;  %v988_v34 = vpack.i.bf16 %v1266_v4, %v1177_v7  ;;  %v1327_v35 = vunpack.c.l.bf16 %v215_v23 }
  0x23   : > { %v1317_v32 = vsel %vm322_vm0, %v344_v22, %v345_v26  ;;  %896 = vmatpush1.bf16.msra.mxu1 %v1078_v17  ;;  %v236_v36 = vunpack.c.l.bf16 %v1312_v28  ;;  %v983_v37 = vpack.i.bf16 %v1280_v14, %v1179_v9  ;;  %v288_v38 = vsel %vm264_vm1, %v286_v24, %v287_v25  ;;  %704 = vmatprep.subr.bf16.mxu0 %v1106_v0  ;;  %v1080_v9 = vld [vmem:[%s1500_s1] sm:$0xff]  }
  0x24   : > { %574 = vst.msk [vmem:[#allocation2 + $0x58] sm:$0xff] %vm239_vm2, %v1317_v32  ;;  %v1335_v39 = vsel %vm322_vm0, %v332_v27, %v333_v31  ;;  %v276_v7 = vsel %vm264_vm1, %v274_v29, %v275_v30  ;;  %v451_v41 = vrot.slane %v1327_v35, 2  ;;  %v1345_v43 = vunpack.c.h.bf16 %v215_v23  ;;  %888 = vmatprep.subr.bf16.mxu1 %v1106_v0 }
  0x25   : > { %979 = vrot.lane.b32.xlu1 %v978_v19, %s1111_s11  ;;  %570 = vst.msk [vmem:[#allocation2 + $0x18] sm:$0xff] %vm239_vm2, %v1335_v39  ;;  %v452_v42 = vrot.slane %v236_v36, 2  ;;  %v998_v44 = vpack.i.bf16 %v288_v38, %v1262_v1  ;;  %v238_v48 = vunpack.c.l.bf16 %v1338_v40  ;;  %v993_v49 = vpack.i.bf16 %v276_v7, %v1274_v11 }
  0x26   : > { %974 = vrot.lane.b32.xlu0 %v973_v20, %s1111_s11  ;;  %705 = vmatpush1.bf16.msra.mxu0 %v1079_v33  ;;  %v558_v46 = vrot.slane %v1345_v43, 2  ;;  %v586_v50 = vld [vmem:[#allocation2 + $0x48] sm:$0xff]  ;;  %v1018_v61 = vpack.i.bf16 %v1317_v32, %v1277_v13  ;;  %v1013_v62 = vpack.i.bf16 %v1335_v39, %v1289_v16  ;;  %v416_v63 = vrot.slane %v236_v36, 1 }
  0x27   : > { %897 = vmatpush1.bf16.msra.mxu1 %v1079_v33  ;;  %v453_v45 = vsel %vm322_vm0, %v451_v41, %v452_v42  ;;  %706 = vmatprep.subr.bf16.mxu0 %v1106_v0  ;;  %v559_v51 = vrot.slane %v238_v48, 2  ;;  %v578_v54 = vld [vmem:[#allocation2 + $0x8] sm:$0xff]  ;;  %v1028_v1 = vpack.i.bf16 %v1327_v35, %v1266_v4  ;;  %v1023_v2 = vpack.i.bf16 %v1190_v18, %v1280_v14 }
  0x28   : > { %575 = vst.msk [vmem:[#allocation2 + $0x68] sm:$0xff] %vm239_vm2, %v453_v45  ;;  %889 = vmatprep.subr.bf16.mxu1 %v1106_v0  ;;  %v1033_v10 = vpack.i.bf16 %v1243_v52, %v276_v7  ;;  %v1048_v11 = vpack.i.bf16 %v453_v45, %v1317_v32  ;;  %v1043_v4 = vpack.i.bf16 %v1232_v47, %v1335_v39  ;;  %v522_v13 = vrot.slane %v1345_v43, 1 }
  0x29   : > { %989 = vrot.lane.b32.xlu1 %v988_v34, %s1112_s18  ;;  %v560_v56 = vsel %vm322_vm0, %v558_v46, %v559_v51  ;;  %v523_v14 = vrot.slane %v238_v48, 1  ;;  %v1058_v15 = vpack.i.bf16 %v1345_v43, %v1327_v35  ;;  %v1053_v52 = vpack.i.bf16 %v1175_v6, %v1190_v18 }
  0x2a   : > { %984 = vrot.lane.b32.xlu0 %v983_v37, %s1112_s18  ;;  %707 = vmatpush1.bf16.msra.mxu0 %v1080_v9  ;;  %576 = vst.msk [vmem:[#allocation2 + $0x78] sm:$0xff] %vm239_vm2, %v560_v56 }
  0x2b   : > { %898 = vmatpush1.bf16.msra.mxu1 %v1080_v9  ;;  %v588_v55 = vld [vmem:[#allocation2 + $0x58] sm:$0xff]  ;;  %722 = vmatprep.subr.bf16.mxu0 %v1106_v0  ;;  %v524_v5 = vsel %vm264_vm1, %v522_v13, %v523_v14 }
  0x2c   : > { %v598_v57 = vpack.c.bf16 %v588_v55, %v586_v50  ;;  %890 = vmatprep.subr.bf16.mxu1 %v1106_v0  ;;  %v580_v58 = vld [vmem:[#allocation2 + $0x18] sm:$0xff]  ;;  %v415_v0 = vrot.slane %v1327_v35, 1 }
  0x2d   : > { %999 = vrot.lane.b32.xlu1 %v998_v44, %s1113_s21  ;;  %v594_v60 = vpack.c.bf16 %v580_v58, %v578_v54 }
  0x2e   : > { %994 = vrot.lane.b32.xlu0 %v993_v49, %s1113_s21  ;;  %877 = vmatprep.mubr.msk.bf16.mxu1 %vm239_vm2, %v598_v57  ;;  %v417_v3 = vsel %vm264_vm1, %v415_v0, %v416_v63 }
  0x2f   : > { %723 = vmatpush2.bf16.msra.mxu0 %v1081_v53  ;;  %899 = vmatpush2.bf16.msra.mxu1 %v1081_v53  ;;  %v1038_v8 = vpack.i.bf16 %v417_v3, %v288_v38  ;;  %v1068_v16 = vpack.i.bf16 %v524_v5, %v417_v3 }
  0x30   : > { %875 = vmatprep.mubr.msk.bf16.mxu0 %vm239_vm2, %v594_v60 }
  0x31   : > { %1009 = vrot.lane.b32.xlu1 %v998_v44, %s1109_s30  ;;  %v592_v0 = vld [vmem:[#allocation2 + $0x78] sm:$0xff] }
  0x32   : > { %1004 = vrot.lane.b32.xlu0 %v993_v49, %s1109_s30 }
  0x35   : > { %1019 = vrot.lane.b32.xlu1 %v1018_v61, %s1108_s29 }
  0x36   : > { %1014 = vrot.lane.b32.xlu0 %v1013_v62, %s1108_s29  ;;  %v590_v62 = vld [vmem:[#allocation2 + $0x68] sm:$0xff] }
  0x39   : > { %1029 = vrot.lane.b32.xlu1 %v1028_v1, %s1107_s24  ;;  %v582_v1 = vld [vmem:[#allocation2 + $0x28] sm:$0xff] }
  0x3a   : > { %1024 = vrot.lane.b32.xlu0 %v1023_v2, %s1107_s24  ;;  %v584_v2 = vld [vmem:[#allocation2 + $0x38] sm:$0xff]  ;;  %s881_s24 = sshll.u32 %s1508_s12, 5 }
  0x3b   : > { %s1472_s27 = scalar_lea.vmem %s1502_s3, %s881_s24 }
  0x3d   : > { %1039 = vrot.lane.b32.xlu1 %v1038_v8, %s1110_s8 }
  0x3e   : > { %1034 = vrot.lane.b32.xlu0 %v1033_v10, %s1110_s8 }
  0x41   : > { %1049 = vrot.lane.b32.xlu1 %v1048_v11, %s1111_s11 }
  0x42   : > { %1044 = vrot.lane.b32.xlu0 %v1043_v4, %s1111_s11 }
  0x45   : > { %1059 = vrot.lane.b32.xlu1 %v1058_v15, %s1112_s18  ;;  %v600_v15 = vpack.c.bf16 %v592_v0, %v590_v62 }
  0x46   : > { %1054 = vrot.lane.b32.xlu0 %v1053_v52, %s1112_s18 }
  0x49   : > { %1069 = vrot.lane.b32.xlu1 %v1068_v16, %s1113_s21 }
  0x4a   : > { %1064 = vrot.lane.b32.xlu0 %v1254_v59, %s1113_s21 }
  0x87   : > { %v940_v47 = vpop.permute.xlu1 %939 }
  0x88   : > { %v935_v12 = vpop.permute.xlu0 %934  ;;  %v942_v29 = vunpack.i.h.bf16 %v940_v47  ;;  %v941_v30 = vunpack.i.l.bf16 %v940_v47  ;;  %v596_v47 = vpack.c.bf16 %v584_v2, %v582_v1 }
  0x89   : > { %v937_v22 = vunpack.i.h.bf16 %v935_v12  ;;  %v936_v23 = vunpack.i.l.bf16 %v935_v12 }
  0x8b   : > { %v955_v17 = vpop.permute.xlu1 %954 }
  0x8c   : > { %v957_v19 = vunpack.i.h.bf16 %v955_v17  ;;  %v956_v20 = vunpack.i.l.bf16 %v955_v17  ;;  %v945_v21 = vpop.permute.xlu0 %944 }
  0x8d   : > { %v947_v6 = vunpack.i.h.bf16 %v945_v21  ;;  %v946_v18 = vunpack.i.l.bf16 %v945_v21 }
  0x8f   : > { %315 = vst.msk [vmem:[#allocation2 + $0x10] sm:$0xff] %vm313_vm3, %v947_v6  ;;  %314 = vst.msk [vmem:[#allocation2] sm:$0xff] %vm313_vm3, %v946_v18  ;;  %v960_v24 = vpop.permute.xlu1 %959 }
  0x90   : > { %373 = vst.msk [vmem:[#allocation2 + $0x10] sm:$0xff] %vm371_vm4, %v957_v19  ;;  %372 = vst.msk [vmem:[#allocation2] sm:$0xff] %vm371_vm4, %v956_v20  ;;  %v962_v59 = vunpack.i.h.bf16 %v960_v24  ;;  %v961_v25 = vunpack.i.l.bf16 %v960_v24  ;;  %v950_v26 = vpop.permute.xlu0 %949 }
  0x91   : > { %v952_v27 = vunpack.i.h.bf16 %v950_v26  ;;  %v951_v28 = vunpack.i.l.bf16 %v950_v26  ;;  %406 = vst.msk [vmem:[#allocation2] sm:$0xff] %vm405_vm5, %v936_v23  ;;  %407 = vst.msk [vmem:[#allocation2 + $0x10] sm:$0xff] %vm405_vm5, %v937_v22 }
  0x93   : > { %319 = vst.msk [vmem:[#allocation2 + $0x50] sm:$0xff] %vm313_vm3, %v952_v27  ;;  %318 = vst.msk [vmem:[#allocation2 + $0x40] sm:$0xff] %vm313_vm3, %v951_v28  ;;  %v970_v31 = vpop.permute.xlu1 %969 }
  0x94   : > { %377 = vst.msk [vmem:[#allocation2 + $0x50] sm:$0xff] %vm371_vm4, %v962_v59  ;;  %376 = vst.msk [vmem:[#allocation2 + $0x40] sm:$0xff] %vm371_vm4, %v961_v25  ;;  %v972_v32 = vunpack.i.h.bf16 %v970_v31  ;;  %v971_v33 = vunpack.i.l.bf16 %v970_v31  ;;  %v965_v34 = vpop.permute.xlu0 %964 }
  0x95   : > { %410 = vst.msk [vmem:[#allocation2 + $0x40] sm:$0xff] %vm405_vm5, %v941_v30  ;;  %411 = vst.msk [vmem:[#allocation2 + $0x50] sm:$0xff] %vm405_vm5, %v942_v29  ;;  %v967_v35 = vunpack.i.h.bf16 %v965_v34  ;;  %v966_v36 = vunpack.i.l.bf16 %v965_v34 }
  0x96   : > { %447 = vst.msk [vmem:[#allocation2 + $0x40] sm:$0xff] %vm442_vm6, %v971_v33  ;;  %448 = vst.msk [vmem:[#allocation2 + $0x50] sm:$0xff] %vm442_vm6, %v972_v32 }
  0x97   : > { %443 = vst.msk [vmem:[#allocation2] sm:$0xff] %vm442_vm6, %v966_v36  ;;  %444 = vst.msk [vmem:[#allocation2 + $0x10] sm:$0xff] %vm442_vm6, %v967_v35  ;;  %v980_v37 = vpop.permute.xlu1 %979 }
  0x98   : > { %v982_v38 = vunpack.i.h.bf16 %v980_v37  ;;  %v981_v39 = vunpack.i.l.bf16 %v980_v37  ;;  %v975_v40 = vpop.permute.xlu0 %974 }
  0x99   : > { %v977_v7 = vunpack.i.h.bf16 %v975_v40  ;;  %v976_v41 = vunpack.i.l.bf16 %v975_v40 }
  0x9a   : > { %483 = vst.msk [vmem:[#allocation2 + $0x40] sm:$0xff] %vm478_vm7, %v981_v39  ;;  %484 = vst.msk [vmem:[#allocation2 + $0x50] sm:$0xff] %vm478_vm7, %v982_v38 }
  0x9b   : > { %479 = vst.msk [vmem:[#allocation2] sm:$0xff] %vm478_vm7, %v976_v41  ;;  %480 = vst.msk [vmem:[#allocation2 + $0x10] sm:$0xff] %vm478_vm7, %v977_v7  ;;  %v990_v42 = vpop.permute.xlu1 %989 }
  0x9c   : > { %v992_v43 = vunpack.i.h.bf16 %v990_v42  ;;  %v991_v9 = vunpack.i.l.bf16 %v990_v42  ;;  %v985_v44 = vpop.permute.xlu0 %984 }
  0x9d   : > { %v987_v45 = vunpack.i.h.bf16 %v985_v44  ;;  %v986_v46 = vunpack.i.l.bf16 %v985_v44 }
  0x9e   : > { %517 = vst.msk [vmem:[#allocation2 + $0x40] sm:$0xff] %vm512_vm8, %v991_v9  ;;  %518 = vst.msk [vmem:[#allocation2 + $0x50] sm:$0xff] %vm512_vm8, %v992_v43 }
  0x9f   : > { %513 = vst.msk [vmem:[#allocation2] sm:$0xff] %vm512_vm8, %v986_v46  ;;  %514 = vst.msk [vmem:[#allocation2 + $0x10] sm:$0xff] %vm512_vm8, %v987_v45  ;;  %v1000_v48 = vpop.permute.xlu1 %999 }
  0xa0   : > { %v1002_v49 = vunpack.i.h.bf16 %v1000_v48  ;;  %v1001_v50 = vunpack.i.l.bf16 %v1000_v48  ;;  %v995_v51 = vpop.permute.xlu0 %994 }
  0xa1   : > { %v997_v53 = vunpack.i.h.bf16 %v995_v51  ;;  %v996_v54 = vunpack.i.l.bf16 %v995_v51 }
  0xa2   : > { %554 = vst.msk [vmem:[#allocation2 + $0x40] sm:$0xff] %vm549_vm9, %v1001_v50  ;;  %555 = vst.msk [vmem:[#allocation2 + $0x50] sm:$0xff] %vm549_vm9, %v1002_v49  ;;  %v865_v50 = vld [vmem:[%s1501_s2] ss:$0 sm:$0xff] }
  0xa3   : > { %550 = vst.msk [vmem:[#allocation2] sm:$0xff] %vm549_vm9, %v996_v54  ;;  %551 = vst.msk [vmem:[#allocation2 + $0x10] sm:$0xff] %vm549_vm9, %v997_v53  ;;  %v1010_v55 = vpop.permute.xlu1 %1009 }
  0xa4   : > { %v1012_v56 = vunpack.i.h.bf16 %v1010_v55  ;;  %v1011_v57 = vunpack.i.l.bf16 %v1010_v55  ;;  %v1005_v58 = vpop.permute.xlu0 %1004 }
  0xa5   : > { %v1007_v60 = vunpack.i.h.bf16 %v1005_v58  ;;  %v1006_v61 = vunpack.i.l.bf16 %v1005_v58 }
  0xa6   : > { %321 = vst.msk [vmem:[#allocation2 + $0x70] sm:$0xff] %vm313_vm3, %v1012_v56  ;;  %320 = vst.msk [vmem:[#allocation2 + $0x60] sm:$0xff] %vm313_vm3, %v1011_v57 }
  0xa7   : > { %317 = vst.msk [vmem:[#allocation2 + $0x30] sm:$0xff] %vm313_vm3, %v1007_v60  ;;  %316 = vst.msk [vmem:[#allocation2 + $0x20] sm:$0xff] %vm313_vm3, %v1006_v61  ;;  %v1020_v63 = vpop.permute.xlu1 %1019 }
  0xa8   : > { %v1022_v3 = vunpack.i.h.bf16 %v1020_v63  ;;  %v1021_v8 = vunpack.i.l.bf16 %v1020_v63  ;;  %v1015_v10 = vpop.permute.xlu0 %1014 }
  0xa9   : > { %v1017_v11 = vunpack.i.h.bf16 %v1015_v10  ;;  %v1016_v4 = vunpack.i.l.bf16 %v1015_v10  ;;  %v585_v13 = vld [vmem:[#allocation2 + $0x40] sm:$0xff]  ;;  %v587_v14 = vld [vmem:[#allocation2 + $0x50] sm:$0xff] }
  0xaa   : > { %378 = vst.msk [vmem:[#allocation2 + $0x60] sm:$0xff] %vm371_vm4, %v1021_v8  ;;  %379 = vst.msk [vmem:[#allocation2 + $0x70] sm:$0xff] %vm371_vm4, %v1022_v3  ;;  %v577_v52 = vld [vmem:[#allocation2] sm:$0xff]  ;;  %v579_v5 = vld [vmem:[#allocation2 + $0x10] sm:$0xff]  ;;  %v597_v16 = vpack.c.bf16 %v587_v14, %v585_v13 }
  0xab   : > { %374 = vst.msk [vmem:[#allocation2 + $0x20] sm:$0xff] %vm371_vm4, %v1016_v4  ;;  %375 = vst.msk [vmem:[#allocation2 + $0x30] sm:$0xff] %vm371_vm4, %v1017_v11  ;;  %v1030_v12 = vpop.permute.xlu1 %1029  ;;  %v593_v17 = vpack.c.bf16 %v579_v5, %v577_v52 }
  0xac   : > { %v1032_v19 = vunpack.i.h.bf16 %v1030_v12  ;;  %v1031_v20 = vunpack.i.l.bf16 %v1030_v12  ;;  %v1025_v21 = vpop.permute.xlu0 %1024  ;;  %741 = vmatmul.mubr.bf16.vlgmr.msra.gmra.mxu1 %v597_v16 }
  0xad   : > { %v1027_v6 = vunpack.i.h.bf16 %v1025_v21  ;;  %v1026_v18 = vunpack.i.l.bf16 %v1025_v21  ;;  %725 = vmatmul.mubr.bf16.vlgmr.msra.gmra.mxu0 %v593_v17  ;;  %878 = vmatprep.mubr.msk.bf16.mxu1 %vm239_vm2, %v600_v15 }
  0xae   : > { %412 = vst.msk [vmem:[#allocation2 + $0x60] sm:$0xff] %vm405_vm5, %v1031_v20  ;;  %413 = vst.msk [vmem:[#allocation2 + $0x70] sm:$0xff] %vm405_vm5, %v1032_v19  ;;  %876 = vmatprep.mubr.msk.bf16.mxu0 %vm239_vm2, %v596_v47 }
  0xaf   : > { %408 = vst.msk [vmem:[#allocation2 + $0x20] sm:$0xff] %vm405_vm5, %v1026_v18  ;;  %409 = vst.msk [vmem:[#allocation2 + $0x30] sm:$0xff] %vm405_vm5, %v1027_v6  ;;  %v1040_v22 = vpop.permute.xlu1 %1039 }
  0xb0   : > { %v1042_v23 = vunpack.i.h.bf16 %v1040_v22  ;;  %v1041_v24 = vunpack.i.l.bf16 %v1040_v22  ;;  %v1035_v59 = vpop.permute.xlu0 %1034 }
  0xb1   : > { %v1037_v25 = vunpack.i.h.bf16 %v1035_v59  ;;  %v1036_v26 = vunpack.i.l.bf16 %v1035_v59 }
  0xb2   : > { %449 = vst.msk [vmem:[#allocation2 + $0x60] sm:$0xff] %vm442_vm6, %v1041_v24  ;;  %450 = vst.msk [vmem:[#allocation2 + $0x70] sm:$0xff] %vm442_vm6, %v1042_v23 }
  0xb3   : > { %445 = vst.msk [vmem:[#allocation2 + $0x20] sm:$0xff] %vm442_vm6, %v1036_v26  ;;  %446 = vst.msk [vmem:[#allocation2 + $0x30] sm:$0xff] %vm442_vm6, %v1037_v25  ;;  %v1050_v27 = vpop.permute.xlu1 %1049 }
  0xb4   : > { %v1052_v28 = vunpack.i.h.bf16 %v1050_v27  ;;  %v1051_v29 = vunpack.i.l.bf16 %v1050_v27  ;;  %v1045_v30 = vpop.permute.xlu0 %1044 }
  0xb5   : > { %v1047_v31 = vunpack.i.h.bf16 %v1045_v30  ;;  %v1046_v32 = vunpack.i.l.bf16 %v1045_v30 }
  0xb6   : > { %485 = vst.msk [vmem:[#allocation2 + $0x60] sm:$0xff] %vm478_vm7, %v1051_v29  ;;  %486 = vst.msk [vmem:[#allocation2 + $0x70] sm:$0xff] %vm478_vm7, %v1052_v28 }
  0xb7   : > { %481 = vst.msk [vmem:[#allocation2 + $0x20] sm:$0xff] %vm478_vm7, %v1046_v32  ;;  %482 = vst.msk [vmem:[#allocation2 + $0x30] sm:$0xff] %vm478_vm7, %v1047_v31  ;;  %v1060_v33 = vpop.permute.xlu1 %1059 }
  0xb8   : > { %v1062_v34 = vunpack.i.h.bf16 %v1060_v33  ;;  %v1061_v35 = vunpack.i.l.bf16 %v1060_v33  ;;  %v1055_v36 = vpop.permute.xlu0 %1054 }
  0xb9   : > { %v1057_v37 = vunpack.i.h.bf16 %v1055_v36  ;;  %v1056_v38 = vunpack.i.l.bf16 %v1055_v36 }
  0xba   : > { %519 = vst.msk [vmem:[#allocation2 + $0x60] sm:$0xff] %vm512_vm8, %v1061_v35  ;;  %520 = vst.msk [vmem:[#allocation2 + $0x70] sm:$0xff] %vm512_vm8, %v1062_v34 }
  0xbb   : > { %515 = vst.msk [vmem:[#allocation2 + $0x20] sm:$0xff] %vm512_vm8, %v1056_v38  ;;  %516 = vst.msk [vmem:[#allocation2 + $0x30] sm:$0xff] %vm512_vm8, %v1057_v37  ;;  %v1070_v39 = vpop.permute.xlu1 %1069 }
  0xbc   : > { %v1072_v40 = vunpack.i.h.bf16 %v1070_v39  ;;  %v1071_v7 = vunpack.i.l.bf16 %v1070_v39  ;;  %v1065_v41 = vpop.permute.xlu0 %1064 }
  0xbd   : > { %v1067_v42 = vunpack.i.h.bf16 %v1065_v41  ;;  %v1066_v43 = vunpack.i.l.bf16 %v1065_v41 }
  0xbe   : > { %556 = vst.msk [vmem:[#allocation2 + $0x60] sm:$0xff] %vm549_vm9, %v1071_v7  ;;  %557 = vst.msk [vmem:[#allocation2 + $0x70] sm:$0xff] %vm549_vm9, %v1072_v40 }
  0xbf   : > { %552 = vst.msk [vmem:[#allocation2 + $0x20] sm:$0xff] %vm549_vm9, %v1066_v43  ;;  %553 = vst.msk [vmem:[#allocation2 + $0x30] sm:$0xff] %vm549_vm9, %v1067_v42 }
  0xc5   : > { %v589_v9 = vld [vmem:[#allocation2 + $0x60] sm:$0xff]  ;;  %v591_v44 = vld [vmem:[#allocation2 + $0x70] sm:$0xff] }
  0xc6   : > { %v581_v45 = vld [vmem:[#allocation2 + $0x20] sm:$0xff]  ;;  %v583_v46 = vld [vmem:[#allocation2 + $0x30] sm:$0xff]  ;;  %v599_v48 = vpack.c.bf16 %v591_v44, %v589_v9 }
  0xc7   : > { %v595_v49 = vpack.c.bf16 %v583_v46, %v581_v45 }
  0xc8   : > { %749 = vmatmul.mubr.bf16.gmra.mxu1 %v599_v48 }
  0xc9   : > { %733 = vmatmul.mubr.bf16.gmra.mxu0 %v595_v49 }
 0x16c   : > { %v742_v51 = vpop.f32.mrf.mxu1 }
 0x16d   : > { %v726_v53 = vpop.f32.mrf.mxu0  ;;  %v743_v54 = vadd.f32 %v865_v50, %v742_v51 }
 0x16e   : > { %v727_v55 = vadd.f32 %v865_v50, %v726_v53  ;;  %v744_v56 = vpop.f32.mrf.mxu1 }
 0x16f   : > { %v761_v57 = vpack.c.bf16 %v743_v54, %v743_v54  ;;  %v728_v58 = vpop.f32.mrf.mxu0 }
 0x170   : > { %v757_v60 = vpack.c.bf16 %v727_v55, %v727_v55  ;;  %v745_v61 = vpop.f32.mrf.mxu1 }
 0x171   : > { %770 = vst.msk [vmem:[%s1472_s27 + $0x10] sm:$0xf] %vm765_vm10, %v761_v57  ;;  %v729_v62 = vpop.f32.mrf.mxu0  ;;  %v746_v0 = vadd.f32 %v865_v50, %v745_v61 }
 0x172   : > { %766 = vst.msk [vmem:[%s1472_s27] sm:$0xf] %vm765_vm10, %v757_v60  ;;  %v730_v63 = vadd.f32 %v865_v50, %v729_v62  ;;  %v747_v1 = vpop.f32.mrf.mxu1 }
 0x173   : > { %v762_v2 = vpack.c.bf16 %v746_v0, %v746_v0  ;;  %v731_v3 = vpop.f32.mrf.mxu0 }
 0x174   : > { %v758_v8 = vpack.c.bf16 %v730_v63, %v730_v63 }
 0x175   : > { %771 = vst.msk [vmem:[%s1472_s27 + $0x14] sm:$0xf] %vm765_vm10, %v762_v2 }
 0x176   : > { %767 = vst.msk [vmem:[%s1472_s27 + $0x4] sm:$0xf] %vm765_vm10, %v758_v8 }
 0x188   : > { %v750_v10 = vpop.f32.mrf.mxu1 }
 0x189   : > { %v734_v11 = vpop.f32.mrf.mxu0  ;;  %v751_v4 = vadd.f32 %v865_v50, %v750_v10 }
 0x18a   : > { %v735_v13 = vadd.f32 %v865_v50, %v734_v11  ;;  %v752_v14 = vpop.f32.mrf.mxu1 }
 0x18b   : > { %v763_v15 = vpack.c.bf16 %v751_v4, %v751_v4  ;;  %v736_v52 = vpop.f32.mrf.mxu0 }
 0x18c   : > { %v759_v5 = vpack.c.bf16 %v735_v13, %v735_v13  ;;  %v753_v16 = vpop.f32.mrf.mxu1 }
 0x18d   : > { %772 = vst.msk [vmem:[%s1472_s27 + $0x18] sm:$0xf] %vm765_vm10, %v763_v15  ;;  %v737_v47 = vpop.f32.mrf.mxu0  ;;  %v754_v12 = vadd.f32 %v865_v50, %v753_v16 }
 0x18e   : > { %768 = vst.msk [vmem:[%s1472_s27 + $0x8] sm:$0xf] %vm765_vm10, %v759_v5  ;;  %v738_v17 = vadd.f32 %v865_v50, %v737_v47  ;;  %v755_v19 = vpop.f32.mrf.mxu1 }
 0x18f   : > { %v764_v20 = vpack.c.bf16 %v754_v12, %v754_v12  ;;  %v739_v21 = vpop.f32.mrf.mxu0 }
 0x190   : > { %v760_v6 = vpack.c.bf16 %v738_v17, %v738_v17 }
 0x191   : > { %773 = vst.msk [vmem:[%s1472_s27 + $0x1c] sm:$0xf] %vm765_vm10, %v764_v20 }
 0x192   : > { %769 = vst.msk [vmem:[%s1472_s27 + $0xc] sm:$0xf] %vm765_vm10, %v760_v6 }
 0x193 PF: > { %s13_s14 = sadd.s32 1, %s1104_s14   ;;  %s1503_s12 = smov %s1100_s13 }
 0x194   : > { %p10_p5 = scmp.ge.s32.totalorder %s13_s14, 4   ;;  %s1504_s13 = smov %s1506_s15 }
 0x196   :  { %12 = sbr.rel (!%p10_p5) target bundleno = 2 (0x2), region = 63 }

</bundles_post_ra>
